<compile_context>
chip_gen: v7x
topology: tpu7x:2x2x1
jax: 0.10.0
libtpu: 0.0.40
codegen_flags: <defaults>
</compile_context>

<pallas_src>
from functools import partial
import math

import jax
import jax.numpy as jnp
from jax.experimental import pallas as pl
from jax.experimental.pallas import tpu as pltpu


# ----------------------------------------------------------------------------
# Fused kernel: preprocess + block-diagonal 1x1-conv head + sigmoid + nms().
#   x_ref     : (tg, G*3)            raw pixels for G pixels per row (0..255)
#   w_ref     : (G*3, 2*(bw+sw))     block-diag head weights (1/255 folded in)
#   b_ref     : (1,   2*(bw+sw))     bias, tiled per pixel
#   sign_ref  : (1, bw)              [-0.5,-0.5,+0.5,+0.5] per anchor/pixel
#   boxes_ref : (tg, bw)             xyxy boxes, pixel-major / anchor-major
#   scores_ref: (tg, sw)             conf * class probabilities
# where bw = G*A*4 and sw = G*A*nc are multiples of 128 (lane-dense).
# ----------------------------------------------------------------------------
def _fused_detect_kernel(x_ref, w_ref, b_ref, sign_ref, boxes_ref, scores_ref):
    bw = boxes_ref.shape[-1]
    sw = scores_ref.shape[-1]

    # One MXU matmul produces all four head sections for G pixels at once.
    z = jnp.dot(x_ref[...], w_ref[...], preferred_element_type=jnp.float32)
    z = z + b_ref[...]

    # sigmoid(z) == 0.5*tanh(0.5*z) + 0.5 : one EUP push per element.
    s = 0.5 * jnp.tanh(0.5 * z) + 0.5

    # Section boundaries (0, bw, 2*bw, 2*bw+sw) are all multiples of 128, so
    # these are clean vreg-column slices (no lane shifts).
    xy = s[:, :bw]                     # [x, y, x, y] per anchor
    wh = s[:, bw:2 * bw]               # [w, h, w, h] per anchor
    cf = s[:, 2 * bw:2 * bw + sw]      # objectness duplicated per class
    cl = s[:, 2 * bw + sw:]            # class probabilities

    # xywh2xyxy == [x - w/2, y - h/2, x + w/2, y + h/2]
    boxes_ref[...] = (xy + sign_ref[...] * wh).astype(boxes_ref.dtype)
    scores_ref[...] = (cf * cl).astype(scores_ref.dtype)


# ----------------------------------------------------------------------------
# Wrapper-side parameter packing: fold 1/255 into the weights, gather/duplicate
# head columns into the [xy | wh | conf | cls] layout and build the per-group
# block-diagonal matrix so the kernel needs no lane routing at all.
# ----------------------------------------------------------------------------
def _pack_head_params(w, b, A, nc, G):
    C, D = w.shape
    no = 5 + nc
    assert D == A * no and b.shape == (1, D)
    ws = w * (1.0 / 255.0)                      # fold preprocess into weights

    xy_cols = [a * no + c for a in range(A) for c in (0, 1, 0, 1)]
    wh_cols = [a * no + c for a in range(A) for c in (2, 3, 2, 3)]
    cf_cols = [a * no + 4 for a in range(A) for _ in range(nc)]
    cl_cols = [a * no + 5 + k for a in range(A) for k in range(nc)]

    eye = jnp.eye(G, dtype=ws.dtype)

    def block_diag(cols):
        sel = jnp.asarray(cols, jnp.int32)
        small = ws[:, sel]                                   # (C, wid)
        big = jnp.einsum('gh,cw->gchw', eye, small)          # (G, C, G, wid)
        return big.reshape(G * C, G * len(cols))

    def tiled_bias(cols):
        sel = jnp.asarray(cols, jnp.int32)
        return jnp.tile(b[:, sel], (1, G))                   # (1, G*wid)

    sections = (xy_cols, wh_cols, cf_cols, cl_cols)
    W_big = jnp.concatenate([block_diag(c) for c in sections], axis=1)
    b_big = jnp.concatenate([tiled_bias(c) for c in sections], axis=1)
    sign = jnp.tile(jnp.asarray([-0.5, -0.5, 0.5, 0.5], jnp.float32),
                    (G * A,)).reshape(1, G * A * 4)
    return W_big, b_big, sign


def _pixel_group(A, nc):
    # Smallest G such that both output widths are multiples of 128 lanes.
    g_box = 128 // math.gcd(128, 4 * A)
    g_cls = 128 // math.gcd(128, A * nc)
    return (g_box * g_cls) // math.gcd(g_box, g_cls)


def _choose_row_tile(Mg, tg_max, row_mult):
    """Pick a row tile (multiple of row_mult). Prefer divisors of Mg (no
    padding / no post-slice copy) that give >= 2 grid steps (v7x megacore)."""
    tg_max = max(row_mult, (tg_max // row_mult) * row_mult)
    hi = min(tg_max, (Mg // row_mult) * row_mult)
    lo = min(64, hi)
    for tg in range(hi, lo - 1, -row_mult):          # pass 1: divisor, >=2 steps
        if tg > 0 and Mg % tg == 0 and Mg // tg >= 2:
            return tg, Mg
    for tg in range(hi, lo - 1, -row_mult):          # pass 2: any divisor
        if tg > 0 and Mg % tg == 0:
            return tg, Mg
    tg = max(row_mult, min(tg_max, 128, pl.cdiv(Mg, row_mult) * row_mult))
    return tg, pl.cdiv(Mg, tg) * tg                  # pass 3: pad


# ----------------------------------------------------------------------------
# Wrapper
# ----------------------------------------------------------------------------
@partial(jax.jit, static_argnames=("num_anchors", "num_classes", "group",
                                   "tg_max", "out_dtype"))
def yolo_v5_detector(x_img, w, b, *, num_anchors=3, num_classes=12,
                     group=None, tg_max=256, out_dtype=jnp.float32):
    B, H, W_img, C = x_img.shape
    A, nc = num_anchors, num_classes
    N = H * W_img * A
    M = B * H * W_img                           # total pixels

    G = group if group is not None else _pixel_group(A, nc)
    bw = G * A * 4                              # lane-dense box width
    sw = G * A * nc                             # lane-dense score width
    Gin = G * C
    Wtot = 2 * (bw + sw)

    W_big, b_big, sign = _pack_head_params(w, b, A, nc, G)

    # Sub-32-bit outputs need a 16-row sublane tile.
    row_mult = 8 if jnp.dtype(out_dtype).itemsize >= 4 else 16
    Mg = pl.cdiv(M, G)                          # group rows (G pixels each)
    tg, Mg_pad = _choose_row_tile(Mg, tg_max, row_mult)
    M_pad = Mg_pad * G

    x_flat = x_img.reshape(M, C).astype(jnp.float32)
    if M_pad != M:
        x_flat = jnp.pad(x_flat, ((0, M_pad - M), (0, 0)))
    x_g = x_flat.reshape(Mg_pad, Gin)           # G pixels per kernel row

    def const_spec(shape):                      # small resident constants
        return pl.BlockSpec(shape, lambda i: (0, 0))

    boxes_g, scores_g = pl.pallas_call(
        _fused_detect_kernel,
        out_shape=(
            jax.ShapeDtypeStruct((Mg_pad, bw), out_dtype),
            jax.ShapeDtypeStruct((Mg_pad, sw), out_dtype),
        ),
        grid_spec=pl.GridSpec(
            grid=(Mg_pad // tg,),
            in_specs=[
                pl.BlockSpec((tg, Gin), lambda i: (i, 0)),
                const_spec((Gin, Wtot)),
                const_spec((1, Wtot)),
                const_spec((1, bw)),
            ],
            out_specs=(
                pl.BlockSpec((tg, bw), lambda i: (i, 0)),
                pl.BlockSpec((tg, sw), lambda i: (i, 0)),
            ),
        ),
        compiler_params=pltpu.CompilerParams(
            dimension_semantics=("parallel",),
            vmem_limit_bytes=32 * 1024 * 1024),
    )(x_g, W_big, b_big, sign)

    # Per-row layout is pixel-major then anchor-major, so these reshapes are
    # pure contiguous views; the [:M*A] slice only exists on the padded path.
    boxes_det = boxes_g.reshape(M_pad * A, 4)
    scores_det = scores_g.reshape(M_pad * A, nc)
    if M_pad != M:
        boxes_det = boxes_det[: M * A]
        scores_det = scores_det[: M * A]
    boxes = boxes_det.reshape(B, N, 4)[:, :, None, :]   # torch: unsqueeze(2)
    scores = scores_det.reshape(B, N, nc)
    return boxes, scores


# ----------------------------------------------------------------------------
# Pure-JAX reference (correctness sanity check)
# ----------------------------------------------------------------------------
def _reference(x_img, w, b, num_anchors, num_classes):
    B, H, W_img, C = x_img.shape
    pred = jax.nn.sigmoid(x_img.reshape(-1, C) / 255.0 @ w + b)
    pred = pred.reshape(B, H * W_img * num_anchors, 5 + num_classes)
    bx = pred[..., :4]
    x0, x1, x2, x3 = bx[..., 0:1], bx[..., 1:2], bx[..., 2:3], bx[..., 3:4]
    boxes = jnp.concatenate(
        (x0 - x2 / 2, x1 - x3 / 2, x0 + x2 / 2, x1 + x3 / 2), axis=-1)
    scores = pred[..., 4:5] * pred[..., 5:]
    return boxes[:, :, None, :], scores


if __name__ == "__main__":
    B, H, W, C = 2, 48, 48, 3          # small NHWC image batch (as torch sees)
    num_anchors, num_classes = 3, 12
    D = num_anchors * (5 + num_classes)

    key = jax.random.PRNGKey(0)
    kx, kw, kb = jax.random.split(key, 3)

    x_img = jax.random.uniform(kx, (B, H, W, C), jnp.float32, 0.0, 255.0)
    w = jax.random.normal(kw, (C, D), jnp.float32) * 0.5
    b = jax.random.normal(kb, (1, D), jnp.float32) * 0.1

    boxes, scores = yolo_v5_detector(
        x_img, w, b, num_anchors=num_anchors, num_classes=num_classes)
    jax.block_until_ready((boxes, scores))

    ref_boxes, ref_scores = _reference(x_img, w, b, num_anchors, num_classes)
    N = H * W * num_anchors
    assert boxes.shape == (B, N, 1, 4)
    assert scores.shape == (B, N, num_classes)
    # Tolerance covers MXU multi-pass f32 rounding of the block-diag matmul.
    assert jnp.allclose(boxes, ref_boxes, atol=2e-3, rtol=2e-3)
    assert jnp.allclose(scores, ref_scores, atol=2e-3, rtol=2e-3)

    print("KERNEL_OK")
</pallas_src>

<mosaic_0001>
module attributes {stable_mosaic.version = 11 : i64} {
  func.func @_fused_detect_kernel(%arg0: i32, %arg1: memref<72x96xf32, #tpu.memory_space<vmem>>, %arg2: memref<96x3072xf32, #tpu.memory_space<vmem>>, %arg3: memref<1x3072xf32, #tpu.memory_space<vmem>>, %arg4: memref<1x384xf32, #tpu.memory_space<vmem>>, %arg5: memref<72x384xf32, #tpu.memory_space<vmem>>, %arg6: memref<72x1152xf32, #tpu.memory_space<vmem>>) attributes {dimension_semantics = [#tpu.dimension_semantics<parallel>], iteration_bounds = array<i64: 2>, scalar_prefetch = 0 : i64, scratch_operands = 0 : i64, tpu.core_type = #tpu.core_type<tc>, window_params = [{transform_indices = @transform_0, window_bounds = array<i64: 72, 96>}, {pipeline_mode = #tpu.pipeline_mode<synchronous>, transform_indices = @transform_1, window_bounds = array<i64: 96, 3072>}, {pipeline_mode = #tpu.pipeline_mode<synchronous>, transform_indices = @transform_2, window_bounds = array<i64: 1, 3072>}, {pipeline_mode = #tpu.pipeline_mode<synchronous>, transform_indices = @transform_3, window_bounds = array<i64: 1, 384>}, {transform_indices = @transform_4, window_bounds = array<i64: 72, 384>}, {transform_indices = @transform_5, window_bounds = array<i64: 72, 1152>}]} {
    %c0 = arith.constant 0 : index
    %c0_0 = arith.constant 0 : index
    %0 = vector.load %arg1[%c0, %c0_0] : memref<72x96xf32, #tpu.memory_space<vmem>>, vector<72x96xf32>
    %c0_1 = arith.constant 0 : index
    %c0_2 = arith.constant 0 : index
    %1 = vector.load %arg2[%c0_1, %c0_2] : memref<96x3072xf32, #tpu.memory_space<vmem>>, vector<96x3072xf32>
    %cst = arith.constant dense<0.000000e+00> : vector<72x3072xf32>
    %2 = tpu.matmul %0, %1, %cst {dimension_numbers = #tpu.dot_dimension_numbers<[1], [0], [0], [1], [0, 0, 1, 1], [], []>} : vector<72x96xf32>, vector<96x3072xf32>, vector<72x3072xf32> -> vector<72x3072xf32>
    %c0_3 = arith.constant 0 : index
    %c0_4 = arith.constant 0 : index
    %3 = vector.load %arg3[%c0_3, %c0_4] : memref<1x3072xf32, #tpu.memory_space<vmem>>, vector<1x3072xf32>
    %4 = vector.broadcast %3 : vector<1x3072xf32> to vector<72x3072xf32>
    %5 = arith.addf %2, %4 : vector<72x3072xf32>
    %cst_5 = arith.constant 5.000000e-01 : f32
    %6 = vector.broadcast %cst_5 : f32 to vector<72x3072xf32>
    %7 = arith.mulf %6, %5 : vector<72x3072xf32>
    %8 = math.tanh %7 : vector<72x3072xf32>
    %cst_6 = arith.constant 5.000000e-01 : f32
    %9 = vector.broadcast %cst_6 : f32 to vector<72x3072xf32>
    %10 = arith.mulf %9, %8 : vector<72x3072xf32>
    %cst_7 = arith.constant 5.000000e-01 : f32
    %11 = vector.broadcast %cst_7 : f32 to vector<72x3072xf32>
    %12 = arith.addf %10, %11 : vector<72x3072xf32>
    %13 = vector.extract_strided_slice %12 {offsets = [0, 0], sizes = [72, 384], strides = [1, 1]} : vector<72x3072xf32> to vector<72x384xf32>
    %14 = vector.extract_strided_slice %12 {offsets = [0, 384], sizes = [72, 384], strides = [1, 1]} : vector<72x3072xf32> to vector<72x384xf32>
    %15 = vector.extract_strided_slice %12 {offsets = [0, 768], sizes = [72, 1152], strides = [1, 1]} : vector<72x3072xf32> to vector<72x1152xf32>
    %16 = vector.extract_strided_slice %12 {offsets = [0, 1920], sizes = [72, 1152], strides = [1, 1]} : vector<72x3072xf32> to vector<72x1152xf32>
    %c0_8 = arith.constant 0 : index
    %c0_9 = arith.constant 0 : index
    %17 = vector.load %arg4[%c0_8, %c0_9] : memref<1x384xf32, #tpu.memory_space<vmem>>, vector<1x384xf32>
    %18 = vector.broadcast %17 : vector<1x384xf32> to vector<72x384xf32>
    %19 = arith.mulf %18, %14 : vector<72x384xf32>
    %20 = arith.addf %13, %19 : vector<72x384xf32>
    %c0_10 = arith.constant 0 : index
    %c0_11 = arith.constant 0 : index
    %21 = vector.load %arg5[%c0_10, %c0_11] : memref<72x384xf32, #tpu.memory_space<vmem>>, vector<72x384xf32>
    tpu.vector_store %arg5[%c0_10, %c0_11], %20 {strides = array<i32>} : memref<72x384xf32, #tpu.memory_space<vmem>>, vector<72x384xf32>,
    %22 = arith.mulf %15, %16 : vector<72x1152xf32>
    %c0_12 = arith.constant 0 : index
    %c0_13 = arith.constant 0 : index
    %23 = vector.load %arg6[%c0_12, %c0_13] : memref<72x1152xf32, #tpu.memory_space<vmem>>, vector<72x1152xf32>
    tpu.vector_store %arg6[%c0_12, %c0_13], %22 {strides = array<i32>} : memref<72x1152xf32, #tpu.memory_space<vmem>>, vector<72x1152xf32>,
    return
  }
  func.func @transform_0(%arg0: i32) -> (i32, i32) {
    %c0_i32 = arith.constant 0 : i32
    %c0_i32_0 = arith.constant 0 : i32
    return %arg0, %c0_i32 : i32, i32
  }
  func.func @transform_1(%arg0: i32) -> (i32, i32) {
    %c0_i32 = arith.constant 0 : i32
    %c0_i32_0 = arith.constant 0 : i32
    %c0_i32_1 = arith.constant 0 : i32
    return %c0_i32, %c0_i32_0 : i32, i32
  }
  func.func @transform_2(%arg0: i32) -> (i32, i32) {
    %c0_i32 = arith.constant 0 : i32
    %c0_i32_0 = arith.constant 0 : i32
    %c0_i32_1 = arith.constant 0 : i32
    return %c0_i32, %c0_i32_0 : i32, i32
  }
  func.func @transform_3(%arg0: i32) -> (i32, i32) {
    %c0_i32 = arith.constant 0 : i32
    %c0_i32_0 = arith.constant 0 : i32
    %c0_i32_1 = arith.constant 0 : i32
    return %c0_i32, %c0_i32_0 : i32, i32
  }
  func.func @transform_4(%arg0: i32) -> (i32, i32) {
    %c0_i32 = arith.constant 0 : i32
    %c0_i32_0 = arith.constant 0 : i32
    return %arg0, %c0_i32 : i32, i32
  }
  func.func @transform_5(%arg0: i32) -> (i32, i32) {
    %c0_i32 = arith.constant 0 : i32
    %c0_i32_0 = arith.constant 0 : i32
    return %arg0, %c0_i32 : i32, i32
  }
}

</mosaic_0001>

<bundles_post_ra>
// kernel: tile.46
= control target key start
LH: loop header
LB: loop body
LE: loop exit
PB: predicated region body
PF: predicated region fallthrough
CT: control target
= control target key end

     0   :  { %s88_s0 = inlined_call_operand.vmem [shape: f32[4], index: 0, kind: input, shape index: {}]   ;;  %s89_s1 = inlined_call_operand.vmem [shape: f32[96,4], index: 1, kind: output, shape index: {}]  }
   0x1   :  { %v4_v0 = vld [vmem:[%s88_s0] ss:$0 sm:$0xff] }
   0x2   :  { %5 = vst [vmem:[%s89_s1] sm:$0xff] %v4_v0  ;;  %28 = vst [vmem:[%s89_s1 + $0x8] sm:$0xff] %v4_v0 }
   0x3   :  { %29 = vst [vmem:[%s89_s1 + $0x10] sm:$0xff] %v4_v0  ;;  %30 = vst [vmem:[%s89_s1 + $0x18] sm:$0xff] %v4_v0 }
   0x4   :  { %31 = vst [vmem:[%s89_s1 + $0x20] sm:$0xff] %v4_v0  ;;  %32 = vst [vmem:[%s89_s1 + $0x28] sm:$0xff] %v4_v0 }
   0x5   :  { %33 = vst [vmem:[%s89_s1 + $0x30] sm:$0xff] %v4_v0  ;;  %34 = vst [vmem:[%s89_s1 + $0x38] sm:$0xff] %v4_v0 }
   0x6   :  { %35 = vst [vmem:[%s89_s1 + $0x40] sm:$0xff] %v4_v0  ;;  %36 = vst [vmem:[%s89_s1 + $0x48] sm:$0xff] %v4_v0 }
   0x7   :  { %37 = vst [vmem:[%s89_s1 + $0x50] sm:$0xff] %v4_v0  ;;  %38 = vst [vmem:[%s89_s1 + $0x58] sm:$0xff] %v4_v0 }

// kernel: tile.47
= control target key start
LH: loop header
LB: loop body
LE: loop exit
PB: predicated region body
PF: predicated region fallthrough
CT: control target
= control target key end

     0   :  { %vm5_vm0 = vcmask 1041409   ;;  %vm9_vm1 = vcmask 1042434   ;;  %s593_s20 = smov 124   ;;  %s594_s2 = smov 116   ;;  %vm11_vm2 = vcmask 31744   ;;  %vm25_vm3 = vcmask 1048544   ;;  %s995_s0 = inlined_call_operand.vmem [shape: f32[96,4], index: 0, kind: input, shape index: {}]   ;;  %s996_s1 = inlined_call_operand.vmem [shape: f32[1,384], index: 1, kind: output, shape index: {}]  }
   0x1   :  { %v467_v0 = vld [vmem:[%s995_s0 + $0x1f] sm:$0x1]   ;;  %v473_v4 = vld [vmem:[%s995_s0 + $0x1d] sm:$0x1]   ;;  %v470_v8 = vld [vmem:[%s995_s0 + $0x1e] sm:$0x1]  }
   0x2   :  { %v468_v1 = vld [vmem:[%s995_s0 + $0x3e] sm:$0x2]   ;;  %v474_v6 = vld [vmem:[%s995_s0 + $0x3c] sm:$0x2]   ;;  %v471_v10 = vld [vmem:[%s995_s0 + $0x3d] sm:$0x2]  }
   0x3   :  { %v18_v2 = vsel %vm5_vm0, %v468_v1, %v467_v0  ;;  %v469_v3 = vld [vmem:[%s995_s0 + $0x5d] sm:$0x4]   ;;  %v475_v7 = vld [vmem:[%s995_s0 + $0x5b] sm:$0x4]   ;;  %v46_v9 = vsel %vm5_vm0, %v474_v6, %v473_v4  ;;  %v472_v11 = vld [vmem:[%s995_s0 + $0x5c] sm:$0x4]   ;;  %v32_v13 = vsel %vm5_vm0, %v471_v10, %v470_v8 }
   0x4   :  { %v22_v5 = vsel %vm9_vm1, %v469_v3, %v18_v2  ;;  %v50_v12 = vsel %vm9_vm1, %v475_v7, %v46_v9  ;;  %v476_v14 = vld [vmem:[%s995_s0 + $0x1c] sm:$0x1]   ;;  %v36_v17 = vsel %vm9_vm1, %v472_v11, %v32_v13  ;;  %v479_v19 = vld [vmem:[%s995_s0 + $0x1b] sm:$0x1]   ;;  %v482_v24 = vld [vmem:[%s995_s0 + $0x1a] sm:$0x1]  }
   0x5   :  { %23 = vrot.lane.b32.xlu0 %v22_v5, %s593_s20  ;;  %v477_v15 = vld [vmem:[%s995_s0 + $0x3b] sm:$0x2]   ;;  %51 = vrot.lane.b32.xlu1 %v50_v12, %s594_s2  ;;  %v480_v20 = vld [vmem:[%s995_s0 + $0x3a] sm:$0x2]   ;;  %s595_s13 = smov 120   ;;  %s596_s22 = smov 112  }
   0x6   :  { %v478_v16 = vld [vmem:[%s995_s0 + $0x5a] sm:$0x4]   ;;  %v60_v18 = vsel %vm5_vm0, %v477_v15, %v476_v14  ;;  %v481_v21 = vld [vmem:[%s995_s0 + $0x59] sm:$0x4]   ;;  %v74_v23 = vsel %vm5_vm0, %v480_v20, %v479_v19  ;;  %v483_v25 = vld [vmem:[%s995_s0 + $0x39] sm:$0x2]  }
   0x7   :  { %v64_v22 = vsel %vm9_vm1, %v478_v16, %v60_v18  ;;  %v88_v26 = vsel %vm5_vm0, %v483_v25, %v482_v24  ;;  %v484_v27 = vld [vmem:[%s995_s0 + $0x58] sm:$0x4]   ;;  %v485_v28 = vld [vmem:[%s995_s0 + $0x19] sm:$0x1]   ;;  %v78_v30 = vsel %vm9_vm1, %v481_v21, %v74_v23  ;;  %v488_v31 = vld [vmem:[%s995_s0 + $0x18] sm:$0x1]  }
   0x8   :  { %v486_v29 = vld [vmem:[%s995_s0 + $0x38] sm:$0x2]   ;;  %v489_v34 = vld [vmem:[%s995_s0 + $0x37] sm:$0x2]   ;;  %v92_v35 = vsel %vm9_vm1, %v484_v27, %v88_v26  ;;  %v491_v36 = vld [vmem:[%s995_s0 + $0x17] sm:$0x1]  }
   0x9   :  { %37 = vrot.lane.b32.xlu0 %v36_v17, %s595_s13  ;;  %65 = vrot.lane.b32.xlu1 %v64_v22, %s596_s22  ;;  %v102_v32 = vsel %vm5_vm0, %v486_v29, %v485_v28  ;;  %v487_v33 = vld [vmem:[%s995_s0 + $0x57] sm:$0x4]   ;;  %v492_v37 = vld [vmem:[%s995_s0 + $0x36] sm:$0x2]   ;;  %s597_s2 = smov 108   ;;  %v116_v38 = vsel %vm5_vm0, %v489_v34, %v488_v31  ;;  %s598_s9 = smov 104  }
   0xa   :  { %v490_v39 = vld [vmem:[%s995_s0 + $0x56] sm:$0x4]   ;;  %v106_v40 = vsel %vm9_vm1, %v487_v33, %v102_v32  ;;  %v494_v41 = vld [vmem:[%s995_s0 + $0x16] sm:$0x1]   ;;  %v130_v43 = vsel %vm5_vm0, %v492_v37, %v491_v36  ;;  %v493_v44 = vld [vmem:[%s995_s0 + $0x55] sm:$0x4]  }
   0xb   :  { %v495_v42 = vld [vmem:[%s995_s0 + $0x35] sm:$0x2]   ;;  %v120_v45 = vsel %vm9_vm1, %v490_v39, %v116_v38  ;;  %v497_v46 = vld [vmem:[%s995_s0 + $0x15] sm:$0x1]   ;;  %s599_s16 = smov 100   ;;  %v134_v50 = vsel %vm9_vm1, %v493_v44, %v130_v43  ;;  %s600_s23 = smov 96  }
   0xc   :  { %v498_v47 = vld [vmem:[%s995_s0 + $0x34] sm:$0x2]   ;;  %v144_v48 = vsel %vm5_vm0, %v495_v42, %v494_v41  ;;  %v496_v49 = vld [vmem:[%s995_s0 + $0x54] sm:$0x4]   ;;  %v500_v51 = vld [vmem:[%s995_s0 + $0x14] sm:$0x1]  }
   0xd   :  { %79 = vrot.lane.b32.xlu0 %v78_v30, %s597_s2  ;;  %93 = vrot.lane.b32.xlu1 %v92_v35, %s598_s9  ;;  %v501_v52 = vld [vmem:[%s995_s0 + $0x33] sm:$0x2]   ;;  %v158_v53 = vsel %vm5_vm0, %v498_v47, %v497_v46  ;;  %v499_v54 = vld [vmem:[%s995_s0 + $0x53] sm:$0x4]   ;;  %v148_v55 = vsel %vm9_vm1, %v496_v49, %v144_v48  ;;  %s601_s30 = smov 92   ;;  %s602_s8 = smov 88  }
   0xe   :  { %v503_v56 = vld [vmem:[%s995_s0 + $0x13] sm:$0x1]   ;;  %v172_v58 = vsel %vm5_vm0, %v501_v52, %v500_v51  ;;  %v502_v59 = vld [vmem:[%s995_s0 + $0x52] sm:$0x4]   ;;  %v162_v60 = vsel %vm9_vm1, %v499_v54, %v158_v53  ;;  %v506_v61 = vld [vmem:[%s995_s0 + $0x12] sm:$0x1]  }
   0xf   :  { %v504_v57 = vld [vmem:[%s995_s0 + $0x32] sm:$0x2]   ;;  %v507_v62 = vld [vmem:[%s995_s0 + $0x31] sm:$0x2]   ;;  %v176_v1 = vsel %vm9_vm1, %v502_v59, %v172_v58  ;;  %v509_v2 = vld [vmem:[%s995_s0 + $0x11] sm:$0x1]  }
  0x10   :  { %v186_v63 = vsel %vm5_vm0, %v504_v57, %v503_v56  ;;  %v505_v0 = vld [vmem:[%s995_s0 + $0x51] sm:$0x4]   ;;  %v510_v3 = vld [vmem:[%s995_s0 + $0x30] sm:$0x2]   ;;  %s603_s15 = smov 84   ;;  %v200_v4 = vsel %vm5_vm0, %v507_v62, %v506_v61  ;;  %s604_s22 = smov 80  }
  0x11   :  { %107 = vrot.lane.b32.xlu0 %v106_v40, %s599_s16  ;;  %121 = vrot.lane.b32.xlu1 %v120_v45, %s600_s23  ;;  %v508_v5 = vld [vmem:[%s995_s0 + $0x50] sm:$0x4]   ;;  %v190_v6 = vsel %vm9_vm1, %v505_v0, %v186_v63  ;;  %v512_v7 = vld [vmem:[%s995_s0 + $0x10] sm:$0x1]   ;;  %v214_v9 = vsel %vm5_vm0, %v510_v3, %v509_v2  ;;  %s605_s29 = smov 76   ;;  %s606_s7 = smov 72  }
  0x12   :  { %v513_v8 = vld [vmem:[%s995_s0 + $0x2f] sm:$0x2]   ;;  %v511_v10 = vld [vmem:[%s995_s0 + $0x4f] sm:$0x4]   ;;  %v204_v11 = vsel %vm9_vm1, %v508_v5, %v200_v4  ;;  %v515_v12 = vld [vmem:[%s995_s0 + $0xf] sm:$0x1]  }
  0x13   :  { %v516_v13 = vld [vmem:[%s995_s0 + $0x2e] sm:$0x2]   ;;  %v228_v14 = vsel %vm5_vm0, %v513_v8, %v512_v7  ;;  %v514_v15 = vld [vmem:[%s995_s0 + $0x4e] sm:$0x4]   ;;  %v218_v16 = vsel %vm9_vm1, %v511_v10, %v214_v9  ;;  %v518_v17 = vld [vmem:[%s995_s0 + $0xe] sm:$0x1]  }
  0x14   :  { %v519_v18 = vld [vmem:[%s995_s0 + $0x2d] sm:$0x2]   ;;  %v242_v19 = vsel %vm5_vm0, %v516_v13, %v515_v12  ;;  %v517_v20 = vld [vmem:[%s995_s0 + $0x4d] sm:$0x4]   ;;  %v232_v21 = vsel %vm9_vm1, %v514_v15, %v228_v14  ;;  %v521_v22 = vld [vmem:[%s995_s0 + $0xd] sm:$0x1]  }
  0x15   :  { %135 = vrot.lane.b32.xlu0 %v134_v50, %s601_s30  ;;  %149 = vrot.lane.b32.xlu1 %v148_v55, %s602_s8  ;;  %v522_v23 = vld [vmem:[%s995_s0 + $0x2c] sm:$0x2]   ;;  %s607_s14 = smov 68   ;;  %v256_v24 = vsel %vm5_vm0, %v519_v18, %v518_v17  ;;  %v520_v25 = vld [vmem:[%s995_s0 + $0x4c] sm:$0x4]   ;;  %v246_v26 = vsel %vm9_vm1, %v517_v20, %v242_v19  ;;  %s608_s21 = smov 64  }
  0x16   :  { %v524_v27 = vld [vmem:[%s995_s0 + $0xc] sm:$0x1]   ;;  %v270_v29 = vsel %vm5_vm0, %v522_v23, %v521_v22  ;;  %v523_v30 = vld [vmem:[%s995_s0 + $0x4b] sm:$0x4]   ;;  %v260_v31 = vsel %vm9_vm1, %v520_v25, %v256_v24  ;;  %v527_v32 = vld [vmem:[%s995_s0 + $0xb] sm:$0x1]  }
  0x17   :  { %v525_v28 = vld [vmem:[%s995_s0 + $0x2b] sm:$0x2]   ;;  %v528_v33 = vld [vmem:[%s995_s0 + $0x2a] sm:$0x2]   ;;  %s609_s28 = smov 60   ;;  %v274_v37 = vsel %vm9_vm1, %v523_v30, %v270_v29  ;;  %s610_s10 = smov 56  }
  0x18   :  { %v284_v34 = vsel %vm5_vm0, %v525_v28, %v524_v27  ;;  %v526_v35 = vld [vmem:[%s995_s0 + $0x4a] sm:$0x4]   ;;  %v529_v36 = vld [vmem:[%s995_s0 + $0x49] sm:$0x4]   ;;  %v530_v38 = vld [vmem:[%s995_s0 + $0xa] sm:$0x1]   ;;  %v298_v41 = vsel %vm5_vm0, %v528_v33, %v527_v32 }
  0x19   :  { %163 = vrot.lane.b32.xlu0 %v162_v60, %s603_s15  ;;  %177 = vrot.lane.b32.xlu1 %v176_v1, %s604_s22  ;;  %v531_v39 = vld [vmem:[%s995_s0 + $0x29] sm:$0x2]   ;;  %v466_v40 = vld [vmem:[%s995_s0 + $0x3e] sm:$0x4]   ;;  %v288_v44 = vsel %vm9_vm1, %v526_v35, %v284_v34  ;;  %s611_s19 = smov 52   ;;  %v302_v51 = vsel %vm9_vm1, %v529_v36, %v298_v41  ;;  %s612_s26 = smov 48  }
  0x1a   :  { %v2_v42 = vld [vmem:[%s995_s0] sm:$0x1]   ;;  %v533_v45 = vld [vmem:[%s995_s0 + $0x9] sm:$0x1]   ;;  %v312_v48 = vsel %vm5_vm0, %v531_v39, %v530_v38  ;;  %v532_v49 = vld [vmem:[%s995_s0 + $0x48] sm:$0x4]  }
  0x1b   :  { %v465_v43 = vld [vmem:[%s995_s0 + $0x1f] sm:$0x2]   ;;  %v534_v46 = vld [vmem:[%s995_s0 + $0x28] sm:$0x2]   ;;  %v536_v52 = vld [vmem:[%s995_s0 + $0x8] sm:$0x1]   ;;  %v316_v56 = vsel %vm9_vm1, %v532_v49, %v312_v48 }
  0x1c   :  { %v6_v47 = vsel %vm5_vm0, %v465_v43, %v2_v42  ;;  %v537_v53 = vld [vmem:[%s995_s0 + $0x27] sm:$0x2]   ;;  %v326_v54 = vsel %vm5_vm0, %v534_v46, %v533_v45  ;;  %v535_v55 = vld [vmem:[%s995_s0 + $0x47] sm:$0x4]   ;;  %v539_v57 = vld [vmem:[%s995_s0 + $0x7] sm:$0x1]  }
  0x1d   :  { %191 = vrot.lane.b32.xlu0 %v190_v6, %s605_s29  ;;  %205 = vrot.lane.b32.xlu1 %v204_v11, %s606_s7  ;;  %v10_v50 = vsel %vm9_vm1, %v466_v40, %v6_v47  ;;  %v540_v58 = vld [vmem:[%s995_s0 + $0x26] sm:$0x2]   ;;  %s613_s4 = smov 44   ;;  %v340_v59 = vsel %vm5_vm0, %v537_v53, %v536_v52  ;;  %v538_v60 = vld [vmem:[%s995_s0 + $0x46] sm:$0x4]   ;;  %v330_v61 = vsel %vm9_vm1, %v535_v55, %v326_v54  ;;  %s614_s11 = smov 40  }
  0x1e   :  { %12 = vst.msk [vmem:[#allocation0] ss:$8 sm:$0x7] %vm11_vm2, %v10_v50   ;;  %v542_v62 = vld [vmem:[%s995_s0 + $0x6] sm:$0x1]   ;;  %v354_v0 = vsel %vm5_vm0, %v540_v58, %v539_v57  ;;  %v344_v2 = vsel %vm9_vm1, %v538_v60, %v340_v59  ;;  %s615_s18 = smov 36  }
  0x1f   :  { %v543_v63 = vld [vmem:[%s995_s0 + $0x25] sm:$0x2]   ;;  %v541_v1 = vld [vmem:[%s995_s0 + $0x45] sm:$0x4]   ;;  %v545_v3 = vld [vmem:[%s995_s0 + $0x5] sm:$0x1]  }
  0x20   :  { %v546_v4 = vld [vmem:[%s995_s0 + $0x24] sm:$0x2]   ;;  %v368_v5 = vsel %vm5_vm0, %v543_v63, %v542_v62  ;;  %v544_v6 = vld [vmem:[%s995_s0 + $0x44] sm:$0x4]   ;;  %v358_v7 = vsel %vm9_vm1, %v541_v1, %v354_v0  ;;  %v548_v8 = vld [vmem:[%s995_s0 + $0x4] sm:$0x1]  }
  0x21   :  { %219 = vrot.lane.b32.xlu0 %v218_v16, %s607_s14  ;;  %233 = vrot.lane.b32.xlu1 %v232_v21, %s608_s21  ;;  %v549_v9 = vld [vmem:[%s995_s0 + $0x23] sm:$0x2]   ;;  %s616_s25 = smov 32   ;;  %v382_v10 = vsel %vm5_vm0, %v546_v4, %v545_v3  ;;  %v547_v11 = vld [vmem:[%s995_s0 + $0x43] sm:$0x4]   ;;  %v372_v12 = vsel %vm9_vm1, %v544_v6, %v368_v5  ;;  %s617_s3 = smov 28  }
  0x22   :  { %v551_v13 = vld [vmem:[%s995_s0 + $0x3] sm:$0x1]   ;;  %v396_v15 = vsel %vm5_vm0, %v549_v9, %v548_v8  ;;  %v550_v16 = vld [vmem:[%s995_s0 + $0x42] sm:$0x4]   ;;  %v386_v17 = vsel %vm9_vm1, %v547_v11, %v382_v10  ;;  %v554_v18 = vld [vmem:[%s995_s0 + $0x2] sm:$0x1]  }
  0x23   :  { %v552_v14 = vld [vmem:[%s995_s0 + $0x22] sm:$0x2]   ;;  %v555_v19 = vld [vmem:[%s995_s0 + $0x21] sm:$0x2]   ;;  %v400_v22 = vsel %vm9_vm1, %v550_v16, %v396_v15  ;;  %v557_v23 = vld [vmem:[%s995_s0 + $0x1] sm:$0x1]  }
  0x24   :  { %v410_v20 = vsel %vm5_vm0, %v552_v14, %v551_v13  ;;  %v553_v21 = vld [vmem:[%s995_s0 + $0x41] sm:$0x4]   ;;  %v558_v24 = vld [vmem:[%s995_s0 + $0x20] sm:$0x2]   ;;  %s619_s17 = smov 20   ;;  %v424_v25 = vsel %vm5_vm0, %v555_v19, %v554_v18  ;;  %s620_s20 = smov 16  }
  0x25   :  { %247 = vrot.lane.b32.xlu0 %v246_v26, %s609_s28  ;;  %261 = vrot.lane.b32.xlu1 %v260_v31, %s610_s10  ;;  %s618_s10 = smov 24   ;;  %v556_v26 = vld [vmem:[%s995_s0 + $0x40] sm:$0x4]   ;;  %v414_v27 = vsel %vm9_vm1, %v553_v21, %v410_v20  ;;  %v438_v28 = vsel %vm5_vm0, %v558_v24, %v557_v23  ;;  %v559_v29 = vld [vmem:[%s995_s0 + $0x3f] sm:$0x4]   ;;  %s621_s0 = smov 12  }
  0x26   :  { %v428_v30 = vsel %vm9_vm1, %v556_v26, %v424_v25  ;;  %v442_v31 = vsel %vm9_vm1, %v559_v29, %v438_v28  ;;  %s622_s23 = smov 8   ;;  %s623_s24 = smov 4   ;;  %vm39_vm4 = vcmask 1015744   ;;  %vm53_vm5 = vcmask 982944  }
  0x27   :  { %vm67_vm6 = vcmask 950144   ;;  %vm81_vm7 = vcmask 917344   ;;  %vm95_vm8 = vcmask 884544   ;;  %vm109_vm9 = vcmask 851744  }
  0x28   :  { %vm123_vm10 = vcmask 818944   ;;  %vm137_vm11 = vcmask 786144   ;;  %vm151_vm12 = vcmask 753344   ;;  %vm165_vm13 = vcmask 720544  }
  0x29   :  { %275 = vrot.lane.b32.xlu0 %v274_v37, %s611_s19  ;;  %289 = vrot.lane.b32.xlu1 %v288_v44, %s612_s26  ;;  %vm179_vm14 = vcmask 687744   ;;  %vm193_vm15 = vcmask 654944   ;;  %vm207_vm0 = vcmask 622144   ;;  %vm221_vm1 = vcmask 589344  }
  0x2a   :  { %vm235_vm2 = vcmask 556544  }
  0x2d   :  { %303 = vrot.lane.b32.xlu0 %v302_v51, %s613_s4  ;;  %317 = vrot.lane.b32.xlu1 %v316_v56, %s614_s11 }
  0x31   :  { %331 = vrot.lane.b32.xlu0 %v330_v61, %s615_s18  ;;  %345 = vrot.lane.b32.xlu1 %v344_v2, %s616_s25 }
  0x35   :  { %359 = vrot.lane.b32.xlu0 %v358_v7, %s617_s3  ;;  %373 = vrot.lane.b32.xlu1 %v372_v12, %s618_s10 }
  0x39   :  { %387 = vrot.lane.b32.xlu0 %v386_v17, %s619_s17  ;;  %401 = vrot.lane.b32.xlu1 %v400_v22, %s620_s20 }
  0x3d   :  { %415 = vrot.lane.b32.xlu0 %v414_v27, %s621_s0  ;;  %429 = vrot.lane.b32.xlu1 %v428_v30, %s622_s23 }
  0x41   :  { %443 = vrot.lane.b32.xlu0 %v442_v31, %s623_s24 }
  0x77   :  { %v24_v32 = vpop.permute.xlu0 %23   ;;  %v52_v33 = vpop.permute.xlu1 %51  }
  0x78   :  { %26 = vst.msk [vmem:[#allocation0] ss:$8 sm:$0x7] %vm25_vm3, %v24_v32   ;;  %vm249_vm3 = vcmask 523744  }
  0x7b   :  { %v38_v34 = vpop.permute.xlu0 %37   ;;  %v66_v35 = vpop.permute.xlu1 %65  }
  0x7c   :  { %40 = vst.msk [vmem:[#allocation0] ss:$8 sm:$0x7] %vm39_vm4, %v38_v34   ;;  %vm263_vm4 = vcmask 490944  }
  0x7d   :  { %54 = vst.msk [vmem:[#allocation0] ss:$8 sm:$0x7] %vm53_vm5, %v52_v33   ;;  %vm277_vm5 = vcmask 458144  }
  0x7e   :  { %68 = vst.msk [vmem:[#allocation0] ss:$8 sm:$0x7] %vm67_vm6, %v66_v35   ;;  %vm291_vm6 = vcmask 425344  }
  0x7f   :  { %v80_v36 = vpop.permute.xlu0 %79   ;;  %v94_v37 = vpop.permute.xlu1 %93  }
  0x80   :  { %82 = vst.msk [vmem:[#allocation0] ss:$8 sm:$0x7] %vm81_vm7, %v80_v36   ;;  %vm305_vm7 = vcmask 392544  }
  0x81   :  { %96 = vst.msk [vmem:[#allocation0] ss:$8 sm:$0x7] %vm95_vm8, %v94_v37   ;;  %vm319_vm8 = vcmask 359744  }
  0x83   :  { %v108_v38 = vpop.permute.xlu0 %107   ;;  %v122_v39 = vpop.permute.xlu1 %121  }
  0x84   :  { %110 = vst.msk [vmem:[#allocation0] ss:$8 sm:$0x7] %vm109_vm9, %v108_v38   ;;  %vm333_vm9 = vcmask 326944  }
  0x85   :  { %124 = vst.msk [vmem:[#allocation0] ss:$8 sm:$0x7] %vm123_vm10, %v122_v39   ;;  %vm347_vm10 = vcmask 294144  }
  0x87   :  { %v136_v40 = vpop.permute.xlu0 %135   ;;  %v150_v41 = vpop.permute.xlu1 %149  }
  0x88   :  { %138 = vst.msk [vmem:[#allocation0] ss:$8 sm:$0x7] %vm137_vm11, %v136_v40   ;;  %vm361_vm11 = vcmask 261344  }
  0x89   :  { %152 = vst.msk [vmem:[#allocation0] ss:$8 sm:$0x7] %vm151_vm12, %v150_v41   ;;  %vm375_vm12 = vcmask 228544  }
  0x8b   :  { %v164_v42 = vpop.permute.xlu0 %163   ;;  %v178_v43 = vpop.permute.xlu1 %177  }
  0x8c   :  { %166 = vst.msk [vmem:[#allocation0] ss:$8 sm:$0x7] %vm165_vm13, %v164_v42   ;;  %vm389_vm13 = vcmask 195744  }
  0x8d   :  { %180 = vst.msk [vmem:[#allocation0] ss:$8 sm:$0x7] %vm179_vm14, %v178_v43   ;;  %vm403_vm14 = vcmask 162944  }
  0x8f   :  { %v192_v44 = vpop.permute.xlu0 %191   ;;  %v206_v45 = vpop.permute.xlu1 %205  }
  0x90   :  { %194 = vst.msk [vmem:[#allocation0] ss:$8 sm:$0x7] %vm193_vm15, %v192_v44   ;;  %vm417_vm15 = vcmask 130144  }
  0x91   :  { %208 = vst.msk [vmem:[#allocation0] ss:$8 sm:$0x7] %vm207_vm0, %v206_v45   ;;  %vm431_vm0 = vcmask 97344  }
  0x93   :  { %v220_v46 = vpop.permute.xlu0 %219   ;;  %v234_v47 = vpop.permute.xlu1 %233  }
  0x94   :  { %222 = vst.msk [vmem:[#allocation0] ss:$8 sm:$0x7] %vm221_vm1, %v220_v46   ;;  %vm445_vm1 = vcmask 64544  }
  0x95   :  { %236 = vst.msk [vmem:[#allocation0] ss:$8 sm:$0x7] %vm235_vm2, %v234_v47  }
  0x97   :  { %v248_v48 = vpop.permute.xlu0 %247   ;;  %v262_v49 = vpop.permute.xlu1 %261  }
  0x98   :  { %250 = vst.msk [vmem:[#allocation0] ss:$8 sm:$0x7] %vm249_vm3, %v248_v48  }
  0x99   :  { %264 = vst.msk [vmem:[#allocation0] ss:$8 sm:$0x7] %vm263_vm4, %v262_v49  }
  0x9b   :  { %v276_v50 = vpop.permute.xlu0 %275   ;;  %v290_v51 = vpop.permute.xlu1 %289  }
  0x9c   :  { %278 = vst.msk [vmem:[#allocation0] ss:$8 sm:$0x7] %vm277_vm5, %v276_v50  }
  0x9d   :  { %292 = vst.msk [vmem:[#allocation0] ss:$8 sm:$0x7] %vm291_vm6, %v290_v51  }
  0x9f   :  { %v304_v52 = vpop.permute.xlu0 %303   ;;  %v318_v53 = vpop.permute.xlu1 %317  }
  0xa0   :  { %306 = vst.msk [vmem:[#allocation0] ss:$8 sm:$0x7] %vm305_vm7, %v304_v52  }
  0xa1   :  { %320 = vst.msk [vmem:[#allocation0] ss:$8 sm:$0x7] %vm319_vm8, %v318_v53  }
  0xa3   :  { %v332_v54 = vpop.permute.xlu0 %331   ;;  %v346_v55 = vpop.permute.xlu1 %345  }
  0xa4   :  { %334 = vst.msk [vmem:[#allocation0] ss:$8 sm:$0x7] %vm333_vm9, %v332_v54  }
  0xa5   :  { %348 = vst.msk [vmem:[#allocation0] ss:$8 sm:$0x7] %vm347_vm10, %v346_v55  }
  0xa7   :  { %v360_v56 = vpop.permute.xlu0 %359   ;;  %v374_v57 = vpop.permute.xlu1 %373  }
  0xa8   :  { %362 = vst.msk [vmem:[#allocation0] ss:$8 sm:$0x7] %vm361_vm11, %v360_v56  }
  0xa9   :  { %376 = vst.msk [vmem:[#allocation0] ss:$8 sm:$0x7] %vm375_vm12, %v374_v57  }
  0xab   :  { %v388_v58 = vpop.permute.xlu0 %387   ;;  %v402_v59 = vpop.permute.xlu1 %401  }
  0xac   :  { %390 = vst.msk [vmem:[#allocation0] ss:$8 sm:$0x7] %vm389_vm13, %v388_v58  }
  0xad   :  { %404 = vst.msk [vmem:[#allocation0] ss:$8 sm:$0x7] %vm403_vm14, %v402_v59  }
  0xaf   :  { %v416_v60 = vpop.permute.xlu0 %415   ;;  %v430_v61 = vpop.permute.xlu1 %429  }
  0xb0   :  { %418 = vst.msk [vmem:[#allocation0] ss:$8 sm:$0x7] %vm417_vm15, %v416_v60  }
  0xb1   :  { %432 = vst.msk [vmem:[#allocation0] ss:$8 sm:$0x7] %vm431_vm0, %v430_v61  }
  0xb3   :  { %v444_v62 = vpop.permute.xlu0 %443  }
  0xb4   :  { %446 = vst.msk [vmem:[#allocation0] ss:$8 sm:$0x7] %vm445_vm1, %v444_v62  }
  0xbb   :  { %v450_v63 = vld [vmem:[#allocation0] sm:$0x1]  ;;  %v454_v0 = vld [vmem:[#allocation0 + $0x8] sm:$0x1]  ;;  %v459_v1 = vld [vmem:[#allocation0 + $0x10] sm:$0x1] }
  0xbc   :  { %452 = vst [vmem:[%s996_s1] sm:$0x1] %v450_v63  ;;  %560 = vst [vmem:[%s996_s1 + $0x1] sm:$0x1] %v454_v0 }
  0xbd   :  { %561 = vst [vmem:[%s996_s1 + $0x2] sm:$0x1] %v459_v1 }

// kernel: yolo_v5_detector.1
= control target key start
LH: loop header
LB: loop body
LE: loop exit
PB: predicated region body
PF: predicated region fallthrough
CT: control target
= control target key end

     0   :  { %s4241_s18 = smov 0   ;;  %s6882_s0 = inlined_call_operand.vmem [shape: f32[144,96], index: 0, kind: input, shape index: {}]   ;;  %s6883_s1 = inlined_call_operand.vmem [shape: f32[96,3072], index: 1, kind: input, shape index: {}]   ;;  %s6884_s2 = inlined_call_operand.vmem [shape: f32[1,3072], index: 2, kind: input, shape index: {}]   ;;  %s6885_s3 = inlined_call_operand.vmem [shape: f32[1,384], index: 3, kind: input, shape index: {}]   ;;  %s6886_s4 = inlined_call_operand.vmem [shape: f32[144,384], index: 4, kind: output, shape index: {0}]   ;;  %s6887_s5 = inlined_call_operand.vmem [shape: f32[144,1152], index: 5, kind: output, shape index: {1}]  }
   0x1 LB: > { %s3343_s19 = sadd.s32 4294967295, %s4208_s18   ;;  %p3347_p0 = scmp.ge.s32.totalorder %s4208_s18, 1  ;;  %s4208_s18 = sphi %s4241_s18, %s16_s18  }
   0x2   : > { %p191_p1 = scmp.lt.s32.totalorder %s4208_s18, 3 }
   0x4   : > { %p192_p2 = pnand %p3347_p0, %p191_p1 }
   0x6   : > { %195 = sbr.rel (%p192_p2) target bundleno = 574 (0x23e), region = 36 }
   0xd   : > { %v256_v0 = vld [vmem:[%s6883_s1 + $0x8] sm:$0xff]  ;;  %v258_v2 = vld [vmem:[%s6883_s1 + $0x18] sm:$0xff]  ;;  %v255_v5 = vld [vmem:[%s6883_s1] sm:$0xff]  ;;  %v4210_v7 = vmov 0.0   ;;  %s4316_s14 = smul.u32 9, %s3343_s19  ;;  %vm669_vm0 = vcmask 785408  }
   0xe   : > { %v280_v1 = vld [vmem:[%s6883_s1 + $0xc8] sm:$0xff]  ;;  %v282_v4 = vld [vmem:[%s6883_s1 + $0xd8] sm:$0xff]  ;;  %v279_v6 = vld [vmem:[%s6883_s1 + $0xc0] sm:$0xff]  ;;  %761 = vmatprep.mubr.f32.mxu0 %v4210_v7  ;;  %880 = vmatprep.mubr.f32.mxu1 %v4210_v7 }
   0xf   : > { %v3461_v3 = vpack.c.bf16 %v280_v1, %v256_v0  ;;  %v3485_v8 = vpack.c.bf16 %v282_v4, %v258_v2  ;;  %v3463_v9 = vpack.c.bf16 %v279_v6, %v255_v5  ;;  %v257_v10 = vld [vmem:[%s6883_s1 + $0x10] sm:$0xff]  ;;  %v304_v12 = vld [vmem:[%s6883_s1 + $0x188] sm:$0xff]  ;;  %v306_v15 = vld [vmem:[%s6883_s1 + $0x198] sm:$0xff]  ;;  %p227_p3 = scmp.lt.s32.totalorder %s4316_s14, 17 }
  0x10   : > { %v281_v11 = vld [vmem:[%s6883_s1 + $0xd0] sm:$0xff]  ;;  %v328_v14 = vld [vmem:[%s6883_s1 + $0x248] sm:$0xff]  ;;  %v330_v16 = vld [vmem:[%s6883_s1 + $0x258] sm:$0xff] }
  0x11   : > { %3462 = vmatprep.subr.bf16.mxu0 %v3461_v3  ;;  %v3487_v13 = vpack.c.bf16 %v281_v11, %v257_v10  ;;  %3486 = vmatprep.subr.bf16.mxu1 %v3485_v8  ;;  %v3465_v17 = vpack.c.bf16 %v328_v14, %v304_v12  ;;  %v3489_v18 = vpack.c.bf16 %v330_v16, %v306_v15  ;;  %v303_v19 = vld [vmem:[%s6883_s1 + $0x180] sm:$0xff]  ;;  %v305_v21 = vld [vmem:[%s6883_s1 + $0x190] sm:$0xff]  ;;  %v352_v24 = vld [vmem:[%s6883_s1 + $0x308] sm:$0xff]  ;;  %s7162_s14 = smov (!%p227_p3, %s4316_s14), 17 }
  0x12   : > { %3464 = vmatpush1.bf16.msra.mxu0 %v3463_v9  ;;  %v327_v20 = vld [vmem:[%s6883_s1 + $0x240] sm:$0xff]  ;;  %v329_v23 = vld [vmem:[%s6883_s1 + $0x250] sm:$0xff]  ;;  %v376_v25 = vld [vmem:[%s6883_s1 + $0x3c8] sm:$0xff]  ;;  %s3348_s19 = sshll.u32 %s7162_s14, 3  ;;  %s3749_s26 = smul.u32 24, %s7162_s14 }
  0x13   : > { %3488 = vmatpush1.bf16.msra.mxu1 %v3487_v13  ;;  %v3467_v22 = vpack.c.bf16 %v327_v20, %v303_v19  ;;  %3466 = vmatprep.subr.bf16.mxu0 %v3465_v17  ;;  %v3491_v26 = vpack.c.bf16 %v329_v23, %v305_v21  ;;  %v3469_v27 = vpack.c.bf16 %v376_v25, %v352_v24  ;;  %v354_v28 = vld [vmem:[%s6883_s1 + $0x318] sm:$0xff]  ;;  %v351_v30 = vld [vmem:[%s6883_s1 + $0x300] sm:$0xff]  ;;  %v353_v33 = vld [vmem:[%s6883_s1 + $0x310] sm:$0xff]  ;;  %s4421_s10 = scalar_lea.vmem %s6882_s0, %s3348_s19  ;;  %s3750_s9 = smul.u32 72, %s7162_s14 }
  0x14   : > { %3490 = vmatprep.subr.bf16.mxu1 %v3489_v18  ;;  %v378_v29 = vld [vmem:[%s6883_s1 + $0x3d8] sm:$0xff]  ;;  %v375_v32 = vld [vmem:[%s6883_s1 + $0x3c0] sm:$0xff]  ;;  %v377_v34 = vld [vmem:[%s6883_s1 + $0x3d0] sm:$0xff]  ;;  %s5582_s6 = scalar_lea.vmem %s6886_s4, %s3749_s26 }
  0x15   : > { %v3493_v31 = vpack.c.bf16 %v378_v29, %v354_v28  ;;  %v3471_v35 = vpack.c.bf16 %v375_v32, %v351_v30  ;;  %v400_v36 = vld [vmem:[%s6883_s1 + $0x488] sm:$0xff]  ;;  %v402_v38 = vld [vmem:[%s6883_s1 + $0x498] sm:$0xff]  ;;  %v3495_v39 = vpack.c.bf16 %v377_v34, %v353_v33  ;;  %v399_v42 = vld [vmem:[%s6883_s1 + $0x480] sm:$0xff]  ;;  %s6354_s12 = scalar_lea.vmem %s6887_s5, %s3750_s9 }
  0x16   : > { %3468 = vmatpush1.bf16.msra.mxu0 %v3467_v22  ;;  %v424_v37 = vld [vmem:[%s6883_s1 + $0x548] sm:$0xff]  ;;  %v426_v41 = vld [vmem:[%s6883_s1 + $0x558] sm:$0xff]  ;;  %v423_v43 = vld [vmem:[%s6883_s1 + $0x540] sm:$0xff] }
  0x17   : > { %3492 = vmatpush1.bf16.msra.mxu1 %v3491_v26  ;;  %3470 = vmatprep.subr.bf16.mxu0 %v3469_v27  ;;  %v3473_v40 = vpack.c.bf16 %v424_v37, %v400_v36  ;;  %v3497_v44 = vpack.c.bf16 %v426_v41, %v402_v38  ;;  %v401_v45 = vld [vmem:[%s6883_s1 + $0x490] sm:$0xff]  ;;  %v448_v47 = vld [vmem:[%s6883_s1 + $0x608] sm:$0xff]  ;;  %v450_v49 = vld [vmem:[%s6883_s1 + $0x618] sm:$0xff]  ;;  %v3475_v51 = vpack.c.bf16 %v423_v43, %v399_v42 }
  0x18   : > { %3494 = vmatprep.subr.bf16.mxu1 %v3493_v31  ;;  %v425_v46 = vld [vmem:[%s6883_s1 + $0x550] sm:$0xff]  ;;  %v472_v48 = vld [vmem:[%s6883_s1 + $0x6c8] sm:$0xff]  ;;  %v474_v50 = vld [vmem:[%s6883_s1 + $0x6d8] sm:$0xff] }
  0x19   : > { %v3499_v52 = vpack.c.bf16 %v425_v46, %v401_v45  ;;  %v3477_v53 = vpack.c.bf16 %v472_v48, %v448_v47  ;;  %v447_v54 = vld [vmem:[%s6883_s1 + $0x600] sm:$0xff]  ;;  %v449_v56 = vld [vmem:[%s6883_s1 + $0x610] sm:$0xff]  ;;  %v3501_v57 = vpack.c.bf16 %v474_v50, %v450_v49  ;;  %v496_v59 = vld [vmem:[%s6883_s1 + $0x788] sm:$0xff] }
  0x1a   : > { %3472 = vmatpush1.bf16.msra.mxu0 %v3471_v35  ;;  %v471_v55 = vld [vmem:[%s6883_s1 + $0x6c0] sm:$0xff]  ;;  %v473_v58 = vld [vmem:[%s6883_s1 + $0x6d0] sm:$0xff]  ;;  %v520_v60 = vld [vmem:[%s6883_s1 + $0x848] sm:$0xff] }
  0x1b   : > { %3496 = vmatpush1.bf16.msra.mxu1 %v3495_v39  ;;  %3474 = vmatprep.subr.bf16.mxu0 %v3473_v40  ;;  %v498_v61 = vld [vmem:[%s6883_s1 + $0x798] sm:$0xff]  ;;  %v3479_v63 = vpack.c.bf16 %v471_v55, %v447_v54  ;;  %v3503_v0 = vpack.c.bf16 %v473_v58, %v449_v56  ;;  %v3481_v1 = vpack.c.bf16 %v520_v60, %v496_v59  ;;  %v495_v2 = vld [vmem:[%s6883_s1 + $0x780] sm:$0xff]  ;;  %v497_v4 = vld [vmem:[%s6883_s1 + $0x790] sm:$0xff] }
  0x1c   : > { %3498 = vmatprep.subr.bf16.mxu1 %v3497_v44  ;;  %v522_v62 = vld [vmem:[%s6883_s1 + $0x858] sm:$0xff]  ;;  %v519_v3 = vld [vmem:[%s6883_s1 + $0x840] sm:$0xff]  ;;  %v521_v6 = vld [vmem:[%s6883_s1 + $0x850] sm:$0xff] }
  0x1d   : > { %v3505_v5 = vpack.c.bf16 %v522_v62, %v498_v61  ;;  %v260_v8 = vld [vmem:[%s6883_s1 + $0x28] sm:$0xff]  ;;  %v262_v10 = vld [vmem:[%s6883_s1 + $0x38] sm:$0xff]  ;;  %v3483_v12 = vpack.c.bf16 %v519_v3, %v495_v2  ;;  %v3507_v13 = vpack.c.bf16 %v521_v6, %v497_v4  ;;  %v259_v15 = vld [vmem:[%s6883_s1 + $0x20] sm:$0xff] }
  0x1e   : > { %3476 = vmatpush1.bf16.msra.mxu0 %v3475_v51  ;;  %v284_v9 = vld [vmem:[%s6883_s1 + $0xe8] sm:$0xff]  ;;  %v286_v11 = vld [vmem:[%s6883_s1 + $0xf8] sm:$0xff]  ;;  %v283_v16 = vld [vmem:[%s6883_s1 + $0xe0] sm:$0xff] }
  0x1f   : > { %3500 = vmatpush1.bf16.msra.mxu1 %v3499_v52  ;;  %3478 = vmatprep.subr.bf16.mxu0 %v3477_v53  ;;  %v3509_v14 = vpack.c.bf16 %v284_v9, %v260_v8  ;;  %v3533_v17 = vpack.c.bf16 %v286_v11, %v262_v10  ;;  %v261_v18 = vld [vmem:[%s6883_s1 + $0x30] sm:$0xff]  ;;  %v308_v20 = vld [vmem:[%s6883_s1 + $0x1a8] sm:$0xff]  ;;  %v4442_v22 = vld [vmem:[%s4421_s10] sm:$0xff]  ;;  %v3511_v23 = vpack.c.bf16 %v283_v16, %v259_v15 }
  0x20   : > { %3502 = vmatprep.subr.bf16.mxu1 %v3501_v57  ;;  %v285_v19 = vld [vmem:[%s6883_s1 + $0xf0] sm:$0xff]  ;;  %v332_v21 = vld [vmem:[%s6883_s1 + $0x268] sm:$0xff]  ;;  %v310_v24 = vld [vmem:[%s6883_s1 + $0x1b8] sm:$0xff] }
  0x21   : > { %v334_v25 = vld [vmem:[%s6883_s1 + $0x278] sm:$0xff]  ;;  %v3535_v26 = vpack.c.bf16 %v285_v19, %v261_v18  ;;  %v3513_v27 = vpack.c.bf16 %v332_v21, %v308_v20  ;;  %v307_v28 = vld [vmem:[%s6883_s1 + $0x1a0] sm:$0xff]  ;;  %v309_v30 = vld [vmem:[%s6883_s1 + $0x1b0] sm:$0xff] }
  0x22   : > { %3480 = vmatpush1.bf16.msra.mxu0 %v3479_v63  ;;  %v331_v29 = vld [vmem:[%s6883_s1 + $0x260] sm:$0xff]  ;;  %v3537_v31 = vpack.c.bf16 %v334_v25, %v310_v24  ;;  %v333_v32 = vld [vmem:[%s6883_s1 + $0x270] sm:$0xff]  ;;  %v356_v33 = vld [vmem:[%s6883_s1 + $0x328] sm:$0xff] }
  0x23   : > { %3504 = vmatpush1.bf16.msra.mxu1 %v3503_v0  ;;  %3482 = vmatprep.subr.bf16.mxu0 %v3481_v1  ;;  %v380_v34 = vld [vmem:[%s6883_s1 + $0x3e8] sm:$0xff]  ;;  %v358_v36 = vld [vmem:[%s6883_s1 + $0x338] sm:$0xff]  ;;  %v3515_v38 = vpack.c.bf16 %v331_v29, %v307_v28  ;;  %v3539_v39 = vpack.c.bf16 %v333_v32, %v309_v30  ;;  %v355_v41 = vld [vmem:[%s6883_s1 + $0x320] sm:$0xff] }
  0x24   : > { %3506 = vmatprep.subr.bf16.mxu1 %v3505_v5  ;;  %v4473_v35 = vld [vmem:[%s4421_s10 + $0x8] sm:$0xff]  ;;  %v382_v37 = vld [vmem:[%s6883_s1 + $0x3f8] sm:$0xff]  ;;  %v3517_v40 = vpack.c.bf16 %v380_v34, %v356_v33  ;;  %v379_v42 = vld [vmem:[%s6883_s1 + $0x3e0] sm:$0xff] }
  0x25   : > { %v357_v43 = vld [vmem:[%s6883_s1 + $0x330] sm:$0xff]  ;;  %v3541_v44 = vpack.c.bf16 %v382_v37, %v358_v36  ;;  %v404_v46 = vld [vmem:[%s6883_s1 + $0x4a8] sm:$0xff]  ;;  %v406_v49 = vld [vmem:[%s6883_s1 + $0x4b8] sm:$0xff]  ;;  %v3519_v51 = vpack.c.bf16 %v379_v42, %v355_v41 }
  0x26   : > { %3484 = vmatpush1.bf16.msra.mxu0 %v3483_v12  ;;  %v381_v45 = vld [vmem:[%s6883_s1 + $0x3f0] sm:$0xff]  ;;  %v428_v47 = vld [vmem:[%s6883_s1 + $0x568] sm:$0xff]  ;;  %v430_v50 = vld [vmem:[%s6883_s1 + $0x578] sm:$0xff] }
  0x27   : > { %3508 = vmatpush1.bf16.msra.mxu1 %v3507_v13  ;;  %3510 = vmatprep.subr.bf16.mxu0 %v3509_v14  ;;  %v4507_v48 = vld [vmem:[%s4421_s10 + $0x10] sm:$0xff]  ;;  %v3543_v52 = vpack.c.bf16 %v381_v45, %v357_v43  ;;  %v3521_v53 = vpack.c.bf16 %v428_v47, %v404_v46  ;;  %v403_v54 = vld [vmem:[%s6883_s1 + $0x4a0] sm:$0xff]  ;;  %v3545_v57 = vpack.c.bf16 %v430_v50, %v406_v49  ;;  %v452_v59 = vld [vmem:[%s6883_s1 + $0x628] sm:$0xff] }
  0x28   : > { %3534 = vmatprep.subr.bf16.mxu1 %v3533_v17  ;;  %v427_v55 = vld [vmem:[%s6883_s1 + $0x560] sm:$0xff]  ;;  %v405_v56 = vld [vmem:[%s6883_s1 + $0x4b0] sm:$0xff]  ;;  %v476_v60 = vld [vmem:[%s6883_s1 + $0x6e8] sm:$0xff] }
  0x29   : > { %3351 = vmatmul.mubr.msk.f32.vlgmr.msra.gmra.mrb[0].mxu0 %vm669_vm0, %v4442_v22  ;;  %v429_v58 = vld [vmem:[%s6883_s1 + $0x570] sm:$0xff]  ;;  %v4540_v61 = vld [vmem:[%s4421_s10 + $0x18] sm:$0xff]  ;;  %v3523_v0 = vpack.c.bf16 %v427_v55, %v403_v54  ;;  %v3525_v2 = vpack.c.bf16 %v476_v60, %v452_v59  ;;  %v451_v3 = vld [vmem:[%s6883_s1 + $0x620] sm:$0xff] }
  0x2a   : > { %3360 = vmatmul.mubr.msk.f32.vlgmr.msra.gmra.mrb[0].mxu1 %vm669_vm0, %v4442_v22  ;;  %3512 = vmatpush1.bf16.msra.mxu0 %v3511_v23  ;;  %v454_v62 = vld [vmem:[%s6883_s1 + $0x638] sm:$0xff]  ;;  %v3547_v1 = vpack.c.bf16 %v429_v58, %v405_v56  ;;  %v475_v4 = vld [vmem:[%s6883_s1 + $0x6e0] sm:$0xff]  ;;  %v453_v5 = vld [vmem:[%s6883_s1 + $0x630] sm:$0xff] }
  0x2b   : > { %3536 = vmatpush1.bf16.msra.mxu1 %v3535_v26  ;;  %767 = vmatprep.mubr.f32.mxu0 %v4210_v7  ;;  %v478_v63 = vld [vmem:[%s6883_s1 + $0x6f8] sm:$0xff]  ;;  %v477_v8 = vld [vmem:[%s6883_s1 + $0x6f0] sm:$0xff]  ;;  %v500_v9 = vld [vmem:[%s6883_s1 + $0x7a8] sm:$0xff]  ;;  %v3527_v14 = vpack.c.bf16 %v475_v4, %v451_v3 }
  0x2c   : > { %886 = vmatprep.mubr.f32.mxu1 %v4210_v7  ;;  %3514 = vmatprep.subr.bf16.mxu0 %v3513_v27  ;;  %v3549_v6 = vpack.c.bf16 %v478_v63, %v454_v62  ;;  %v524_v10 = vld [vmem:[%s6883_s1 + $0x868] sm:$0xff]  ;;  %v4573_v11 = vld [vmem:[%s4421_s10 + $0x20] sm:$0xff]  ;;  %v502_v12 = vld [vmem:[%s6883_s1 + $0x7b8] sm:$0xff]  ;;  %v3551_v15 = vpack.c.bf16 %v477_v8, %v453_v5 }
  0x2d   : > { %3352 = vmatmul.mubr.msk.f32.gmra.mrb[2].mxu0 %vm669_vm0, %v4473_v35  ;;  %3538 = vmatprep.subr.bf16.mxu1 %v3537_v31  ;;  %v526_v13 = vld [vmem:[%s6883_s1 + $0x878] sm:$0xff]  ;;  %v3529_v16 = vpack.c.bf16 %v524_v10, %v500_v9  ;;  %v499_v17 = vld [vmem:[%s6883_s1 + $0x7a0] sm:$0xff]  ;;  %v501_v19 = vld [vmem:[%s6883_s1 + $0x7b0] sm:$0xff] }
  0x2e   : > { %3361 = vmatmul.mubr.msk.f32.gmra.mrb[2].mxu1 %vm669_vm0, %v4473_v35  ;;  %773 = vmatprep.mubr.f32.mxu0 %v4210_v7  ;;  %v523_v18 = vld [vmem:[%s6883_s1 + $0x860] sm:$0xff]  ;;  %v3553_v20 = vpack.c.bf16 %v526_v13, %v502_v12  ;;  %v525_v21 = vld [vmem:[%s6883_s1 + $0x870] sm:$0xff]  ;;  %v264_v23 = vld [vmem:[%s6883_s1 + $0x48] sm:$0xff] }
  0x2f   : > { %892 = vmatprep.mubr.f32.mxu1 %v4210_v7  ;;  %3516 = vmatpush1.bf16.msra.mxu0 %v3515_v38  ;;  %v288_v24 = vld [vmem:[%s6883_s1 + $0x108] sm:$0xff]  ;;  %v266_v26 = vld [vmem:[%s6883_s1 + $0x58] sm:$0xff]  ;;  %v3531_v28 = vpack.c.bf16 %v523_v18, %v499_v17  ;;  %v3555_v29 = vpack.c.bf16 %v525_v21, %v501_v19  ;;  %v4621_v32 = vld [vmem:[%s4421_s10 + $0x30] sm:$0xff] }
  0x30   : > { %3540 = vmatpush1.bf16.msra.mxu1 %v3539_v39  ;;  %3518 = vmatprep.subr.bf16.mxu0 %v3517_v40  ;;  %v4606_v25 = vld [vmem:[%s4421_s10 + $0x28] sm:$0xff]  ;;  %v290_v27 = vld [vmem:[%s6883_s1 + $0x118] sm:$0xff]  ;;  %v3557_v30 = vpack.c.bf16 %v288_v24, %v264_v23  ;;  %v4639_v34 = vld [vmem:[%s4421_s10 + $0x40] sm:$0xff] }
  0x31   : > { %3353 = vmatmul.mubr.msk.f32.gmra.mrb[4].mxu0 %vm669_vm0, %v4507_v48  ;;  %3542 = vmatprep.subr.bf16.mxu1 %v3541_v44  ;;  %v3581_v31 = vpack.c.bf16 %v290_v27, %v266_v26  ;;  %v4630_v33 = vld [vmem:[%s4421_s10 + $0x38] sm:$0xff]  ;;  %v263_v36 = vld [vmem:[%s6883_s1 + $0x40] sm:$0xff]  ;;  %v265_v38 = vld [vmem:[%s6883_s1 + $0x50] sm:$0xff] }
  0x32   : > { %3362 = vmatmul.mubr.msk.f32.gmra.mrb[4].mxu1 %vm669_vm0, %v4507_v48  ;;  %779 = vmatprep.mubr.f32.mxu0 %v4210_v7  ;;  %v287_v37 = vld [vmem:[%s6883_s1 + $0x100] sm:$0xff]  ;;  %v289_v39 = vld [vmem:[%s6883_s1 + $0x110] sm:$0xff]  ;;  %v312_v40 = vld [vmem:[%s6883_s1 + $0x1c8] sm:$0xff] }
  0x33   : > { %898 = vmatprep.mubr.f32.mxu1 %v4210_v7  ;;  %3520 = vmatpush1.bf16.msra.mxu0 %v3519_v51  ;;  %v336_v41 = vld [vmem:[%s6883_s1 + $0x288] sm:$0xff]  ;;  %v3559_v42 = vpack.c.bf16 %v287_v37, %v263_v36  ;;  %v314_v43 = vld [vmem:[%s6883_s1 + $0x1d8] sm:$0xff]  ;;  %v3583_v45 = vpack.c.bf16 %v289_v39, %v265_v38  ;;  %v311_v47 = vld [vmem:[%s6883_s1 + $0x1c0] sm:$0xff] }
  0x34   : > { %3544 = vmatpush1.bf16.msra.mxu1 %v3543_v52  ;;  %3522 = vmatprep.subr.bf16.mxu0 %v3521_v53  ;;  %v338_v44 = vld [vmem:[%s6883_s1 + $0x298] sm:$0xff]  ;;  %v3561_v46 = vpack.c.bf16 %v336_v41, %v312_v40  ;;  %v335_v49 = vld [vmem:[%s6883_s1 + $0x280] sm:$0xff]  ;;  %v313_v50 = vld [vmem:[%s6883_s1 + $0x1d0] sm:$0xff] }
  0x35   : > { %3354 = vmatmul.mubr.msk.f32.gmra.mrb[6].mxu0 %vm669_vm0, %v4540_v61  ;;  %3546 = vmatprep.subr.bf16.mxu1 %v3545_v57  ;;  %v3585_v51 = vpack.c.bf16 %v338_v44, %v314_v43  ;;  %v337_v52 = vld [vmem:[%s6883_s1 + $0x290] sm:$0xff]  ;;  %v360_v53 = vld [vmem:[%s6883_s1 + $0x348] sm:$0xff]  ;;  %v362_v55 = vld [vmem:[%s6883_s1 + $0x358] sm:$0xff]  ;;  %v3563_v57 = vpack.c.bf16 %v335_v49, %v311_v47 }
  0x36   : > { %3363 = vmatmul.mubr.msk.f32.gmra.mrb[6].mxu1 %vm669_vm0, %v4540_v61  ;;  %785 = vmatprep.mubr.f32.mxu0 %v4210_v7  ;;  %v384_v54 = vld [vmem:[%s6883_s1 + $0x408] sm:$0xff]  ;;  %v386_v56 = vld [vmem:[%s6883_s1 + $0x418] sm:$0xff]  ;;  %v3587_v58 = vpack.c.bf16 %v337_v52, %v313_v50  ;;  %v359_v60 = vld [vmem:[%s6883_s1 + $0x340] sm:$0xff] }
  0x37   : > { %904 = vmatprep.mubr.f32.mxu1 %v4210_v7  ;;  %3524 = vmatpush1.bf16.msra.mxu0 %v3523_v0  ;;  %v3565_v59 = vpack.c.bf16 %v384_v54, %v360_v53  ;;  %v383_v62 = vld [vmem:[%s6883_s1 + $0x400] sm:$0xff]  ;;  %v361_v63 = vld [vmem:[%s6883_s1 + $0x350] sm:$0xff]  ;;  %v3589_v0 = vpack.c.bf16 %v386_v56, %v362_v55  ;;  %v432_v3 = vld [vmem:[%s6883_s1 + $0x588] sm:$0xff] }
  0x38   : > { %3548 = vmatpush1.bf16.msra.mxu1 %v3547_v1  ;;  %3526 = vmatprep.subr.bf16.mxu0 %v3525_v2  ;;  %v385_v1 = vld [vmem:[%s6883_s1 + $0x410] sm:$0xff]  ;;  %v408_v2 = vld [vmem:[%s6883_s1 + $0x4c8] sm:$0xff]  ;;  %v410_v4 = vld [vmem:[%s6883_s1 + $0x4d8] sm:$0xff] }
  0x39   : > { %3355 = vmatmul.mubr.msk.f32.gmra.mrb[8].mxu0 %vm669_vm0, %v4573_v11  ;;  %3550 = vmatprep.subr.bf16.mxu1 %v3549_v6  ;;  %v434_v5 = vld [vmem:[%s6883_s1 + $0x598] sm:$0xff]  ;;  %v3567_v6 = vpack.c.bf16 %v383_v62, %v359_v60  ;;  %v3591_v8 = vpack.c.bf16 %v385_v1, %v361_v63  ;;  %v3569_v9 = vpack.c.bf16 %v432_v3, %v408_v2  ;;  %v407_v10 = vld [vmem:[%s6883_s1 + $0x4c0] sm:$0xff]  ;;  %v409_v13 = vld [vmem:[%s6883_s1 + $0x4d0] sm:$0xff] }
  0x3a   : > { %3364 = vmatmul.mubr.msk.f32.gmra.mrb[8].mxu1 %vm669_vm0, %v4573_v11  ;;  %791 = vmatprep.mubr.f32.mxu0 %v4210_v7  ;;  %v431_v12 = vld [vmem:[%s6883_s1 + $0x580] sm:$0xff]  ;;  %v480_v17 = vld [vmem:[%s6883_s1 + $0x708] sm:$0xff]  ;;  %v458_v18 = vld [vmem:[%s6883_s1 + $0x658] sm:$0xff] }
  0x3b   : > { %910 = vmatprep.mubr.f32.mxu1 %v4210_v7  ;;  %3528 = vmatpush1.bf16.msra.mxu0 %v3527_v14  ;;  %v3593_v14 = vpack.c.bf16 %v434_v5, %v410_v4  ;;  %v482_v19 = vld [vmem:[%s6883_s1 + $0x718] sm:$0xff]  ;;  %v455_v24 = vld [vmem:[%s6883_s1 + $0x640] sm:$0xff]  ;;  %v457_v27 = vld [vmem:[%s6883_s1 + $0x650] sm:$0xff] }
  0x3c   : > { %3552 = vmatpush1.bf16.msra.mxu1 %v3551_v15  ;;  %3530 = vmatprep.subr.bf16.mxu0 %v3529_v16  ;;  %v433_v15 = vld [vmem:[%s6883_s1 + $0x590] sm:$0xff]  ;;  %v456_v16 = vld [vmem:[%s6883_s1 + $0x648] sm:$0xff]  ;;  %v479_v26 = vld [vmem:[%s6883_s1 + $0x700] sm:$0xff] }
  0x3d   : > { %3356 = vmatmul.mubr.msk.f32.gmra.mrb[10].mxu0 %vm669_vm0, %v4606_v25  ;;  %3554 = vmatprep.subr.bf16.mxu1 %v3553_v20  ;;  %v3571_v20 = vpack.c.bf16 %v431_v12, %v407_v10  ;;  %v3595_v21 = vpack.c.bf16 %v433_v15, %v409_v13  ;;  %v3573_v23 = vpack.c.bf16 %v480_v17, %v456_v16  ;;  %v506_v36 = vld [vmem:[%s6883_s1 + $0x7d8] sm:$0xff]  ;;  %v503_v41 = vld [vmem:[%s6883_s1 + $0x7c0] sm:$0xff]  ;;  %v505_v43 = vld [vmem:[%s6883_s1 + $0x7d0] sm:$0xff] }
  0x3e   : > { %3365 = vmatmul.mubr.msk.f32.gmra.mrb[10].mxu1 %vm669_vm0, %v4606_v25  ;;  %797 = vmatprep.mubr.f32.mxu0 %v4210_v7  ;;  %v530_v37 = vld [vmem:[%s6883_s1 + $0x898] sm:$0xff]  ;;  %v3575_v38 = vpack.c.bf16 %v479_v26, %v455_v24  ;;  %v292_v47 = vld [vmem:[%s6883_s1 + $0x128] sm:$0xff]  ;;  %v267_v55 = vld [vmem:[%s6883_s1 + $0x60] sm:$0xff] }
  0x3f   : > { %916 = vmatprep.mubr.f32.mxu1 %v4210_v7  ;;  %3532 = vmatpush1.bf16.msra.mxu0 %v3531_v28  ;;  %v3597_v28 = vpack.c.bf16 %v482_v19, %v458_v18  ;;  %v3601_v44 = vpack.c.bf16 %v530_v37, %v506_v36  ;;  %v270_v49 = vld [vmem:[%s6883_s1 + $0x78] sm:$0xff]  ;;  %v291_v56 = vld [vmem:[%s6883_s1 + $0x120] sm:$0xff]  ;;  %v340_v60 = vld [vmem:[%s6883_s1 + $0x2a8] sm:$0xff] }
  0x40   : > { %3556 = vmatpush1.bf16.msra.mxu1 %v3555_v29  ;;  %3558 = vmatprep.subr.bf16.mxu0 %v3557_v30  ;;  %v481_v29 = vld [vmem:[%s6883_s1 + $0x710] sm:$0xff]  ;;  %v504_v30 = vld [vmem:[%s6883_s1 + $0x7c8] sm:$0xff]  ;;  %v294_v50 = vld [vmem:[%s6883_s1 + $0x138] sm:$0xff]  ;;  %v3607_v62 = vpack.c.bf16 %v291_v56, %v267_v55 }
  0x41   : > { %3357 = vmatmul.mubr.msk.f32.gmra.mrb[12].mxu0 %vm669_vm0, %v4621_v32  ;;  %3582 = vmatprep.subr.bf16.mxu1 %v3581_v31  ;;  %v528_v31 = vld [vmem:[%s6883_s1 + $0x888] sm:$0xff]  ;;  %v3599_v39 = vpack.c.bf16 %v481_v29, %v457_v27  ;;  %v3629_v54 = vpack.c.bf16 %v294_v50, %v270_v49  ;;  %v318_v63 = vld [vmem:[%s6883_s1 + $0x1f8] sm:$0xff]  ;;  %v315_v3 = vld [vmem:[%s6883_s1 + $0x1e0] sm:$0xff] }
  0x42   : > { %3366 = vmatmul.mubr.msk.f32.gmra.mrb[12].mxu1 %vm669_vm0, %v4621_v32  ;;  %803 = vmatprep.mubr.f32.mxu0 %v4210_v7  ;;  %v3577_v40 = vpack.c.bf16 %v528_v31, %v504_v30  ;;  %v339_v4 = vld [vmem:[%s6883_s1 + $0x2a0] sm:$0xff]  ;;  %v317_v5 = vld [vmem:[%s6883_s1 + $0x1f0] sm:$0xff]  ;;  %v388_v10 = vld [vmem:[%s6883_s1 + $0x428] sm:$0xff] }
  0x43   : > { %922 = vmatprep.mubr.f32.mxu1 %v4210_v7  ;;  %v366_v12 = vld [vmem:[%s6883_s1 + $0x378] sm:$0xff]  ;;  %v363_v17 = vld [vmem:[%s6883_s1 + $0x360] sm:$0xff]  ;;  %v365_v19 = vld [vmem:[%s6883_s1 + $0x370] sm:$0xff] }
  0x44   : > { %v390_v13 = vld [vmem:[%s6883_s1 + $0x438] sm:$0xff]  ;;  %v387_v18 = vld [vmem:[%s6883_s1 + $0x420] sm:$0xff]  ;;  %v436_v24 = vld [vmem:[%s6883_s1 + $0x5a8] sm:$0xff] }
  0x45   : > { %3358 = vmatmul.mubr.msk.f32.gmra.mrb[14].mxu0 %vm669_vm0, %v4630_v33  ;;  %v414_v26 = vld [vmem:[%s6883_s1 + $0x4f8] sm:$0xff]  ;;  %v411_v31 = vld [vmem:[%s6883_s1 + $0x4e0] sm:$0xff]  ;;  %v413_v37 = vld [vmem:[%s6883_s1 + $0x4f0] sm:$0xff] }
  0x46   : > { %3367 = vmatmul.mubr.msk.f32.gmra.mrb[14].mxu1 %vm669_vm0, %v4630_v33  ;;  %809 = vmatprep.mubr.f32.mxu0 %v4210_v7  ;;  %v438_v27 = vld [vmem:[%s6883_s1 + $0x5b8] sm:$0xff]  ;;  %v435_v36 = vld [vmem:[%s6883_s1 + $0x5a0] sm:$0xff]  ;;  %v461_v50 = vld [vmem:[%s6883_s1 + $0x670] sm:$0xff] }
  0x47   : > { %928 = vmatprep.mubr.f32.mxu1 %v4210_v7  ;;  %v483_v49 = vld [vmem:[%s6883_s1 + $0x720] sm:$0xff]  ;;  %v510_v55 = vld [vmem:[%s6883_s1 + $0x7f8] sm:$0xff] }
  0x48   : > { %v534_v56 = vld [vmem:[%s6883_s1 + $0x8b8] sm:$0xff] }
  0x49   : > { %3359 = vmatmul.mubr.msk.f32.gmra.mrb[16].mxu0 %vm669_vm0, %v4639_v34 }
  0x4a   : > { %3368 = vmatmul.mubr.msk.f32.gmra.mrb[16].mxu1 %vm669_vm0, %v4639_v34  ;;  %999 = vmatprep.mubr.f32.mxu0 %v4210_v7 }
  0x4b   : > { %1118 = vmatprep.mubr.f32.mxu1 %v4210_v7 }
  0x4d   : > { %3369 = vmatmul.mubr.msk.f32.vlgmr.msra.gmra.mrb[18].mxu0 %vm669_vm0, %v4442_v22 }
  0x4e   : > { %3378 = vmatmul.mubr.msk.f32.vlgmr.msra.gmra.mrb[18].mxu1 %vm669_vm0, %v4442_v22  ;;  %3560 = vmatpush1.bf16.msra.mxu0 %v3559_v42  ;;  %v527_v42 = vld [vmem:[%s6883_s1 + $0x880] sm:$0xff] }
  0x4f   : > { %3584 = vmatpush1.bf16.msra.mxu1 %v3583_v45  ;;  %1005 = vmatprep.mubr.f32.mxu0 %v4210_v7  ;;  %v529_v45 = vld [vmem:[%s6883_s1 + $0x890] sm:$0xff] }
  0x50   : > { %1124 = vmatprep.mubr.f32.mxu1 %v4210_v7  ;;  %3562 = vmatprep.subr.bf16.mxu0 %v3561_v46  ;;  %v268_v46 = vld [vmem:[%s6883_s1 + $0x68] sm:$0xff]  ;;  %v3603_v52 = vpack.c.bf16 %v529_v45, %v505_v43  ;;  %v486_v43 = vld [vmem:[%s6883_s1 + $0x738] sm:$0xff] }
  0x51   : > { %3370 = vmatmul.mubr.msk.f32.gmra.mrb[20].mxu0 %vm669_vm0, %v4473_v35  ;;  %3586 = vmatprep.subr.bf16.mxu1 %v3585_v51  ;;  %v3579_v51 = vpack.c.bf16 %v527_v42, %v503_v41  ;;  %v3605_v53 = vpack.c.bf16 %v292_v47, %v268_v46  ;;  %v484_v41 = vld [vmem:[%s6883_s1 + $0x728] sm:$0xff]  ;;  %v462_v42 = vld [vmem:[%s6883_s1 + $0x678] sm:$0xff]  ;;  %v459_v47 = vld [vmem:[%s6883_s1 + $0x660] sm:$0xff] }
  0x52   : > { %3379 = vmatmul.mubr.msk.f32.gmra.mrb[20].mxu1 %vm669_vm0, %v4473_v35  ;;  %1011 = vmatprep.mubr.f32.mxu0 %v4210_v7 }
  0x53   : > { %1130 = vmatprep.mubr.f32.mxu1 %v4210_v7  ;;  %3564 = vmatpush1.bf16.msra.mxu0 %v3563_v57  ;;  %v269_v57 = vld [vmem:[%s6883_s1 + $0x70] sm:$0xff] }
  0x54   : > { %3588 = vmatpush1.bf16.msra.mxu1 %v3587_v58  ;;  %3566 = vmatprep.subr.bf16.mxu0 %v3565_v59  ;;  %v293_v58 = vld [vmem:[%s6883_s1 + $0x130] sm:$0xff]  ;;  %v316_v59 = vld [vmem:[%s6883_s1 + $0x1e8] sm:$0xff] }
  0x55   : > { %3371 = vmatmul.mubr.msk.f32.gmra.mrb[22].mxu0 %vm669_vm0, %v4507_v48  ;;  %3590 = vmatprep.subr.bf16.mxu1 %v3589_v0  ;;  %v342_v0 = vld [vmem:[%s6883_s1 + $0x2b8] sm:$0xff]  ;;  %v3631_v1 = vpack.c.bf16 %v293_v58, %v269_v57  ;;  %v3609_v2 = vpack.c.bf16 %v340_v60, %v316_v59  ;;  %v3623_v57 = vpack.c.bf16 %v483_v49, %v459_v47  ;;  %v507_v60 = vld [vmem:[%s6883_s1 + $0x7e0] sm:$0xff] }
  0x56   : > { %3380 = vmatmul.mubr.msk.f32.gmra.mrb[22].mxu1 %vm669_vm0, %v4507_v48  ;;  %1017 = vmatprep.mubr.f32.mxu0 %v4210_v7  ;;  %v418_v47 = vld [vmem:[%s6883_s1 + $0x518] sm:$0xff] }
  0x57   : > { %1136 = vmatprep.mubr.f32.mxu1 %v4210_v7  ;;  %3568 = vmatpush1.bf16.msra.mxu0 %v3567_v6  ;;  %v3633_v6 = vpack.c.bf16 %v342_v0, %v318_v63  ;;  %v509_v63 = vld [vmem:[%s6883_s1 + $0x7f0] sm:$0xff]  ;;  %v3649_v0 = vpack.c.bf16 %v534_v56, %v510_v55  ;;  %v442_v49 = vld [vmem:[%s6883_s1 + $0x5d8] sm:$0xff] }
  0x58   : > { %3592 = vmatpush1.bf16.msra.mxu1 %v3591_v8  ;;  %3570 = vmatprep.subr.bf16.mxu0 %v3569_v9  ;;  %v341_v8 = vld [vmem:[%s6883_s1 + $0x2b0] sm:$0xff]  ;;  %v364_v9 = vld [vmem:[%s6883_s1 + $0x368] sm:$0xff]  ;;  %v3689_v55 = vpack.c.bf16 %v442_v49, %v418_v47 }
  0x59   : > { %3372 = vmatmul.mubr.msk.f32.gmra.mrb[24].mxu0 %vm669_vm0, %v4540_v61  ;;  %3594 = vmatprep.subr.bf16.mxu1 %v3593_v14  ;;  %v3611_v14 = vpack.c.bf16 %v339_v4, %v315_v3  ;;  %v3635_v15 = vpack.c.bf16 %v341_v8, %v317_v5  ;;  %v3613_v16 = vpack.c.bf16 %v388_v10, %v364_v9  ;;  %v296_v3 = vld [vmem:[%s6883_s1 + $0x148] sm:$0xff]  ;;  %v274_v4 = vld [vmem:[%s6883_s1 + $0x98] sm:$0xff]  ;;  %v441_v56 = vld [vmem:[%s6883_s1 + $0x5d0] sm:$0xff] }
  0x5a   : > { %3381 = vmatmul.mubr.msk.f32.gmra.mrb[24].mxu1 %vm669_vm0, %v4540_v61  ;;  %1023 = vmatprep.mubr.f32.mxu0 %v4210_v7  ;;  %v298_v5 = vld [vmem:[%s6883_s1 + $0x158] sm:$0xff] }
  0x5b   : > { %1142 = vmatprep.mubr.f32.mxu1 %v4210_v7  ;;  %3572 = vmatpush1.bf16.msra.mxu0 %v3571_v20  ;;  %v3637_v20 = vpack.c.bf16 %v390_v13, %v366_v12  ;;  %v3677_v10 = vpack.c.bf16 %v298_v5, %v274_v4  ;;  %v271_v12 = vld [vmem:[%s6883_s1 + $0x80] sm:$0xff]  ;;  %v489_v4 = vld [vmem:[%s6883_s1 + $0x750] sm:$0xff]  ;;  %v512_v5 = vld [vmem:[%s6883_s1 + $0x808] sm:$0xff] }
  0x5c   : > { %3596 = vmatpush1.bf16.msra.mxu1 %v3595_v21  ;;  %3574 = vmatprep.subr.bf16.mxu0 %v3573_v23  ;;  %v389_v21 = vld [vmem:[%s6883_s1 + $0x430] sm:$0xff]  ;;  %v412_v23 = vld [vmem:[%s6883_s1 + $0x4e8] sm:$0xff]  ;;  %v295_v13 = vld [vmem:[%s6883_s1 + $0x140] sm:$0xff] }
  0x5d   : > { %3373 = vmatmul.mubr.msk.f32.gmra.mrb[26].mxu0 %vm669_vm0, %v4573_v11  ;;  %3598 = vmatprep.subr.bf16.mxu1 %v3597_v28  ;;  %v3615_v28 = vpack.c.bf16 %v387_v18, %v363_v17  ;;  %v3639_v29 = vpack.c.bf16 %v389_v21, %v365_v19  ;;  %v3617_v30 = vpack.c.bf16 %v436_v24, %v412_v23  ;;  %v344_v17 = vld [vmem:[%s6883_s1 + $0x2c8] sm:$0xff]  ;;  %v322_v19 = vld [vmem:[%s6883_s1 + $0x218] sm:$0xff]  ;;  %v319_v24 = vld [vmem:[%s6883_s1 + $0x200] sm:$0xff] }
  0x5e   : > { %3382 = vmatmul.mubr.msk.f32.gmra.mrb[26].mxu1 %vm669_vm0, %v4573_v11  ;;  %1029 = vmatprep.mubr.f32.mxu0 %v4210_v7  ;;  %v3655_v18 = vpack.c.bf16 %v295_v13, %v271_v12 }
  0x5f   : > { %1148 = vmatprep.mubr.f32.mxu1 %v4210_v7  ;;  %3576 = vmatpush1.bf16.msra.mxu0 %v3575_v38  ;;  %v3641_v38 = vpack.c.bf16 %v438_v27, %v414_v26  ;;  %v343_v26 = vld [vmem:[%s6883_s1 + $0x2c0] sm:$0xff]  ;;  %v321_v27 = vld [vmem:[%s6883_s1 + $0x210] sm:$0xff] }
  0x60   : > { %3600 = vmatpush1.bf16.msra.mxu1 %v3599_v39  ;;  %3578 = vmatprep.subr.bf16.mxu0 %v3577_v40  ;;  %v437_v39 = vld [vmem:[%s6883_s1 + $0x5b0] sm:$0xff]  ;;  %v460_v40 = vld [vmem:[%s6883_s1 + $0x668] sm:$0xff] }
  0x61   : > { %3374 = vmatmul.mubr.msk.f32.gmra.mrb[28].mxu0 %vm669_vm0, %v4606_v25  ;;  %3602 = vmatprep.subr.bf16.mxu1 %v3601_v44  ;;  %v3619_v44 = vpack.c.bf16 %v435_v36, %v411_v31  ;;  %v3643_v45 = vpack.c.bf16 %v437_v39, %v413_v37  ;;  %v3621_v46 = vpack.c.bf16 %v484_v41, %v460_v40  ;;  %v392_v31 = vld [vmem:[%s6883_s1 + $0x448] sm:$0xff]  ;;  %v370_v36 = vld [vmem:[%s6883_s1 + $0x398] sm:$0xff]  ;;  %v391_v41 = vld [vmem:[%s6883_s1 + $0x440] sm:$0xff] }
  0x62   : > { %3383 = vmatmul.mubr.msk.f32.gmra.mrb[28].mxu1 %vm669_vm0, %v4606_v25  ;;  %1035 = vmatprep.mubr.f32.mxu0 %v4210_v7  ;;  %v394_v37 = vld [vmem:[%s6883_s1 + $0x458] sm:$0xff] }
  0x63   : > { %1154 = vmatprep.mubr.f32.mxu1 %v4210_v7  ;;  %3580 = vmatpush1.bf16.msra.mxu0 %v3579_v51  ;;  %v3645_v51 = vpack.c.bf16 %v486_v43, %v462_v42  ;;  %v369_v42 = vld [vmem:[%s6883_s1 + $0x390] sm:$0xff]  ;;  %v3685_v43 = vpack.c.bf16 %v394_v37, %v370_v36  ;;  %v350_v36 = vld [vmem:[%s6883_s1 + $0x2f8] sm:$0xff] }
  0x64   : > { %3604 = vmatpush1.bf16.msra.mxu1 %v3603_v52  ;;  %3606 = vmatprep.subr.bf16.mxu0 %v3605_v53  ;;  %v485_v52 = vld [vmem:[%s6883_s1 + $0x730] sm:$0xff]  ;;  %v508_v53 = vld [vmem:[%s6883_s1 + $0x7e8] sm:$0xff] }
  0x65   : > { %3375 = vmatmul.mubr.msk.f32.gmra.mrb[30].mxu0 %vm669_vm0, %v4621_v32  ;;  %3630 = vmatprep.subr.bf16.mxu1 %v3629_v54  ;;  %v532_v54 = vld [vmem:[%s6883_s1 + $0x8a8] sm:$0xff]  ;;  %v3647_v58 = vpack.c.bf16 %v485_v52, %v461_v50 }
  0x66   : > { %3384 = vmatmul.mubr.msk.f32.gmra.mrb[30].mxu1 %vm669_vm0, %v4621_v32  ;;  %1041 = vmatprep.mubr.f32.mxu0 %v4210_v7  ;;  %v3625_v59 = vpack.c.bf16 %v532_v54, %v508_v53  ;;  %v439_v53 = vld [vmem:[%s6883_s1 + $0x5c0] sm:$0xff]  ;;  %v417_v54 = vld [vmem:[%s6883_s1 + $0x510] sm:$0xff] }
  0x67   : > { %1160 = vmatprep.mubr.f32.mxu1 %v4210_v7 }
  0x69   : > { %3376 = vmatmul.mubr.msk.f32.gmra.mrb[32].mxu0 %vm669_vm0, %v4630_v33 }
  0x6a   : > { %3385 = vmatmul.mubr.msk.f32.gmra.mrb[32].mxu1 %vm669_vm0, %v4630_v33  ;;  %1047 = vmatprep.mubr.f32.mxu0 %v4210_v7 }
  0x6b   : > { %1166 = vmatprep.mubr.f32.mxu1 %v4210_v7 }
  0x6d   : > { %3377 = vmatmul.mubr.msk.f32.gmra.mrb[34].mxu0 %vm669_vm0, %v4639_v34 }
  0x6e   : > { %3386 = vmatmul.mubr.msk.f32.gmra.mrb[34].mxu1 %vm669_vm0, %v4639_v34  ;;  %1237 = vmatprep.mubr.f32.mxu0 %v4210_v7 }
  0x6f   : > { %1356 = vmatprep.mubr.f32.mxu1 %v4210_v7 }
  0x71   : > { %3387 = vmatmul.mubr.msk.f32.vlgmr.msra.gmra.mrb[36].mxu0 %vm669_vm0, %v4442_v22 }
  0x72   : > { %3396 = vmatmul.mubr.msk.f32.vlgmr.msra.gmra.mrb[36].mxu1 %vm669_vm0, %v4442_v22  ;;  %3608 = vmatpush1.bf16.msra.mxu0 %v3607_v62  ;;  %v531_v62 = vld [vmem:[%s6883_s1 + $0x8a0] sm:$0xff] }
  0x73   : > { %3632 = vmatpush1.bf16.msra.mxu1 %v3631_v1  ;;  %1243 = vmatprep.mubr.f32.mxu0 %v4210_v7  ;;  %v533_v1 = vld [vmem:[%s6883_s1 + $0x8b0] sm:$0xff] }
  0x74   : > { %1362 = vmatprep.mubr.f32.mxu1 %v4210_v7  ;;  %3610 = vmatprep.subr.bf16.mxu0 %v3609_v2  ;;  %v272_v2 = vld [vmem:[%s6883_s1 + $0x88] sm:$0xff]  ;;  %v3651_v8 = vpack.c.bf16 %v533_v1, %v509_v63  ;;  %v3691_v63 = vpack.c.bf16 %v441_v56, %v417_v54  ;;  %v487_v1 = vld [vmem:[%s6883_s1 + $0x740] sm:$0xff] }
  0x75   : > { %3388 = vmatmul.mubr.msk.f32.gmra.mrb[38].mxu0 %vm669_vm0, %v4473_v35  ;;  %3634 = vmatprep.subr.bf16.mxu1 %v3633_v6  ;;  %v3627_v6 = vpack.c.bf16 %v531_v62, %v507_v60  ;;  %v3653_v9 = vpack.c.bf16 %v296_v3, %v272_v2  ;;  %v490_v60 = vld [vmem:[%s6883_s1 + $0x758] sm:$0xff]  ;;  %v465_v2 = vld [vmem:[%s6883_s1 + $0x690] sm:$0xff]  ;;  %v420_v56 = vld [vmem:[%s6883_s1 + $0x528] sm:$0xff] }
  0x76   : > { %3397 = vmatmul.mubr.msk.f32.gmra.mrb[38].mxu1 %vm669_vm0, %v4473_v35  ;;  %1249 = vmatprep.mubr.f32.mxu0 %v4210_v7  ;;  %v3695_v12 = vpack.c.bf16 %v489_v4, %v465_v2  ;;  %v5342_v2 = vld [vmem:[%s4421_s10 + $0x10] sm:$0xff] }
  0x77   : > { %1368 = vmatprep.mubr.f32.mxu1 %v4210_v7  ;;  %3612 = vmatpush1.bf16.msra.mxu0 %v3611_v14  ;;  %v273_v14 = vld [vmem:[%s6883_s1 + $0x90] sm:$0xff] }
  0x78   : > { %3636 = vmatpush1.bf16.msra.mxu1 %v3635_v15  ;;  %3614 = vmatprep.subr.bf16.mxu0 %v3613_v16  ;;  %v297_v15 = vld [vmem:[%s6883_s1 + $0x150] sm:$0xff]  ;;  %v320_v16 = vld [vmem:[%s6883_s1 + $0x208] sm:$0xff] }
  0x79   : > { %3389 = vmatmul.mubr.msk.f32.gmra.mrb[40].mxu0 %vm669_vm0, %v4507_v48  ;;  %3638 = vmatprep.subr.bf16.mxu1 %v3637_v20  ;;  %v346_v20 = vld [vmem:[%s6883_s1 + $0x2d8] sm:$0xff]  ;;  %v3679_v21 = vpack.c.bf16 %v297_v15, %v273_v14  ;;  %v3657_v23 = vpack.c.bf16 %v344_v17, %v320_v16  ;;  %v535_v14 = vld [vmem:[%s6883_s1 + $0x8c0] sm:$0xff]  ;;  %v513_v15 = vld [vmem:[%s6883_s1 + $0x810] sm:$0xff] }
  0x7a   : > { %3398 = vmatmul.mubr.msk.f32.gmra.mrb[40].mxu1 %vm669_vm0, %v4507_v48  ;;  %1255 = vmatprep.mubr.f32.mxu0 %v4210_v7  ;;  %v537_v17 = vld [vmem:[%s6883_s1 + $0x8d0] sm:$0xff] }
  0x7b   : > { %1374 = vmatprep.mubr.f32.mxu1 %v4210_v7  ;;  %3616 = vmatpush1.bf16.msra.mxu0 %v3615_v28  ;;  %v3681_v28 = vpack.c.bf16 %v346_v20, %v322_v19  ;;  %v300_v19 = vld [vmem:[%s6883_s1 + $0x168] sm:$0xff]  ;;  %v278_v20 = vld [vmem:[%s6883_s1 + $0xb8] sm:$0xff]  ;;  %v445_v4 = vld [vmem:[%s6883_s1 + $0x5f0] sm:$0xff] }
  0x7c   : > { %3640 = vmatpush1.bf16.msra.mxu1 %v3639_v29  ;;  %3618 = vmatprep.subr.bf16.mxu0 %v3617_v30  ;;  %v345_v29 = vld [vmem:[%s6883_s1 + $0x2d0] sm:$0xff]  ;;  %v368_v30 = vld [vmem:[%s6883_s1 + $0x388] sm:$0xff] }
  0x7d   : > { %3390 = vmatmul.mubr.msk.f32.gmra.mrb[42].mxu0 %vm669_vm0, %v4540_v61  ;;  %3642 = vmatprep.subr.bf16.mxu1 %v3641_v38  ;;  %v3659_v38 = vpack.c.bf16 %v343_v26, %v319_v24  ;;  %v3683_v39 = vpack.c.bf16 %v345_v29, %v321_v27  ;;  %v3661_v40 = vpack.c.bf16 %v392_v31, %v368_v30  ;;  %v277_v27 = vld [vmem:[%s6883_s1 + $0xb0] sm:$0xff]  ;;  %v348_v29 = vld [vmem:[%s6883_s1 + $0x2e8] sm:$0xff]  ;;  %v326_v31 = vld [vmem:[%s6883_s1 + $0x238] sm:$0xff] }
  0x7e   : > { %3399 = vmatmul.mubr.msk.f32.gmra.mrb[42].mxu1 %vm669_vm0, %v4540_v61  ;;  %1261 = vmatprep.mubr.f32.mxu0 %v4210_v7  ;;  %v3699_v24 = vpack.c.bf16 %v537_v17, %v513_v15  ;;  %v469_v15 = vld [vmem:[%s6883_s1 + $0x6b0] sm:$0xff] }
  0x7f   : > { %1380 = vmatprep.mubr.f32.mxu1 %v4210_v7  ;;  %3620 = vmatpush1.bf16.msra.mxu0 %v3619_v44  ;;  %v393_v44 = vld [vmem:[%s6883_s1 + $0x450] sm:$0xff] }
  0x80   : > { %3644 = vmatpush1.bf16.msra.mxu1 %v3643_v45  ;;  %3622 = vmatprep.subr.bf16.mxu0 %v3621_v46  ;;  %v416_v45 = vld [vmem:[%s6883_s1 + $0x508] sm:$0xff] }
  0x81   : > { %3391 = vmatmul.mubr.msk.f32.gmra.mrb[44].mxu0 %vm669_vm0, %v4573_v11  ;;  %3646 = vmatprep.subr.bf16.mxu1 %v3645_v51  ;;  %v440_v46 = vld [vmem:[%s6883_s1 + $0x5c8] sm:$0xff]  ;;  %v3687_v51 = vpack.c.bf16 %v393_v44, %v369_v42  ;;  %v349_v42 = vld [vmem:[%s6883_s1 + $0x2f0] sm:$0xff] }
  0x82   : > { %3400 = vmatmul.mubr.msk.f32.gmra.mrb[44].mxu1 %vm669_vm0, %v4573_v11  ;;  %1267 = vmatprep.mubr.f32.mxu0 %v4210_v7  ;;  %v3665_v52 = vpack.c.bf16 %v440_v46, %v416_v45  ;;  %v396_v44 = vld [vmem:[%s6883_s1 + $0x468] sm:$0xff]  ;;  %v374_v45 = vld [vmem:[%s6883_s1 + $0x3b8] sm:$0xff] }
  0x83   : > { %1386 = vmatprep.mubr.f32.mxu1 %v4210_v7  ;;  %3624 = vmatpush1.bf16.msra.mxu0 %v3623_v57  ;;  %v464_v57 = vld [vmem:[%s6883_s1 + $0x688] sm:$0xff]  ;;  %v398_v46 = vld [vmem:[%s6883_s1 + $0x478] sm:$0xff] }
  0x84   : > { %3648 = vmatpush1.bf16.msra.mxu1 %v3647_v58  ;;  %3626 = vmatprep.subr.bf16.mxu0 %v3625_v59  ;;  %v488_v58 = vld [vmem:[%s6883_s1 + $0x748] sm:$0xff]  ;;  %v466_v59 = vld [vmem:[%s6883_s1 + $0x698] sm:$0xff]  ;;  %v3733_v54 = vpack.c.bf16 %v398_v46, %v374_v45 }
  0x85   : > { %3392 = vmatmul.mubr.msk.f32.gmra.mrb[46].mxu0 %vm669_vm0, %v4606_v25  ;;  %3650 = vmatprep.subr.bf16.mxu1 %v3649_v0  ;;  %v3669_v0 = vpack.c.bf16 %v488_v58, %v464_v57  ;;  %v3693_v3 = vpack.c.bf16 %v490_v60, %v466_v59  ;;  %v444_v57 = vld [vmem:[%s6883_s1 + $0x5e8] sm:$0xff]  ;;  %v422_v58 = vld [vmem:[%s6883_s1 + $0x538] sm:$0xff] }
  0x86   : > { %3401 = vmatmul.mubr.msk.f32.gmra.mrb[46].mxu1 %vm669_vm0, %v4606_v25  ;;  %1273 = vmatprep.mubr.f32.mxu0 %v4210_v7  ;;  %v446_v59 = vld [vmem:[%s6883_s1 + $0x5f8] sm:$0xff] }
  0x87   : > { %1392 = vmatprep.mubr.f32.mxu1 %v4210_v7  ;;  %3628 = vmatpush1.bf16.msra.mxu0 %v3627_v6  ;;  %v536_v6 = vld [vmem:[%s6883_s1 + $0x8c8] sm:$0xff] }
  0x88   : > { %3652 = vmatpush1.bf16.msra.mxu1 %v3651_v8  ;;  %3654 = vmatprep.subr.bf16.mxu0 %v3653_v9  ;;  %v514_v8 = vld [vmem:[%s6883_s1 + $0x818] sm:$0xff]  ;;  %v3673_v13 = vpack.c.bf16 %v536_v6, %v512_v5  ;;  %v468_v5 = vld [vmem:[%s6883_s1 + $0x6a8] sm:$0xff] }
  0x89   : > { %3393 = vmatmul.mubr.msk.f32.gmra.mrb[48].mxu0 %vm669_vm0, %v4621_v32  ;;  %3678 = vmatprep.subr.bf16.mxu1 %v3677_v10  ;;  %v538_v9 = vld [vmem:[%s6883_s1 + $0x8d8] sm:$0xff]  ;;  %v492_v6 = vld [vmem:[%s6883_s1 + $0x768] sm:$0xff] }
  0x8a   : > { %3402 = vmatmul.mubr.msk.f32.gmra.mrb[48].mxu1 %vm669_vm0, %v4621_v32  ;;  %1279 = vmatprep.mubr.f32.mxu0 %v4210_v7  ;;  %v3697_v16 = vpack.c.bf16 %v538_v9, %v514_v8  ;;  %v470_v8 = vld [vmem:[%s6883_s1 + $0x6b8] sm:$0xff] }
  0x8b   : > { %1398 = vmatprep.mubr.f32.mxu1 %v4210_v7  ;;  %v494_v9 = vld [vmem:[%s6883_s1 + $0x778] sm:$0xff] }
  0x8c   : > { %v3741_v17 = vpack.c.bf16 %v494_v9, %v470_v8 }
  0x8d   : > { %3394 = vmatmul.mubr.msk.f32.gmra.mrb[50].mxu0 %vm669_vm0, %v4630_v33 }
  0x8e   : > { %3403 = vmatmul.mubr.msk.f32.gmra.mrb[50].mxu1 %vm669_vm0, %v4630_v33  ;;  %1285 = vmatprep.mubr.f32.mxu0 %v4210_v7 }
  0x8f   : > { %1404 = vmatprep.mubr.f32.mxu1 %v4210_v7 }
  0x91   : > { %3395 = vmatmul.mubr.msk.f32.gmra.mrb[52].mxu0 %vm669_vm0, %v4639_v34 }
  0x92   : > { %3404 = vmatmul.mubr.msk.f32.gmra.mrb[52].mxu1 %vm669_vm0, %v4639_v34  ;;  %1475 = vmatprep.mubr.f32.mxu0 %v4210_v7 }
  0x93   : > { %1594 = vmatprep.mubr.f32.mxu1 %v4210_v7 }
  0x95   : > { %3405 = vmatmul.mubr.msk.f32.vlgmr.msra.gmra.mrb[54].mxu0 %vm669_vm0, %v4442_v22 }
  0x96   : > { %3414 = vmatmul.mubr.msk.f32.vlgmr.msra.gmra.mrb[54].mxu1 %vm669_vm0, %v4442_v22  ;;  %3656 = vmatpush1.bf16.msra.mxu0 %v3655_v18  ;;  %v367_v22 = vld [vmem:[%s6883_s1 + $0x380] sm:$0xff]  ;;  %v276_v18 = vld [vmem:[%s6883_s1 + $0xa8] sm:$0xff] }
  0x97   : > { %3680 = vmatpush1.bf16.msra.mxu1 %v3679_v21  ;;  %1481 = vmatprep.mubr.f32.mxu0 %v4210_v7  ;;  %v3663_v50 = vpack.c.bf16 %v391_v41, %v367_v22  ;;  %v302_v21 = vld [vmem:[%s6883_s1 + $0x178] sm:$0xff]  ;;  %v3701_v26 = vpack.c.bf16 %v300_v19, %v276_v18  ;;  %v5276_v22 = vld [vmem:[%s4421_s10] sm:$0xff]  ;;  %v3729_v41 = vpack.c.bf16 %v350_v36, %v326_v31  ;;  %v493_v18 = vld [vmem:[%s6883_s1 + $0x770] sm:$0xff] }
  0x98   : > { %1600 = vmatprep.mubr.f32.mxu1 %v4210_v7  ;;  %3658 = vmatprep.subr.bf16.mxu0 %v3657_v23  ;;  %v516_v19 = vld [vmem:[%s6883_s1 + $0x828] sm:$0xff] }
  0x99   : > { %3406 = vmatmul.mubr.msk.f32.gmra.mrb[56].mxu0 %vm669_vm0, %v4473_v35  ;;  %3682 = vmatprep.subr.bf16.mxu1 %v3681_v28  ;;  %v324_v28 = vld [vmem:[%s6883_s1 + $0x228] sm:$0xff] }
  0x9a   : > { %3415 = vmatmul.mubr.msk.f32.gmra.mrb[56].mxu1 %vm669_vm0, %v4473_v35  ;;  %1487 = vmatprep.mubr.f32.mxu0 %v4210_v7  ;;  %v415_v35 = vld [vmem:[%s6883_s1 + $0x500] sm:$0xff]  ;;  %v4197_v36 = vld [vmem:[%s4421_s10 + $0x28] sm:$0xff] }
  0x9b   : > { %1606 = vmatprep.mubr.f32.mxu1 %v4210_v7  ;;  %3660 = vmatpush1.bf16.msra.mxu0 %v3659_v38  ;;  %v3667_v62 = vpack.c.bf16 %v439_v53, %v415_v35  ;;  %v3705_v38 = vpack.c.bf16 %v348_v29, %v324_v28  ;;  %v373_v35 = vld [vmem:[%s6883_s1 + $0x3b0] sm:$0xff]  ;;  %v5309_v53 = vld [vmem:[%s4421_s10 + $0x8] sm:$0xff] }
  0x9c   : > { %3684 = vmatpush1.bf16.msra.mxu1 %v3683_v39  ;;  %3662 = vmatprep.subr.bf16.mxu0 %v3661_v40  ;;  %v323_v39 = vld [vmem:[%s6883_s1 + $0x220] sm:$0xff]  ;;  %v325_v40 = vld [vmem:[%s6883_s1 + $0x230] sm:$0xff] }
  0x9d   : > { %3407 = vmatmul.mubr.msk.f32.gmra.mrb[58].mxu0 %vm669_vm0, %v4507_v48  ;;  %3686 = vmatprep.subr.bf16.mxu1 %v3685_v43  ;;  %v372_v43 = vld [vmem:[%s6883_s1 + $0x3a8] sm:$0xff]  ;;  %v3731_v49 = vpack.c.bf16 %v349_v42, %v325_v40  ;;  %v517_v28 = vld [vmem:[%s6883_s1 + $0x830] sm:$0xff] }
  0x9e   : > { %3416 = vmatmul.mubr.msk.f32.gmra.mrb[58].mxu1 %vm669_vm0, %v4507_v48  ;;  %1493 = vmatprep.mubr.f32.mxu0 %v4210_v7  ;;  %v463_v48 = vld [vmem:[%s6883_s1 + $0x680] sm:$0xff]  ;;  %v541_v29 = vld [vmem:[%s6883_s1 + $0x8f0] sm:$0xff] }
  0x9f   : > { %1612 = vmatprep.mubr.f32.mxu1 %v4210_v7  ;;  %3664 = vmatpush1.bf16.msra.mxu0 %v3663_v50  ;;  %v3671_v10 = vpack.c.bf16 %v487_v1, %v463_v48  ;;  %v3709_v50 = vpack.c.bf16 %v396_v44, %v372_v43  ;;  %v443_v48 = vld [vmem:[%s6883_s1 + $0x5e0] sm:$0xff]  ;;  %v421_v1 = vld [vmem:[%s6883_s1 + $0x530] sm:$0xff]  ;;  %v3747_v31 = vpack.c.bf16 %v541_v29, %v517_v28 }
  0xa0   : > { %3688 = vmatpush1.bf16.msra.mxu1 %v3687_v51  ;;  %3666 = vmatprep.subr.bf16.mxu0 %v3665_v52  ;;  %v371_v51 = vld [vmem:[%s6883_s1 + $0x3a0] sm:$0xff] }
  0xa1   : > { %3408 = vmatmul.mubr.msk.f32.gmra.mrb[60].mxu0 %vm669_vm0, %v4540_v61  ;;  %3690 = vmatprep.subr.bf16.mxu1 %v3689_v55  ;;  %v395_v52 = vld [vmem:[%s6883_s1 + $0x460] sm:$0xff]  ;;  %v397_v55 = vld [vmem:[%s6883_s1 + $0x470] sm:$0xff] }
  0xa2   : > { %3417 = vmatmul.mubr.msk.f32.gmra.mrb[60].mxu1 %vm669_vm0, %v4540_v61  ;;  %1499 = vmatprep.mubr.f32.mxu0 %v4210_v7  ;;  %v511_v61 = vld [vmem:[%s6883_s1 + $0x800] sm:$0xff]  ;;  %v3711_v60 = vpack.c.bf16 %v395_v52, %v371_v51 }
  0xa3   : > { %1618 = vmatprep.mubr.f32.mxu1 %v4210_v7  ;;  %3668 = vmatpush1.bf16.msra.mxu0 %v3667_v62  ;;  %v3675_v23 = vpack.c.bf16 %v535_v14, %v511_v61  ;;  %v3735_v62 = vpack.c.bf16 %v397_v55, %v373_v35  ;;  %v467_v61 = vld [vmem:[%s6883_s1 + $0x6a0] sm:$0xff] }
  0xa4   : > { %3692 = vmatpush1.bf16.msra.mxu1 %v3691_v63  ;;  %3670 = vmatprep.subr.bf16.mxu0 %v3669_v0  ;;  %v3713_v63 = vpack.c.bf16 %v444_v57, %v420_v56  ;;  %v419_v0 = vld [vmem:[%s6883_s1 + $0x520] sm:$0xff] }
  0xa5   : > { %3409 = vmatmul.mubr.msk.f32.gmra.mrb[62].mxu0 %vm669_vm0, %v4573_v11  ;;  %3694 = vmatprep.subr.bf16.mxu1 %v3693_v3  ;;  %v3737_v3 = vpack.c.bf16 %v446_v59, %v422_v58  ;;  %v491_v14 = vld [vmem:[%s6883_s1 + $0x760] sm:$0xff] }
  0xa6   : > { %3418 = vmatmul.mubr.msk.f32.gmra.mrb[62].mxu1 %vm669_vm0, %v4573_v11  ;;  %1505 = vmatprep.mubr.f32.mxu0 %v4210_v7  ;;  %v3725_v11 = vpack.c.bf16 %v302_v21, %v278_v20  ;;  %v540_v20 = vld [vmem:[%s6883_s1 + $0x8e8] sm:$0xff]  ;;  %v518_v21 = vld [vmem:[%s6883_s1 + $0x838] sm:$0xff] }
  0xa7   : > { %1624 = vmatprep.mubr.f32.mxu1 %v4210_v7  ;;  %3672 = vmatpush1.bf16.msra.mxu0 %v3671_v10  ;;  %v3715_v10 = vpack.c.bf16 %v443_v48, %v419_v0 }
  0xa8   : > { %3696 = vmatpush1.bf16.msra.mxu1 %v3695_v12  ;;  %3674 = vmatprep.subr.bf16.mxu0 %v3673_v13  ;;  %v3739_v12 = vpack.c.bf16 %v445_v4, %v421_v1  ;;  %v3717_v13 = vpack.c.bf16 %v492_v6, %v468_v5 }
  0xa9   : > { %3410 = vmatmul.mubr.msk.f32.gmra.mrb[64].mxu0 %vm669_vm0, %v4606_v25  ;;  %3698 = vmatprep.subr.bf16.mxu1 %v3697_v16  ;;  %v5375_v16 = vld [vmem:[%s4421_s10 + $0x18] sm:$0xff] }
  0xaa   : > { %3419 = vmatmul.mubr.msk.f32.gmra.mrb[64].mxu1 %vm669_vm0, %v4606_v25  ;;  %1511 = vmatprep.mubr.f32.mxu0 %v4210_v7  ;;  %v275_v25 = vld [vmem:[%s6883_s1 + $0xa0] sm:$0xff] }
  0xab   : > { %1630 = vmatprep.mubr.f32.mxu1 %v4210_v7  ;;  %3676 = vmatpush1.bf16.msra.mxu0 %v3675_v23  ;;  %v542_v23 = vld [vmem:[%s6883_s1 + $0x8f8] sm:$0xff] }
  0xac   : > { %3700 = vmatpush1.bf16.msra.mxu1 %v3699_v24  ;;  %3702 = vmatprep.subr.bf16.mxu0 %v3701_v26  ;;  %v3719_v24 = vpack.c.bf16 %v491_v14, %v467_v61  ;;  %v3743_v26 = vpack.c.bf16 %v493_v18, %v469_v15 }
  0xad   : > { %3411 = vmatmul.mubr.msk.f32.gmra.mrb[66].mxu0 %vm669_vm0, %v4621_v32  ;;  %3726 = vmatprep.subr.bf16.mxu1 %v3725_v11  ;;  %v3721_v11 = vpack.c.bf16 %v540_v20, %v516_v19 }
  0xae   : > { %3420 = vmatmul.mubr.msk.f32.gmra.mrb[66].mxu1 %vm669_vm0, %v4621_v32  ;;  %1517 = vmatprep.mubr.f32.mxu0 %v4210_v7  ;;  %v299_v32 = vld [vmem:[%s6883_s1 + $0x160] sm:$0xff] }
  0xaf   : > { %1636 = vmatprep.mubr.f32.mxu1 %v4210_v7  ;;  %v3703_v30 = vpack.c.bf16 %v299_v32, %v275_v25  ;;  %v515_v25 = vld [vmem:[%s6883_s1 + $0x820] sm:$0xff] }
  0xb0   : > { %v539_v32 = vld [vmem:[%s6883_s1 + $0x8e0] sm:$0xff] }
  0xb1   : > { %3412 = vmatmul.mubr.msk.f32.gmra.mrb[68].mxu0 %vm669_vm0, %v4630_v33 }
  0xb2   : > { %3421 = vmatmul.mubr.msk.f32.gmra.mrb[68].mxu1 %vm669_vm0, %v4630_v33  ;;  %1523 = vmatprep.mubr.f32.mxu0 %v4210_v7  ;;  %v301_v33 = vld [vmem:[%s6883_s1 + $0x170] sm:$0xff] }
  0xb3   : > { %1642 = vmatprep.mubr.f32.mxu1 %v4210_v7  ;;  %v3727_v37 = vpack.c.bf16 %v301_v33, %v277_v27  ;;  %v4196_v27 = vld [vmem:[%s4421_s10 + $0x20] sm:$0xff]  ;;  %v3745_v33 = vpack.c.bf16 %v542_v23, %v518_v21 }
  0xb5   : > { %3413 = vmatmul.mubr.msk.f32.gmra.mrb[70].mxu0 %vm669_vm0, %v4639_v34 }
  0xb6   : > { %3422 = vmatmul.mubr.msk.f32.gmra.mrb[70].mxu1 %vm669_vm0, %v4639_v34  ;;  %1713 = vmatprep.mubr.f32.mxu0 %v4210_v7  ;;  %v347_v34 = vld [vmem:[%s6883_s1 + $0x2e0] sm:$0xff] }
  0xb7   : > { %1832 = vmatprep.mubr.f32.mxu1 %v4210_v7  ;;  %v3707_v47 = vpack.c.bf16 %v347_v34, %v323_v39  ;;  %v4200_v39 = vld [vmem:[%s4421_s10 + $0x40] sm:$0xff]  ;;  %v549_v34 = vlaneseq }
  0xb9   : > { %3423 = vmatmul.mubr.msk.f32.vlgmr.msra.gmra.mrb[72].mxu0 %vm669_vm0, %v5276_v22  ;;  %v5464_v40 = vshrl.u32 %v549_v34, 7 }
  0xba   : > { %3432 = vmatmul.mubr.msk.f32.vlgmr.msra.gmra.mrb[72].mxu1 %vm669_vm0, %v5276_v22  ;;  %3704 = vmatpush1.bf16.msra.mxu0 %v3703_v30  ;;  %v3723_v30 = vpack.c.bf16 %v539_v32, %v515_v25 }
  0xbb   : > { %3728 = vmatpush1.bf16.msra.mxu1 %v3727_v37  ;;  %1719 = vmatprep.mubr.f32.mxu0 %v4210_v7  ;;  %v4198_v37 = vld [vmem:[%s4421_s10 + $0x30] sm:$0xff]  ;;  %v5481_v42 = vsub.s32 2, %v5464_v40  ;;  %v5485_v43 = vsub.s32 3, %v5464_v40  ;;  %v5493_v45 = vsub.s32 1, %v5464_v40  ;;  %v5536_v29 = vsub.s32 5, %v5464_v40 }
  0xbc   : > { %1838 = vmatprep.mubr.f32.mxu1 %v4210_v7  ;;  %3706 = vmatprep.subr.bf16.mxu0 %v3705_v38  ;;  %v4199_v38 = vld [vmem:[%s4421_s10 + $0x38] sm:$0xff] }
  0xbd   : > { %3424 = vmatmul.mubr.msk.f32.gmra.mrb[74].mxu0 %vm669_vm0, %v5309_v53  ;;  %3730 = vmatprep.subr.bf16.mxu1 %v3729_v41  ;;  %v5478_v41 = vld [vmem:[%s6884_s2] sm:$0xff]  ;;  %6902 = vst [vmem:[#allocation3_spill] sm:$0xff] %v5481_v42  ;;  %6903 = vst [vmem:[#allocation4_spill] sm:$0xff] %v5485_v43 }
  0xbe   : > { %3433 = vmatmul.mubr.msk.f32.gmra.mrb[74].mxu1 %vm669_vm0, %v5309_v53  ;;  %1725 = vmatprep.mubr.f32.mxu0 %v4210_v7  ;;  %6904 = vst [vmem:[#allocation5_spill] sm:$0xff] %v5493_v45  ;;  %v5498_v46 = vrot.slane %v5478_v41, %v5481_v42  ;;  %v5509_v52 = vrot.slane %v5478_v41, %v5493_v45  ;;  %6907 = vst [vmem:[#allocation8_spill] sm:$0xff] %v5536_v29 }
  0xbf   : > { %1844 = vmatprep.mubr.f32.mxu1 %v4210_v7  ;;  %3708 = vmatpush1.bf16.msra.mxu0 %v3707_v47  ;;  %v5504_v47 = vrot.slane %v5478_v41, %v5485_v43 }
  0xc0   : > { %3732 = vmatpush1.bf16.msra.mxu1 %v3731_v49  ;;  %3710 = vmatprep.subr.bf16.mxu0 %v3709_v50 }
  0xc1   : > { %3425 = vmatmul.mubr.msk.f32.gmra.mrb[76].mxu0 %vm669_vm0, %v5342_v2  ;;  %3734 = vmatprep.subr.bf16.mxu1 %v3733_v54 }
  0xc2   : > { %3434 = vmatmul.mubr.msk.f32.gmra.mrb[76].mxu1 %vm669_vm0, %v5342_v2  ;;  %1731 = vmatprep.mubr.f32.mxu0 %v4210_v7 }
  0xc3   : > { %1850 = vmatprep.mubr.f32.mxu1 %v4210_v7  ;;  %3712 = vmatpush1.bf16.msra.mxu0 %v3711_v60 }
  0xc4   : > { %3736 = vmatpush1.bf16.msra.mxu1 %v3735_v62  ;;  %3714 = vmatprep.subr.bf16.mxu0 %v3713_v63 }
  0xc5   : > { %3426 = vmatmul.mubr.msk.f32.gmra.mrb[78].mxu0 %vm669_vm0, %v5375_v16  ;;  %3738 = vmatprep.subr.bf16.mxu1 %v3737_v3 }
  0xc6   : > { %3435 = vmatmul.mubr.msk.f32.gmra.mrb[78].mxu1 %vm669_vm0, %v5375_v16  ;;  %1737 = vmatprep.mubr.f32.mxu0 %v4210_v7 }
  0xc7   : > { %1856 = vmatprep.mubr.f32.mxu1 %v4210_v7  ;;  %3716 = vmatpush1.bf16.msra.mxu0 %v3715_v10 }
  0xc8   : > { %3740 = vmatpush1.bf16.msra.mxu1 %v3739_v12  ;;  %3718 = vmatprep.subr.bf16.mxu0 %v3717_v13 }
  0xc9   : > { %3427 = vmatmul.mubr.msk.f32.gmra.mrb[80].mxu0 %vm669_vm0, %v4196_v27  ;;  %3742 = vmatprep.subr.bf16.mxu1 %v3741_v17 }
  0xca   : > { %3436 = vmatmul.mubr.msk.f32.gmra.mrb[80].mxu1 %vm669_vm0, %v4196_v27  ;;  %1743 = vmatprep.mubr.f32.mxu0 %v4210_v7 }
  0xcb   : > { %1862 = vmatprep.mubr.f32.mxu1 %v4210_v7  ;;  %3720 = vmatpush1.bf16.msra.mxu0 %v3719_v24  ;;  %v5526_v24 = vsub.s32 4, %v5464_v40 }
  0xcc   : > { %3744 = vmatpush1.bf16.msra.mxu1 %v3743_v26  ;;  %3722 = vmatprep.subr.bf16.mxu0 %v3721_v11  ;;  %v5529_v26 = vsub.s32 6, %v5464_v40  ;;  %v2989_v11 = vld [vmem:[%s6885_s3] sm:$0x7] }
  0xcd   : > { %3428 = vmatmul.mubr.msk.f32.gmra.mrb[82].mxu0 %vm669_vm0, %v4197_v36  ;;  %3746 = vmatprep.subr.bf16.mxu1 %v3745_v33  ;;  %6905 = vst [vmem:[#allocation6_spill] sm:$0xff] %v5526_v24 }
  0xce   : > { %3437 = vmatmul.mubr.msk.f32.gmra.mrb[82].mxu1 %vm669_vm0, %v4197_v36  ;;  %1749 = vmatprep.mubr.f32.mxu0 %v4210_v7  ;;  %6906 = vst [vmem:[#allocation7_spill] sm:$0xff] %v5529_v26 }
  0xcf   : > { %1868 = vmatprep.mubr.f32.mxu1 %v4210_v7  ;;  %3724 = vmatpush1.bf16.msra.mxu0 %v3723_v30  ;;  %v5539_v30 = vsub.s32 7, %v5464_v40 }
  0xd0   : > { %3748 = vmatpush1.bf16.msra.mxu1 %v3747_v31 }
  0xd1   : > { %3429 = vmatmul.mubr.msk.f32.gmra.mrb[84].mxu0 %vm669_vm0, %v4198_v37  ;;  %6908 = vst [vmem:[#allocation9_spill] sm:$0xff] %v5539_v30 }
  0xd2   : > { %3438 = vmatmul.mubr.msk.f32.gmra.mrb[84].mxu1 %vm669_vm0, %v4198_v37  ;;  %1755 = vmatprep.mubr.f32.mxu0 %v4210_v7 }
  0xd3   : > { %1874 = vmatprep.mubr.f32.mxu1 %v4210_v7 }
  0xd5   : > { %3430 = vmatmul.mubr.msk.f32.gmra.mrb[86].mxu0 %vm669_vm0, %v4199_v38 }
  0xd6   : > { %3439 = vmatmul.mubr.msk.f32.gmra.mrb[86].mxu1 %vm669_vm0, %v4199_v38  ;;  %1761 = vmatprep.mubr.f32.mxu0 %v4210_v7 }
  0xd7   : > { %1880 = vmatprep.mubr.f32.mxu1 %v4210_v7 }
  0xd9   : > { %3431 = vmatmul.mubr.msk.f32.gmra.mrb[88].mxu0 %vm669_vm0, %v4200_v39 }
  0xda   : > { %3440 = vmatmul.mubr.msk.f32.gmra.mrb[88].mxu1 %vm669_vm0, %v4200_v39  ;;  %1951 = vmatprep.mubr.f32.mxu0 %v4210_v7 }
  0xdb   : > { %2070 = vmatprep.mubr.f32.mxu1 %v4210_v7 }
  0xdd   : > { %3441 = vmatmul.mubr.msk.f32.vlgmr.msra.gmra.mrb[90].mxu0 %vm669_vm0, %v5276_v22 }
  0xde   : > { %3450 = vmatmul.mubr.msk.f32.vlgmr.msra.gmra.mrb[90].mxu1 %vm669_vm0, %v5276_v22  ;;  %1957 = vmatprep.mubr.f32.mxu0 %v4210_v7  ;;  %v5471_v22 = vsub.s32 0, %v5464_v40  ;;  %v5550_v40 = vrot.slane %v5478_v41, %v5526_v24 }
  0xdf   : > { %2076 = vmatprep.mubr.f32.mxu1 %v4210_v7 }
  0xe0   : > { %6901 = vst [vmem:[#allocation2_spill] sm:$0xff] %v5471_v22  ;;  %v5490_v44 = vrot.slane %v5478_v41, %v5471_v22 }
  0xe1   : > { %3442 = vmatmul.mubr.msk.f32.gmra.mrb[92].mxu0 %vm669_vm0, %v5309_v53 }
  0xe2   : > { %3451 = vmatmul.mubr.msk.f32.gmra.mrb[92].mxu1 %vm669_vm0, %v5309_v53  ;;  %1963 = vmatprep.mubr.f32.mxu0 %v4210_v7 }
  0xe3   : > { %2082 = vmatprep.mubr.f32.mxu1 %v4210_v7 }
  0xe5   : > { %3443 = vmatmul.mubr.msk.f32.gmra.mrb[94].mxu0 %vm669_vm0, %v5342_v2 }
  0xe6   : > { %3452 = vmatmul.mubr.msk.f32.gmra.mrb[94].mxu1 %vm669_vm0, %v5342_v2  ;;  %1969 = vmatprep.mubr.f32.mxu0 %v4210_v7 }
  0xe7   : > { %2088 = vmatprep.mubr.f32.mxu1 %v4210_v7 }
  0xe9   : > { %3444 = vmatmul.mubr.msk.f32.gmra.mrb[96].mxu0 %vm669_vm0, %v5375_v16 }
  0xea   : > { %3453 = vmatmul.mubr.msk.f32.gmra.mrb[96].mxu1 %vm669_vm0, %v5375_v16  ;;  %1975 = vmatprep.mubr.f32.mxu0 %v4210_v7 }
  0xeb   : > { %2094 = vmatprep.mubr.f32.mxu1 %v4210_v7 }
  0xed   : > { %3445 = vmatmul.mubr.msk.f32.gmra.mrb[98].mxu0 %vm669_vm0, %v4196_v27 }
  0xee   : > { %3454 = vmatmul.mubr.msk.f32.gmra.mrb[98].mxu1 %vm669_vm0, %v4196_v27  ;;  %1981 = vmatprep.mubr.f32.mxu0 %v4210_v7 }
  0xef   : > { %2100 = vmatprep.mubr.f32.mxu1 %v4210_v7 }
  0xf1   : > { %3446 = vmatmul.mubr.msk.f32.gmra.mrb[100].mxu0 %vm669_vm0, %v4197_v36 }
  0xf2   : > { %3455 = vmatmul.mubr.msk.f32.gmra.mrb[100].mxu1 %vm669_vm0, %v4197_v36  ;;  %1987 = vmatprep.mubr.f32.mxu0 %v4210_v7 }
  0xf3   : > { %2106 = vmatprep.mubr.f32.mxu1 %v4210_v7 }
  0xf5   : > { %3447 = vmatmul.mubr.msk.f32.gmra.mrb[102].mxu0 %vm669_vm0, %v4198_v37 }
  0xf6   : > { %3456 = vmatmul.mubr.msk.f32.gmra.mrb[102].mxu1 %vm669_vm0, %v4198_v37  ;;  %1993 = vmatprep.mubr.f32.mxu0 %v4210_v7 }
  0xf7   : > { %2112 = vmatprep.mubr.f32.mxu1 %v4210_v7 }
  0xf9   : > { %3448 = vmatmul.mubr.msk.f32.gmra.mrb[104].mxu0 %vm669_vm0, %v4199_v38 }
  0xfa   : > { %3457 = vmatmul.mubr.msk.f32.gmra.mrb[104].mxu1 %vm669_vm0, %v4199_v38  ;;  %1999 = vmatprep.mubr.f32.mxu0 %v4210_v7 }
  0xfb   : > { %2118 = vmatprep.mubr.f32.mxu1 %v4210_v7 }
  0xfc   : > { %v763_v49 = vpop.f32.mrb[0].mxu0 }
  0xfd   : > { %v764_v50 = vadd.f32 %v763_v49, %v5490_v44  ;;  %v882_v51 = vpop.f32.mrb[0].mxu1  ;;  %v765_v35 = vpop.f32.mrb[1].mxu0  ;;  %3449 = vmatmul.mubr.msk.f32.gmra.mrb[106].mxu0 %vm669_vm0, %v4200_v39 }
  0xfe   : > { %v883_v53 = vadd.f32 %v882_v51, %v5498_v46  ;;  %v884_v54 = vpop.f32.mrb[1].mxu1  ;;  %3458 = vmatmul.mubr.msk.f32.gmra.mrb[106].mxu1 %vm669_vm0, %v4200_v39  ;;  %v766_v58 = vadd.f32 %v765_v35, %v5509_v52 }
  0xff   : > { %v2125_v7 = vmul.f32 0.5, %v764_v50  ;;  %v885_v55 = vadd.f32 %v884_v54, %v5504_v47  ;;  %v5546_v50 = vrot.slane %v2989_v11, %v5471_v22 }
 0x100   : > { %v769_v56 = vpop.f32.mrb[2].mxu0  ;;  %v2127_v57 = vmul.f32 0.5, %v883_v53  ;;  %v2126_v4 = vmul.f32 0.5, %v766_v58 }
 0x101   : > { %v2128_v59 = vmul.f32 0.5, %v885_v55  ;;  %v770_v60 = vadd.f32 %v769_v56, %v5490_v44  ;;  %v888_v62 = vpop.f32.mrb[2].mxu1  ;;  %v771_v63 = vpop.f32.mrb[3].mxu0  ;;  %3760 = vtanh.f32 %v2125_v7  ;;  %v5554_v55 = vrot.slane %v5478_v41, %v5529_v26 }
 0x102   : > { %v890_v0 = vpop.f32.mrb[3].mxu1  ;;  %v889_v1 = vadd.f32 %v888_v62, %v5498_v46  ;;  %v772_v13 = vadd.f32 %v771_v63, %v5509_v52 }
 0x103   : > { %v2149_v48 = vmul.f32 0.5, %v770_v60  ;;  %v891_v2 = vadd.f32 %v890_v0, %v5504_v47  ;;  %3762 = vtanh.f32 %v2128_v59  ;;  %v5559_v59 = vrot.slane %v5478_v41, %v5536_v29 }
 0x104   : > { %v775_v3 = vpop.f32.mrb[4].mxu0  ;;  %3764 = vtanh.f32 %v2127_v57  ;;  %v2151_v12 = vmul.f32 0.5, %v889_v1  ;;  %v2150_v25 = vmul.f32 0.5, %v772_v13  ;;  %v5563_v60 = vrot.slane %v5478_v41, %v5539_v30 }
 0x105   : > { %v2152_v5 = vmul.f32 0.5, %v891_v2  ;;  %v776_v6 = vadd.f32 %v775_v3, %v5490_v44  ;;  %v894_v8 = vpop.f32.mrb[4].mxu1  ;;  %v777_v9 = vpop.f32.mrb[5].mxu0  ;;  %3766 = vtanh.f32 %v2149_v48  ;;  %v5568_v1 = vrot.slane %v2989_v11, %v5493_v45  ;;  %v544_v2 = vld [vmem:[%s6884_s2 + $0x8] sm:$0xff] }
 0x106   : > { %v896_v10 = vpop.f32.mrb[5].mxu1  ;;  %v895_v16 = vadd.f32 %v894_v8, %v5498_v46  ;;  %v778_v21 = vadd.f32 %v777_v9, %v5509_v52 }
 0x107   : > { %v2173_v61 = vmul.f32 0.5, %v776_v6  ;;  %v897_v14 = vadd.f32 %v896_v10, %v5504_v47  ;;  %3768 = vtanh.f32 %v2152_v5  ;;  %v5576_v6 = vrot.slane %v2989_v11, %v5481_v42 }
 0x108   : > { %v781_v15 = vpop.f32.mrb[6].mxu0  ;;  %3770 = vtanh.f32 %v2126_v4  ;;  %v2175_v31 = vmul.f32 0.5, %v895_v16  ;;  %v2174_v51 = vmul.f32 0.5, %v778_v21 }
 0x109   : > { %v2176_v17 = vmul.f32 0.5, %v897_v14  ;;  %v782_v18 = vadd.f32 %v781_v15, %v5490_v44  ;;  %v900_v19 = vpop.f32.mrb[6].mxu1  ;;  %v783_v20 = vpop.f32.mrb[7].mxu0  ;;  %3772 = vtanh.f32 %v2173_v61 }
 0x10a   : > { %v902_v23 = vpop.f32.mrb[7].mxu1  ;;  %3774 = vtanh.f32 %v2151_v12  ;;  %v901_v36 = vadd.f32 %v900_v19, %v5498_v46  ;;  %v784_v4 = vadd.f32 %v783_v20, %v5509_v52 }
 0x10b   : > { %v2197_v32 = vmul.f32 0.5, %v782_v18  ;;  %v903_v27 = vadd.f32 %v902_v23, %v5504_v47  ;;  %v3761_v33 = vpop.eup %3760  ;;  %3776 = vtanh.f32 %v2176_v17  ;;  %v5586_v17 = vrot.slane %v544_v2, %v5471_v22 }
 0x10c   : > { %v787_v28 = vpop.f32.mrb[8].mxu0  ;;  %v2557_v54 = vmul.f32 0.5, %v3761_v33  ;;  %v2199_v63 = vmul.f32 0.5, %v901_v36 }
 0x10d   : > { %v2200_v37 = vmul.f32 0.5, %v903_v27  ;;  %v788_v38 = vadd.f32 %v787_v28, %v5490_v44  ;;  %v906_v39 = vpop.f32.mrb[8].mxu1  ;;  %v5543_v34 = vpop.f32.mrb[9].mxu0  ;;  %3778 = vtanh.f32 %v2197_v32  ;;  %v2198_v27 = vmul.f32 0.5, %v784_v4 }
 0x10e   : > { %v3763_v49 = vpop.eup %3762  ;;  %v908_v35 = vpop.f32.mrb[9].mxu1  ;;  %3780 = vtanh.f32 %v2150_v25  ;;  %v2773_v9 = vadd.f32 0.5, %v2557_v54  ;;  %v907_v21 = vadd.f32 %v906_v39, %v5498_v46  ;;  %v5594_v28 = vrot.slane %v544_v2, %v5481_v42 }
 0x10f   : > { %v3765_v53 = vpop.eup %3764  ;;  %v2560_v7 = vmul.f32 0.5, %v3763_v49  ;;  %3782 = vtanh.f32 %v2200_v37  ;;  %v2221_v57 = vmul.f32 0.5, %v788_v38  ;;  %v909_v41 = vadd.f32 %v908_v35, %v5504_v47 }
 0x110   : > { %v3767_v56 = vpop.eup %3766  ;;  %v793_v58 = vpop.f32.mrb[10].mxu0  ;;  %3784 = vtanh.f32 %v2175_v31  ;;  %v2559_v32 = vmul.f32 0.5, %v3765_v53  ;;  %v790_v39 = vadd.f32 %v5543_v34, %v5509_v52  ;;  %v5601_v53 = vrot.slane %v544_v2, %v5493_v45 }
 0x111   : > { %v2776_v62 = vadd.f32 0.5, %v2560_v7  ;;  %v912_v0 = vpop.f32.mrb[10].mxu1  ;;  %v5565_v48 = vpop.f32.mrb[11].mxu0  ;;  %3786 = vtanh.f32 %v2174_v51  ;;  %v2581_v12 = vmul.f32 0.5, %v3767_v56  ;;  %v2224_v14 = vmul.f32 0.5, %v909_v41 }
 0x112   : > { %v3769_v3 = vpop.eup %3768  ;;  %v914_v5 = vpop.f32.mrb[11].mxu1  ;;  %3788 = vtanh.f32 %v2221_v57  ;;  %v794_v15 = vadd.f32 %v793_v58, %v5490_v44  ;;  %v5604_v54 = vrot.slane %v544_v2, %v5485_v43  ;;  %v5610_v34 = vadd.f32 0.5, %v2559_v32 }
 0x113   : > { %v3771_v8 = vpop.eup %3770  ;;  %v3006_v10 = vmul.f32 %v5546_v50, %v2776_v62  ;;  %v2584_v13 = vmul.f32 0.5, %v3769_v3  ;;  %3790 = vtanh.f32 %v2199_v63  ;;  %v2797_v31 = vadd.f32 0.5, %v2581_v12 }
 0x114   : > { %v3773_v61 = vpop.eup %3772  ;;  %v799_v16 = vpop.f32.mrb[12].mxu0  ;;  %3792 = vtanh.f32 %v2224_v14  ;;  %v2245_v51 = vmul.f32 0.5, %v794_v15  ;;  %6909 = vst [vmem:[#allocation10_spill] sm:$0xff] %v5604_v54  ;;  %v2558_v56 = vmul.f32 0.5, %v3771_v8  ;;  %v2223_v62 = vmul.f32 0.5, %v907_v21 }
 0x115   : > { %v3775_v18 = vpop.eup %3774  ;;  %v3033_v19 = vadd.f32 %v3006_v10, %v2773_v9  ;;  %v2800_v20 = vadd.f32 0.5, %v2584_v13  ;;  %v5589_v23 = vpop.f32.mrb[12].mxu1  ;;  %v2605_v37 = vmul.f32 0.5, %v3773_v61  ;;  %3794 = vtanh.f32 %v2198_v27 }
 0x116   : > { %v5591_v11 = vpop.f32.mrb[13].mxu0  ;;  %v3777_v25 = vpop.eup %3776  ;;  %v913_v41 = vadd.f32 %v912_v0, %v5498_v46  ;;  %v915_v9 = vadd.f32 %v914_v5, %v5504_v47  ;;  %v2583_v15 = vmul.f32 0.5, %v3775_v18  ;;  %3796 = vtanh.f32 %v2245_v51 }
 0x117   : > { %v920_v33 = vpop.f32.mrb[13].mxu1  ;;  %3060 = vst [vmem:[%s5582_s6] sm:$0xff] %v3033_v19  ;;  %v3009_v36 = vmul.f32 %v5546_v50, %v2800_v20  ;;  %v2608_v38 = vmul.f32 0.5, %v3777_v25  ;;  %v3779_v49 = vpop.eup %3778  ;;  %v2821_v12 = vadd.f32 0.5, %v2605_v37  ;;  %v2222_v19 = vmul.f32 0.5, %v790_v39 }
 0x118   : > { %v805_v35 = vpop.f32.mrb[14].mxu0  ;;  %v3781_v7 = vpop.eup %3780  ;;  %v2629_v13 = vmul.f32 0.5, %v3779_v49  ;;  %v2248_v20 = vmul.f32 0.5, %v915_v9  ;;  %3798 = vtanh.f32 %v2223_v62  ;;  %v800_v0 = vadd.f32 %v799_v16, %v5490_v44 }
 0x119   : > { %v3036_v57 = vadd.f32 %v3009_v36, %v2797_v31  ;;  %v2824_v58 = vadd.f32 0.5, %v2608_v38  ;;  %v5606_v63 = vpop.f32.mrb[14].mxu1  ;;  %v5608_v3 = vpop.f32.mrb[15].mxu0  ;;  %v5621_v36 = vadd.f32 0.5, %v2558_v56  ;;  %v2582_v37 = vmul.f32 0.5, %v3781_v7 }
 0x11a   : > { %v3783_v4 = vpop.eup %3782  ;;  %v926_v10 = vpop.f32.mrb[15].mxu1  ;;  %v2247_v38 = vmul.f32 0.5, %v913_v41  ;;  %3800 = vtanh.f32 %v2248_v20  ;;  %v2845_v39 = vadd.f32 0.5, %v2629_v13  ;;  %v5626_v62 = vadd.f32 0.5, %v2583_v15 }
 0x11b   : > { %v3785_v2 = vpop.eup %3784  ;;  %3063 = vst [vmem:[%s5582_s6 + $0x18] sm:$0xff] %v3036_v57  ;;  %v3012_v8 = vmul.f32 %v5546_v50, %v2824_v58  ;;  %v2632_v61 = vmul.f32 0.5, %v3783_v4  ;;  %v2269_v57 = vmul.f32 0.5, %v800_v0  ;;  %v921_v58 = vadd.f32 %v920_v33, %v5504_v47 }
 0x11c   : > { %v3787_v14 = vpop.eup %3786  ;;  %v811_v21 = vpop.f32.mrb[16].mxu0  ;;  %3802 = vtanh.f32 %v2222_v19  ;;  %v796_v56 = vadd.f32 %v5565_v48, %v5509_v52  ;;  %v806_v7 = vadd.f32 %v805_v35, %v5490_v44  ;;  %v2607_v20 = vmul.f32 0.5, %v3785_v2 }
 0x11d   : > { %v3039_v25 = vadd.f32 %v3012_v8, %v2821_v12  ;;  %v2848_v32 = vadd.f32 0.5, %v2632_v61  ;;  %v5617_v5 = vpop.f32.mrb[16].mxu1  ;;  %v5619_v27 = vpop.f32.mrb[17].mxu0  ;;  %v2272_v8 = vmul.f32 0.5, %v921_v58  ;;  %3804 = vtanh.f32 %v2269_v57 }
 0x11e   : > { %v3789_v31 = vpop.eup %3788  ;;  %v932_v18 = vpop.f32.mrb[17].mxu1  ;;  %v2293_v33 = vmul.f32 0.5, %v806_v7  ;;  %3806 = vtanh.f32 %v2247_v38  ;;  %v919_v35 = vadd.f32 %v5589_v23, %v5498_v46  ;;  %v5647_v23 = vadd.f32 0.5, %v2607_v20 }
 0x11f   : > { %v3791_v49 = vpop.eup %3790  ;;  %3066 = vst [vmem:[%s5582_s6 + $0x30] sm:$0xff] %v3039_v25  ;;  %v3015_v51 = vmul.f32 %v5546_v50, %v2848_v32  ;;  %v2653_v9 = vmul.f32 0.5, %v3789_v31  ;;  %v2606_v25 = vmul.f32 0.5, %v3787_v14  ;;  %v5631_v32 = vadd.f32 0.5, %v2582_v37 }
 0x120   : > { %v3793_v16 = vpop.eup %3792  ;;  %v1001_v4 = vpop.f32.mrb[18].mxu0  ;;  %v2631_v19 = vmul.f32 0.5, %v3791_v49  ;;  %3808 = vtanh.f32 %v2272_v8  ;;  %v927_v31 = vadd.f32 %v926_v10, %v5504_v47  ;;  %v2246_v37 = vmul.f32 0.5, %v796_v56 }
 0x121   : > { %v3042_v41 = vadd.f32 %v3015_v51, %v2845_v39  ;;  %v2656_v12 = vmul.f32 0.5, %v3793_v16  ;;  %v1120_v13 = vpop.f32.mrb[18].mxu1  ;;  %v1003_v61 = vpop.f32.mrb[19].mxu0  ;;  %v812_v39 = vadd.f32 %v811_v21, %v5490_v44  ;;  %v2869_v14 = vadd.f32 0.5, %v2653_v9 }
 0x122   : > { %v1122_v15 = vpop.f32.mrb[19].mxu1  ;;  %v3795_v0 = vpop.eup %3794  ;;  %v802_v49 = vadd.f32 %v5591_v11, %v5509_v52  ;;  %v5649_v10 = vadd.f32 0.5, %v2606_v25  ;;  %3810 = vtanh.f32 %v2293_v33  ;;  %v2296_v44 = vmul.f32 0.5, %v927_v31 }
 0x123   : > { %3069 = vst [vmem:[%s5582_s6 + $0x48] sm:$0xff] %v3042_v41  ;;  %v2872_v48 = vadd.f32 0.5, %v2656_v12  ;;  %v3797_v58 = vpop.eup %3796  ;;  %v5653_v7 = vadd.f32 0.5, %v2631_v19  ;;  %v2630_v56 = vmul.f32 0.5, %v3795_v0  ;;  %v2317_v11 = vmul.f32 0.5, %v812_v39 }
 0x124   : > { %v5638_v2 = vpop.f32.mrb[20].mxu0  ;;  %v3799_v16 = vpop.eup %3798  ;;  %v2271_v12 = vmul.f32 0.5, %v919_v35  ;;  %v925_v8 = vadd.f32 %v5606_v63, %v5498_v46  ;;  %3812 = vtanh.f32 %v2296_v44  ;;  %v933_v20 = vadd.f32 %v932_v18, %v5504_v47 }
 0x125   : > { %v3018_v51 = vmul.f32 %v5546_v50, %v2872_v48  ;;  %v5643_v57 = vpop.f32.mrb[20].mxu1  ;;  %v5645_v38 = vpop.f32.mrb[21].mxu0  ;;  %v2677_v33 = vmul.f32 0.5, %v3797_v58  ;;  %3814 = vtanh.f32 %v2246_v37  ;;  %v2270_v31 = vmul.f32 0.5, %v802_v49 }
 0x126   : > { %v5651_v21 = vpop.f32.mrb[21].mxu1  ;;  %v3801_v9 = vpop.eup %3800  ;;  %v808_v35 = vadd.f32 %v5608_v3, %v5509_v52  ;;  %v1002_v63 = vadd.f32 %v1001_v4, %v5550_v40  ;;  %v5669_v47 = vadd.f32 %v1120_v13, %v5554_v55  ;;  %3816 = vtanh.f32 %v2317_v11 }
 0x127   : > { %v3045_v41 = vadd.f32 %v3018_v51, %v2869_v14  ;;  %v2680_v48 = vmul.f32 0.5, %v3801_v9  ;;  %v3803_v39 = vpop.eup %3802  ;;  %v2320_v14 = vmul.f32 0.5, %v933_v20  ;;  %v1004_v37 = vadd.f32 %v1003_v61, %v5559_v59 }
 0x128   : > { %v5658_v25 = vpop.f32.mrb[22].mxu0  ;;  %v5675_v49 = vadd.f32 %v1122_v15, %v5563_v60  ;;  %v3805_v58 = vpop.eup %3804  ;;  %v5677_v44 = vadd.f32 0.5, %v2630_v56  ;;  %3818 = vtanh.f32 %v2271_v12  ;;  %v2295_v3 = vmul.f32 0.5, %v925_v8 }
 0x129   : > { %3072 = vst [vmem:[%s5582_s6 + $0x60] sm:$0xff] %v3045_v41  ;;  %v5661_v19 = vpop.f32.mrb[22].mxu1  ;;  %v5663_v0 = vpop.f32.mrb[23].mxu0  ;;  %v2896_v51 = vadd.f32 0.5, %v2680_v48  ;;  %v2129_v41 = vmul.f32 0.5, %v1002_v63  ;;  %v2893_v13 = vadd.f32 0.5, %v2677_v33  ;;  %3820 = vtanh.f32 %v2320_v14 }
 0x12a   : > { %v5671_v18 = vpop.f32.mrb[23].mxu1  ;;  %v3807_v4 = vpop.eup %3806  ;;  %v2130_v48 = vmul.f32 0.5, %v1004_v37  ;;  %v2655_v43 = vmul.f32 0.5, %v3799_v16  ;;  %v2294_v56 = vmul.f32 0.5, %v808_v35  ;;  %v931_v12 = vadd.f32 %v5617_v5, %v5498_v46 }
 0x12b   : > { %v3021_v20 = vmul.f32 %v5546_v50, %v2896_v51  ;;  %v3809_v15 = vpop.eup %3808  ;;  %3822 = vtanh.f32 %v2129_v41  ;;  %v2701_v33 = vmul.f32 0.5, %v3805_v58  ;;  %v2654_v37 = vmul.f32 0.5, %v3803_v39 }
 0x12c   : > { %v5679_v9 = vpop.f32.mrb[24].mxu0  ;;  %3824 = vtanh.f32 %v2270_v31  ;;  %v2704_v51 = vmul.f32 0.5, %v3809_v15  ;;  %v3811_v14 = vpop.eup %3810  ;;  %v2679_v45 = vmul.f32 0.5, %v3807_v4  ;;  %v1008_v42 = vadd.f32 %v5638_v2, %v5550_v40 }
 0x12d   : > { %v5682_v11 = vpop.f32.mrb[24].mxu1  ;;  %v5684_v61 = vpop.f32.mrb[25].mxu0  ;;  %v3048_v63 = vadd.f32 %v3021_v20, %v2893_v13  ;;  %3826 = vtanh.f32 %v2130_v48  ;;  %v814_v46 = vadd.f32 %v5619_v27, %v5509_v52  ;;  %v5699_v5 = vadd.f32 %v5643_v57, %v5554_v55 }
 0x12e   : > { %v5688_v8 = vpop.f32.mrb[25].mxu1  ;;  %v2920_v16 = vadd.f32 0.5, %v2704_v51  ;;  %3828 = vtanh.f32 %v2295_v3  ;;  %v3813_v35 = vpop.eup %3812  ;;  %v2319_v58 = vmul.f32 0.5, %v931_v12  ;;  %v2153_v2 = vmul.f32 0.5, %v1008_v42 }
 0x12f   : > { %3075 = vst [vmem:[%s5582_s6 + $0x78] sm:$0xff] %v3048_v63  ;;  %3830 = vtanh.f32 %v2294_v56  ;;  %v1010_v41 = vadd.f32 %v5645_v38, %v5559_v59  ;;  %v3815_v3 = vpop.eup %3814  ;;  %v2917_v13 = vadd.f32 0.5, %v2701_v33  ;;  %v2725_v27 = vmul.f32 0.5, %v3811_v14 }
 0x130   : > { %v5692_v22 = vpop.f32.mrb[26].mxu0  ;;  %v3024_v52 = vmul.f32 %v5546_v50, %v2920_v16  ;;  %v2728_v57 = vmul.f32 0.5, %v3813_v35  ;;  %v5710_v20 = vadd.f32 0.5, %v2655_v43  ;;  %v5712_v48 = vadd.f32 0.5, %v2654_v37  ;;  %v3817_v42 = vpop.eup %3816 }
 0x131   : > { %v5701_v31 = vpop.f32.mrb[26].mxu1  ;;  %v5703_v39 = vpop.f32.mrb[27].mxu0  ;;  %3832 = vtanh.f32 %v2153_v2  ;;  %v2154_v15 = vmul.f32 0.5, %v1010_v41  ;;  %v2318_v63 = vmul.f32 0.5, %v814_v46  ;;  %v5718_v33 = vadd.f32 %v5651_v21, %v5563_v60 }
 0x132   : > { %v5707_v4 = vpop.f32.mrb[27].mxu1  ;;  %v3051_v12 = vadd.f32 %v3024_v52, %v2917_v13  ;;  %v2944_v38 = vadd.f32 0.5, %v2728_v57  ;;  %v3819_v43 = vpop.eup %3818  ;;  %v5724_v37 = vadd.f32 0.5, %v2679_v45  ;;  %v2678_v16 = vmul.f32 0.5, %v3815_v3 }
 0x133   : > { %3834 = vtanh.f32 %v2154_v15  ;;  %v1014_v35 = vadd.f32 %v5658_v25, %v5550_v40  ;;  %v3821_v41 = vpop.eup %3820  ;;  %v2941_v46 = vadd.f32 0.5, %v2725_v27  ;;  %v5734_v13 = vadd.f32 %v5661_v19, %v5554_v55 }
 0x134   : > { %v5714_v56 = vpop.f32.mrb[28].mxu0  ;;  %3078 = vst [vmem:[%s5582_s6 + $0x90] sm:$0xff] %v3051_v12  ;;  %v3027_v21 = vmul.f32 %v5546_v50, %v2944_v38  ;;  %3836 = vtanh.f32 %v2319_v58  ;;  %v2749_v45 = vmul.f32 0.5, %v3817_v42  ;;  %v2752_v57 = vmul.f32 0.5, %v3821_v41 }
 0x135   : > { %v5720_v51 = vpop.f32.mrb[28].mxu1  ;;  %v5722_v14 = vpop.f32.mrb[29].mxu0  ;;  %v2177_v3 = vmul.f32 0.5, %v1014_v35  ;;  %v1016_v15 = vadd.f32 %v5663_v0, %v5559_v59  ;;  %v2703_v12 = vmul.f32 0.5, %v3819_v43  ;;  %3838 = vtanh.f32 %v2318_v63 }
 0x136   : > { %v5728_v2 = vpop.f32.mrb[29].mxu1  ;;  %v3823_v52 = vpop.eup %3822  ;;  %v3054_v27 = vadd.f32 %v3027_v21, %v2941_v46  ;;  %v5744_v26 = vadd.f32 0.5, %v2678_v16  ;;  %v2968_v42 = vadd.f32 0.5, %v2752_v57  ;;  %v2131_v35 = vmul.f32 0.5, %v5669_v47 }
 0x137   : > { %v3825_v30 = vpop.eup %3824  ;;  %v2561_v38 = vmul.f32 0.5, %v3823_v52  ;;  %3840 = vtanh.f32 %v2177_v3  ;;  %v2178_v46 = vmul.f32 0.5, %v1016_v15  ;;  %v5752_v63 = vadd.f32 %v5671_v18, %v5563_v60 }
 0x138   : > { %v5738_v25 = vpop.f32.mrb[30].mxu0  ;;  %v3827_v19 = vpop.eup %3826  ;;  %3081 = vst [vmem:[%s5582_s6 + $0xa8] sm:$0xff] %v3054_v27  ;;  %v2702_v52 = vmul.f32 0.5, %v3825_v30  ;;  %v2965_v54 = vadd.f32 0.5, %v2749_v45  ;;  %v3030_v16 = vmul.f32 %v5546_v50, %v2968_v42  ;;  %v2132_v57 = vmul.f32 0.5, %v5675_v49 }
 0x139   : > { %v5740_v58 = vpop.f32.mrb[30].mxu1  ;;  %v5742_v29 = vpop.f32.mrb[31].mxu0  ;;  %v2777_v24 = vadd.f32 0.5, %v2561_v38  ;;  %v2562_v43 = vmul.f32 0.5, %v3827_v19  ;;  %v5758_v3 = vadd.f32 0.5, %v2703_v12  ;;  %3842 = vtanh.f32 %v2178_v46 }
 0x13a   : > { %v5747_v0 = vpop.f32.mrb[31].mxu1  ;;  %v3829_v41 = vpop.eup %3828  ;;  %v3057_v30 = vadd.f32 %v3030_v16, %v2965_v54  ;;  %3844 = vtanh.f32 %v2131_v35  ;;  %v1020_v50 = vadd.f32 %v5679_v9, %v5550_v40  ;;  %v5769_v49 = vadd.f32 %v5682_v11, %v5554_v55 }
 0x13b   : > { %v3831_v21 = vpop.eup %3830  ;;  %6910 = vst [vmem:[#allocation11_spill] sm:$0xff] %v5758_v3  ;;  %v3007_v27 = vmul.f32 %v5568_v1, %v2777_v24  ;;  %v2778_v38 = vadd.f32 0.5, %v2562_v43  ;;  %v2155_v43 = vmul.f32 0.5, %v5699_v5  ;;  %3846 = vtanh.f32 %v2132_v57 }
 0x13c   : > { %v5756_v47 = vpop.f32.mrb[32].mxu0  ;;  %v3833_v19 = vpop.eup %3832  ;;  %3084 = vst [vmem:[%s5582_s6 + $0xc0] sm:$0xff] %v3057_v30  ;;  %v2156_v54 = vmul.f32 0.5, %v5718_v33  ;;  %v2201_v35 = vmul.f32 0.5, %v1020_v50  ;;  %v1022_v9 = vadd.f32 %v5684_v61, %v5559_v59  ;;  %v5786_v5 = vadd.f32 %v5688_v8, %v5563_v60 }
 0x13d   : > { %v5761_v15 = vpop.f32.mrb[32].mxu1  ;;  %v5763_v18 = vpop.f32.mrb[33].mxu0  ;;  %v3034_v24 = vadd.f32 %v3007_v27, %v5621_v36  ;;  %v3008_v12 = vmul.f32 %v5576_v6, %v2778_v38  ;;  %v2585_v42 = vmul.f32 0.5, %v3833_v19  ;;  %v2727_v19 = vmul.f32 0.5, %v3829_v41 }
 0x13e   : > { %v5771_v45 = vpop.f32.mrb[33].mxu1  ;;  %v3835_v46 = vpop.eup %3834  ;;  %3848 = vtanh.f32 %v2201_v35  ;;  %v2202_v61 = vmul.f32 0.5, %v1022_v9  ;;  %v1026_v30 = vadd.f32 %v5692_v22, %v5550_v40  ;;  %v2179_v8 = vmul.f32 0.5, %v5734_v13 }
 0x13f   : > { %v3837_v16 = vpop.eup %3836  ;;  %3061 = vst [vmem:[%s5582_s6 + $0x8] sm:$0xff] %v3034_v24  ;;  %v3035_v36 = vadd.f32 %v3008_v12, %v5610_v34  ;;  %v2801_v27 = vadd.f32 0.5, %v2585_v42  ;;  %v2586_v38 = vmul.f32 0.5, %v3835_v46  ;;  %3850 = vtanh.f32 %v2155_v43 }
 0x140   : > { %v5780_v11 = vpop.f32.mrb[34].mxu0  ;;  %v3839_v24 = vpop.eup %3838  ;;  %v2726_v46 = vmul.f32 0.5, %v3831_v21  ;;  %3852 = vtanh.f32 %v2202_v61  ;;  %v2225_v41 = vmul.f32 0.5, %v1026_v30  ;;  %v5801_v35 = vadd.f32 %v5701_v31, %v5554_v55 }
 0x141   : > { %v5788_v57 = vpop.f32.mrb[34].mxu1  ;;  %v5790_v33 = vpop.f32.mrb[35].mxu0  ;;  %3062 = vst [vmem:[%s5582_s6 + $0x10] sm:$0xff] %v3035_v36  ;;  %v3010_v34 = vmul.f32 %v5568_v1, %v2801_v27  ;;  %v2802_v12 = vadd.f32 0.5, %v2586_v38  ;;  %3854 = vtanh.f32 %v2156_v54  ;;  %v5811_v21 = vadd.f32 0.5, %v2702_v52 }
 0x142   : > { %v5794_v50 = vpop.f32.mrb[35].mxu1  ;;  %v3841_v42 = vpop.eup %3840  ;;  %v2751_v38 = vmul.f32 0.5, %v3837_v16  ;;  %3856 = vtanh.f32 %v2225_v41  ;;  %v1028_v31 = vadd.f32 %v5703_v39, %v5559_v59  ;;  %v1032_v39 = vadd.f32 %v5714_v56, %v5550_v40 }
 0x143   : > { %v3037_v9 = vadd.f32 %v3010_v34, %v5631_v32  ;;  %v3011_v36 = vmul.f32 %v5576_v6, %v2802_v12  ;;  %v2609_v43 = vmul.f32 0.5, %v3841_v42  ;;  %v3843_v30 = vpop.eup %3842  ;;  %3858 = vtanh.f32 %v2179_v8 }
 0x144   : > { %v5803_v22 = vpop.f32.mrb[36].mxu0  ;;  %v5821_v34 = vadd.f32 %v5707_v4, %v5563_v60  ;;  %v3845_v52 = vpop.eup %3844  ;;  %v5823_v12 = vadd.f32 0.5, %v2727_v19  ;;  %v2610_v16 = vmul.f32 0.5, %v3843_v30  ;;  %v2226_v42 = vmul.f32 0.5, %v1028_v31 }
 0x145   : > { %v5807_v27 = vpop.f32.mrb[36].mxu1  ;;  %v5809_v13 = vpop.f32.mrb[37].mxu0  ;;  %3064 = vst [vmem:[%s5582_s6 + $0x20] sm:$0xff] %v3037_v9  ;;  %v3038_v32 = vadd.f32 %v3011_v36, %v5626_v62  ;;  %v2825_v54 = vadd.f32 0.5, %v2609_v43  ;;  %v5829_v3 = vadd.f32 0.5, %v2726_v46  ;;  %v2180_v8 = vmul.f32 0.5, %v5752_v63 }
 0x146   : > { %v5815_v61 = vpop.f32.mrb[37].mxu1  ;;  %6911 = vst [vmem:[#allocation12_spill] sm:$0xff] %v5823_v12  ;;  %v5836_v4 = vadd.f32 %v5720_v51, %v5554_v55  ;;  %v3847_v36 = vpop.eup %3846  ;;  %v2750_v43 = vmul.f32 0.5, %v3839_v24  ;;  %v2826_v56 = vadd.f32 0.5, %v2610_v16  ;;  %3860 = vtanh.f32 %v2226_v42 }
 0x147   : > { %3065 = vst [vmem:[%s5582_s6 + $0x28] sm:$0xff] %v3038_v32  ;;  %v3013_v62 = vmul.f32 %v5568_v1, %v2825_v54  ;;  %v2249_v46 = vmul.f32 0.5, %v1032_v39  ;;  %v5844_v30 = vadd.f32 0.5, %v2751_v38  ;;  %v2563_v32 = vmul.f32 0.5, %v3845_v52 }
 0x148   : > { %v5827_v41 = vpop.f32.mrb[38].mxu0  ;;  %v1034_v51 = vadd.f32 %v5722_v14, %v5559_v59  ;;  %v3849_v54 = vpop.eup %3848  ;;  %v3014_v12 = vmul.f32 %v5576_v6, %v2826_v56  ;;  %v5853_v24 = vadd.f32 %v5728_v2, %v5563_v60  ;;  %v1038_v14 = vadd.f32 %v5738_v25, %v5550_v40 }
 0x149   : > { %v5838_v19 = vpop.f32.mrb[38].mxu1  ;;  %v5840_v9 = vpop.f32.mrb[39].mxu0  ;;  %6913 = vst [vmem:[#allocation14_spill] sm:$0xff] %v5844_v30  ;;  %v3040_v63 = vadd.f32 %v3013_v62, %v5649_v10  ;;  %3862 = vtanh.f32 %v2249_v46  ;;  %v2633_v52 = vmul.f32 0.5, %v3849_v54  ;;  %v5864_v62 = vadd.f32 0.5, %v2750_v43 }
 0x14a   : > { %6912 = vst [vmem:[#allocation13_spill] sm:$0xff] %v5840_v9  ;;  %v5842_v31 = vpop.f32.mrb[39].mxu1  ;;  %v2203_v9 = vmul.f32 0.5, %v5769_v49  ;;  %v3851_v38 = vpop.eup %3850  ;;  %3864 = vtanh.f32 %v2180_v8  ;;  %v2250_v10 = vmul.f32 0.5, %v1034_v51  ;;  %v3041_v2 = vadd.f32 %v3014_v12, %v5647_v23 }
 0x14b   : > { %3067 = vst [vmem:[%s5582_s6 + $0x38] sm:$0xff] %v3040_v63  ;;  %v3853_v49 = vpop.eup %3852  ;;  %6915 = vst [vmem:[#allocation16_spill] sm:$0xff] %v5864_v62  ;;  %v2204_v56 = vmul.f32 0.5, %v5786_v5  ;;  %v5870_v8 = vadd.f32 %v5740_v58, %v5554_v55  ;;  %v2849_v25 = vadd.f32 0.5, %v2633_v52  ;;  %v2273_v54 = vmul.f32 0.5, %v1038_v14 }
 0x14c   : > { %v5855_v16 = vpop.f32.mrb[40].mxu0  ;;  %v3855_v63 = vpop.eup %3854  ;;  %v2634_v51 = vmul.f32 0.5, %v3853_v49  ;;  %3866 = vtanh.f32 %v2250_v10  ;;  %v2564_v43 = vmul.f32 0.5, %v3847_v36  ;;  %3068 = vst [vmem:[%s5582_s6 + $0x40] sm:$0xff] %v3041_v2  ;;  %v2227_v23 = vmul.f32 0.5, %v5801_v35 }
 0x14d   : > { %v5860_v42 = vpop.f32.mrb[40].mxu1  ;;  %v5862_v39 = vpop.f32.mrb[41].mxu0  ;;  %3868 = vtanh.f32 %v2203_v9  ;;  %v3016_v58 = vmul.f32 %v5568_v1, %v2849_v25  ;;  %v1040_v9 = vadd.f32 %v5742_v29, %v5559_v59  ;;  %v5889_v35 = vadd.f32 %v5747_v0, %v5563_v60 }
 0x14e   : > { %6914 = vst [vmem:[#allocation15_spill] sm:$0xff] %v5862_v39  ;;  %v5872_v46 = vpop.f32.mrb[41].mxu1  ;;  %v3857_v30 = vpop.eup %3856  ;;  %v5874_v39 = vadd.f32 0.5, %v2563_v32  ;;  %v2850_v62 = vadd.f32 0.5, %v2634_v51  ;;  %3870 = vtanh.f32 %v2273_v54  ;;  %v2587_v32 = vmul.f32 0.5, %v3851_v38 }
 0x14f   : > { %6916 = vst [vmem:[#allocation17_spill] sm:$0xff] %v5872_v46  ;;  %v3859_v12 = vpop.eup %3858  ;;  %v2657_v46 = vmul.f32 0.5, %v3857_v30  ;;  %3872 = vtanh.f32 %v2204_v56  ;;  %v2588_v14 = vmul.f32 0.5, %v3855_v63  ;;  %v3043_v30 = vadd.f32 %v3016_v58, %v5677_v44 }
 0x150   : > { %6917 = vst [vmem:[#allocation18_spill] sm:$0xff] %v5874_v39  ;;  %v5878_v5 = vpop.f32.mrb[42].mxu0  ;;  %v3017_v49 = vmul.f32 %v5576_v6, %v2850_v62  ;;  %v3861_v25 = vpop.eup %3860  ;;  %v2611_v51 = vmul.f32 0.5, %v3859_v12  ;;  %v2274_v54 = vmul.f32 0.5, %v1040_v9  ;;  %v1044_v38 = vadd.f32 %v5756_v47, %v5550_v40 }
 0x151   : > { %v5881_v52 = vpop.f32.mrb[42].mxu1  ;;  %v5883_v10 = vpop.f32.mrb[43].mxu0  ;;  %v2873_v2 = vadd.f32 0.5, %v2657_v46  ;;  %v5899_v29 = vadd.f32 %v5761_v15, %v5554_v55  ;;  %3070 = vst [vmem:[%s5582_s6 + $0x50] sm:$0xff] %v3043_v30  ;;  %3874 = vtanh.f32 %v2227_v23  ;;  %v2658_v62 = vmul.f32 0.5, %v3861_v25 }
 0x152   : > { %v5891_v36 = vpop.f32.mrb[43].mxu1  ;;  %v3044_v56 = vadd.f32 %v3017_v49, %v5653_v7  ;;  %v5910_v47 = vadd.f32 0.5, %v2564_v43  ;;  %v5912_v58 = vadd.f32 0.5, %v2587_v32  ;;  %3876 = vtanh.f32 %v2274_v54 }
 0x153   : > { %v3019_v44 = vmul.f32 %v5568_v1, %v2873_v2  ;;  %v3863_v12 = vpop.eup %3862  ;;  %v2297_v15 = vmul.f32 0.5, %v1044_v38  ;;  %v2874_v23 = vadd.f32 0.5, %v2658_v62  ;;  %v2228_v49 = vmul.f32 0.5, %v5821_v34 }
 0x154   : > { %v5901_v0 = vpop.f32.mrb[44].mxu0  ;;  %6918 = vst [vmem:[#allocation19_spill] sm:$0xff] %v5910_v47  ;;  %6919 = vst [vmem:[#allocation20_spill] sm:$0xff] %v5912_v58  ;;  %v3865_v30 = vpop.eup %3864  ;;  %v2681_v2 = vmul.f32 0.5, %v3863_v12  ;;  %v5919_v25 = vadd.f32 0.5, %v2588_v14  ;;  %v5921_v39 = vadd.f32 0.5, %v2611_v51  ;;  %v1046_v43 = vadd.f32 %v5763_v18, %v5559_v59 }
 0x155   : > { %v5906_v46 = vpop.f32.mrb[44].mxu1  ;;  %v5908_v63 = vpop.f32.mrb[45].mxu0  ;;  %3071 = vst [vmem:[%s5582_s6 + $0x58] sm:$0xff] %v3044_v56  ;;  %v3046_v7 = vadd.f32 %v3019_v44, %v5712_v48  ;;  %3878 = vtanh.f32 %v2297_v15  ;;  %v3020_v38 = vmul.f32 %v5576_v6, %v2874_v23  ;;  %v2251_v48 = vmul.f32 0.5, %v5836_v4 }
 0x156   : > { %v5914_v9 = vpop.f32.mrb[45].mxu1  ;;  %6920 = vst [vmem:[#allocation21_spill] sm:$0xff] %v5919_v25  ;;  %6921 = vst [vmem:[#allocation22_spill] sm:$0xff] %v5921_v39  ;;  %v3867_v54 = vpop.eup %3866  ;;  %v2897_v56 = vadd.f32 0.5, %v2681_v2  ;;  %v1165_v34 = vadd.f32 %v5771_v45, %v5563_v60  ;;  %v2612_v62 = vmul.f32 0.5, %v3865_v30  ;;  %v2298_v12 = vmul.f32 0.5, %v1046_v43 }
 0x157   : > { %3073 = vst [vmem:[%s5582_s6 + $0x68] sm:$0xff] %v3046_v7  ;;  %v3869_v44 = vpop.eup %3868  ;;  %v2682_v18 = vmul.f32 0.5, %v3867_v54  ;;  %v1050_v15 = vadd.f32 %v5780_v11, %v5550_v40  ;;  %v3047_v4 = vadd.f32 %v3020_v38, %v5710_v20  ;;  %3880 = vtanh.f32 %v2228_v49 }
 0x158   : > { %v5925_v32 = vpop.f32.mrb[46].mxu0  ;;  %v3871_v23 = vpop.eup %3870  ;;  %v3022_v45 = vmul.f32 %v5568_v1, %v2897_v56  ;;  %v2252_v2 = vmul.f32 0.5, %v5853_v24  ;;  %3882 = vtanh.f32 %v2298_v12  ;;  %v2275_v11 = vmul.f32 0.5, %v5870_v8 }
 0x159   : > { %v5932_v14 = vpop.f32.mrb[46].mxu1  ;;  %v5934_v51 = vpop.f32.mrb[47].mxu0  ;;  %v2898_v47 = vadd.f32 0.5, %v2682_v18  ;;  %v2705_v39 = vmul.f32 0.5, %v3871_v23  ;;  %v2321_v30 = vmul.f32 0.5, %v1050_v15  ;;  %3074 = vst [vmem:[%s5582_s6 + $0x70] sm:$0xff] %v3047_v4  ;;  %3884 = vtanh.f32 %v2251_v48 }
 0x15a   : > { %v5938_v7 = vpop.f32.mrb[47].mxu1  ;;  %v3873_v25 = vpop.eup %3872  ;;  %v3049_v40 = vadd.f32 %v3022_v45, %v5744_v26  ;;  %v2276_v20 = vmul.f32 0.5, %v5889_v35  ;;  %v1169_v56 = vadd.f32 %v5788_v57, %v5554_v55  ;;  %v2635_v26 = vmul.f32 0.5, %v3869_v44 }
 0x15b   : > { %v3023_v24 = vmul.f32 %v5576_v6, %v2898_v47  ;;  %v2921_v38 = vadd.f32 0.5, %v2705_v39  ;;  %3886 = vtanh.f32 %v2321_v30  ;;  %v5958_v12 = vpop.eup %3874  ;;  %v2636_v48 = vmul.f32 0.5, %v3873_v25 }
 0x15c   : > { %v5943_v54 = vpop.f32.mrb[48].mxu0  ;;  %3076 = vst [vmem:[%s5582_s6 + $0x80] sm:$0xff] %v3049_v40  ;;  %v1052_v8 = vadd.f32 %v5790_v33, %v5559_v59  ;;  %v1171_v35 = vadd.f32 %v5794_v50, %v5563_v60  ;;  %v3877_v47 = vpop.eup %3876  ;;  %3888 = vtanh.f32 %v2252_v2  ;;  %v2299_v57 = vmul.f32 0.5, %v5899_v29 }
 0x15d   : > { %v5949_v49 = vpop.f32.mrb[48].mxu1  ;;  %v5951_v43 = vpop.f32.mrb[49].mxu0  ;;  %v3050_v39 = vadd.f32 %v3023_v24, %v5724_v37  ;;  %v3025_v55 = vmul.f32 %v5568_v1, %v2921_v38  ;;  %3890 = vtanh.f32 %v2275_v11  ;;  %v2706_v25 = vmul.f32 0.5, %v3877_v47 }
 0x15e   : > { %v5956_v18 = vpop.f32.mrb[49].mxu1  ;;  %v2300_v44 = vmul.f32 0.5, %v1165_v34  ;;  %v2322_v23 = vmul.f32 0.5, %v1052_v8  ;;  %3892 = vtanh.f32 %v2276_v20  ;;  %v2323_v33 = vmul.f32 0.5, %v1169_v56 }
 0x15f   : > { %v3879_v60 = vpop.eup %3878  ;;  %3077 = vst [vmem:[%s5582_s6 + $0x88] sm:$0xff] %v3050_v39  ;;  %v3052_v37 = vadd.f32 %v3025_v55, %v5811_v21  ;;  %v1240_v50 = vadd.f32 %v5803_v22, %v5586_v17  ;;  %v5980_v45 = vadd.f32 0.5, %v2612_v62  ;;  %v2922_v2 = vadd.f32 0.5, %v2706_v25  ;;  %v6926_v55 = vld [vmem:[#allocation11_spill] sm:$0xff] }
 0x160   : > { %v5968_v15 = vpop.f32.mrb[50].mxu0  ;;  %v2729_v34 = vmul.f32 0.5, %v3879_v60  ;;  %3894 = vtanh.f32 %v2322_v23  ;;  %v2324_v30 = vmul.f32 0.5, %v1171_v35  ;;  %v1359_v40 = vadd.f32 %v5807_v27, %v5594_v28 }
 0x161   : > { %v5970_v4 = vpop.f32.mrb[50].mxu1  ;;  %v5972_v59 = vpop.f32.mrb[51].mxu0  ;;  %6922 = vst [vmem:[#allocation23_spill] sm:$0xff] %v5980_v45  ;;  %3079 = vst [vmem:[%s5582_s6 + $0x98] sm:$0xff] %v3052_v37  ;;  %3896 = vtanh.f32 %v2299_v57  ;;  %v1242_v21 = vadd.f32 %v5809_v13, %v5601_v53  ;;  %v5989_v22 = vadd.f32 0.5, %v2635_v26  ;;  %v3026_v62 = vmul.f32 %v5576_v6, %v2922_v2  ;;  %v6925_v13 = vld [vmem:[#allocation10_spill] sm:$0xff] }
 0x162   : > { %v5978_v29 = vpop.f32.mrb[51].mxu1  ;;  %v3881_v20 = vpop.eup %3880  ;;  %v2945_v24 = vadd.f32 0.5, %v2729_v34  ;;  %3898 = vtanh.f32 %v2300_v44  ;;  %v5996_v35 = vadd.f32 0.5, %v2636_v48  ;;  %v2133_v27 = vmul.f32 0.5, %v1240_v50  ;;  %v6929_v45 = vld [vmem:[#allocation12_spill] sm:$0xff] }
 0x163   : > { %6923 = vst [vmem:[#allocation24_spill] sm:$0xff] %v5989_v22  ;;  %v3883_v8 = vpop.eup %3882  ;;  %3900 = vtanh.f32 %v2323_v33  ;;  %v1361_v47 = vadd.f32 %v5815_v61, %v6925_v13  ;;  %v3053_v57 = vadd.f32 %v3026_v62, %v6926_v55  ;;  %v1246_v23 = vadd.f32 %v5827_v41, %v5586_v17  ;;  %v6927_v62 = vld [vmem:[#allocation13_spill] sm:$0xff] }
 0x164   : > { %v5987_v11 = vpop.f32.mrb[52].mxu0  ;;  %6924 = vst [vmem:[#allocation25_spill] sm:$0xff] %v5996_v35  ;;  %v3885_v26 = vpop.eup %3884  ;;  %v3028_v25 = vmul.f32 %v5568_v1, %v2945_v24  ;;  %v2730_v44 = vmul.f32 0.5, %v3883_v8  ;;  %3902 = vtanh.f32 %v2324_v30  ;;  %v2135_v48 = vmul.f32 0.5, %v1359_v40 }
 0x165   : > { %v5992_v38 = vpop.f32.mrb[52].mxu1  ;;  %v5994_v56 = vpop.f32.mrb[53].mxu0  ;;  %v2134_v37 = vmul.f32 0.5, %v1242_v21  ;;  %v1365_v33 = vadd.f32 %v5838_v19, %v5594_v28  ;;  %3080 = vst [vmem:[%s5582_s6 + $0xa0] sm:$0xff] %v3053_v57  ;;  %v1248_v24 = vadd.f32 %v6927_v62, %v5601_v53  ;;  %v2659_v40 = vmul.f32 0.5, %v5958_v12 }
 0x166   : > { %v6000_v39 = vpop.f32.mrb[53].mxu1  ;;  %v3887_v60 = vpop.eup %3886  ;;  %v3055_v50 = vadd.f32 %v3028_v25, %v5829_v3  ;;  %v2946_v2 = vadd.f32 0.5, %v2730_v44  ;;  %3904 = vtanh.f32 %v2133_v27  ;;  %v2136_v19 = vmul.f32 0.5, %v1361_v47 }
 0x167   : > { %v2753_v34 = vmul.f32 0.5, %v3887_v60  ;;  %v3889_v30 = vpop.eup %3888  ;;  %v1367_v21 = vadd.f32 %v5842_v31, %v6925_v13  ;;  %v2157_v44 = vmul.f32 0.5, %v1246_v23  ;;  %v1252_v60 = vadd.f32 %v5855_v16, %v5586_v17 }
 0x168   : > { %v6008_v61 = vpop.f32.mrb[54].mxu0  ;;  %v3891_v3 = vpop.eup %3890  ;;  %3082 = vst [vmem:[%s5582_s6 + $0xb0] sm:$0xff] %v3055_v50  ;;  %v3029_v57 = vmul.f32 %v5576_v6, %v2946_v2  ;;  %v2660_v35 = vmul.f32 0.5, %v3881_v20  ;;  %3906 = vtanh.f32 %v2135_v48  ;;  %v2159_v12 = vmul.f32 0.5, %v1365_v33 }
 0x169   : > { %v6014_v8 = vpop.f32.mrb[54].mxu1  ;;  %v6016_v41 = vpop.f32.mrb[55].mxu0  ;;  %v2969_v25 = vadd.f32 0.5, %v2753_v34  ;;  %v1371_v27 = vadd.f32 %v5860_v42, %v5594_v28  ;;  %3908 = vtanh.f32 %v2134_v37  ;;  %v2158_v23 = vmul.f32 0.5, %v1248_v24  ;;  %v6932_v42 = vld [vmem:[#allocation15_spill] sm:$0xff] }
 0x16a   : > { %v6021_v55 = vpop.f32.mrb[55].mxu1  ;;  %v3893_v62 = vpop.eup %3892  ;;  %v3056_v50 = vadd.f32 %v3029_v57, %v6929_v45  ;;  %3910 = vtanh.f32 %v2136_v19  ;;  %v2160_v33 = vmul.f32 0.5, %v1367_v21  ;;  %v1254_v22 = vadd.f32 %v6932_v42, %v5601_v53  ;;  %v6934_v19 = vld [vmem:[#allocation17_spill] sm:$0xff] }
 0x16b   : > { %6928 = vst [vmem:[#allocation10_spill] sm:$0xff] %v6021_v55  ;;  %v3895_v31 = vpop.eup %3894  ;;  %v3031_v2 = vmul.f32 %v5568_v1, %v2969_v25  ;;  %v2683_v45 = vmul.f32 0.5, %v3885_v26  ;;  %v6933_v1 = vld [vmem:[#allocation16_spill] sm:$0xff]  ;;  %3912 = vtanh.f32 %v2157_v44  ;;  %v2181_v24 = vmul.f32 0.5, %v1252_v60 }
 0x16c   : > { %v6029_v47 = vpop.f32.mrb[56].mxu0  ;;  %v3897_v20 = vpop.eup %3896  ;;  %v2754_v48 = vmul.f32 0.5, %v3895_v31  ;;  %3083 = vst [vmem:[%s5582_s6 + $0xb8] sm:$0xff] %v3056_v50  ;;  %3914 = vtanh.f32 %v2159_v12  ;;  %v1373_v21 = vadd.f32 %v6934_v19, %v6925_v13  ;;  %v6047_v42 = vadd.f32 0.5, %v2659_v40 }
 0x16d   : > { %v6033_v34 = vpop.f32.mrb[56].mxu1  ;;  %v6035_v16 = vpop.f32.mrb[57].mxu0  ;;  %v3058_v37 = vadd.f32 %v3031_v2, %v6933_v1  ;;  %3916 = vtanh.f32 %v2158_v23  ;;  %v1258_v26 = vadd.f32 %v5878_v5, %v5586_v17  ;;  %v6056_v12 = vadd.f32 0.5, %v2660_v35  ;;  %v6938_v1 = vld [vmem:[#allocation14_spill] sm:$0xff] }
 0x16e   : > { %6930 = vst [vmem:[#allocation11_spill] sm:$0xff] %v6033_v34  ;;  %6931 = vst [vmem:[#allocation13_spill] sm:$0xff] %v6035_v16  ;;  %v6039_v58 = vpop.f32.mrb[57].mxu1  ;;  %v3899_v55 = vpop.eup %3898  ;;  %v2970_v25 = vadd.f32 0.5, %v2754_v48  ;;  %v2183_v16 = vmul.f32 0.5, %v1371_v27  ;;  %v2684_v34 = vmul.f32 0.5, %v3889_v30  ;;  %3918 = vtanh.f32 %v2160_v33 }
 0x16f   : > { %v3901_v57 = vpop.eup %3900  ;;  %6935 = vst [vmem:[#allocation12_spill] sm:$0xff] %v6047_v42  ;;  %3085 = vst [vmem:[%s5582_s6 + $0xc8] sm:$0xff] %v3058_v37  ;;  %v2182_v2 = vmul.f32 0.5, %v1254_v22  ;;  %v6061_v40 = vadd.f32 0.5, %v2683_v45  ;;  %v2707_v30 = vmul.f32 0.5, %v3891_v3  ;;  %3920 = vtanh.f32 %v2181_v24 }
 0x170   : > { %v6045_v31 = vpop.f32.mrb[58].mxu0  ;;  %v3903_v60 = vpop.eup %3902  ;;  %6936 = vst [vmem:[#allocation15_spill] sm:$0xff] %v6056_v12  ;;  %v3032_v27 = vmul.f32 %v5576_v6, %v2970_v25  ;;  %v2184_v23 = vmul.f32 0.5, %v1373_v21  ;;  %3922 = vtanh.f32 %v2183_v16  ;;  %v1377_v35 = vadd.f32 %v5881_v52, %v5594_v28 }
 0x171   : > { %v6052_v50 = vpop.f32.mrb[58].mxu1  ;;  %v6054_v44 = vpop.f32.mrb[59].mxu0  ;;  %6937 = vst [vmem:[#allocation16_spill] sm:$0xff] %v6061_v40  ;;  %v1260_v6 = vadd.f32 %v5883_v10, %v5601_v53  ;;  %v6070_v22 = vadd.f32 0.5, %v2684_v34  ;;  %v2708_v45 = vmul.f32 0.5, %v3893_v62  ;;  %v2205_v25 = vmul.f32 0.5, %v1258_v26 }
 0x172   : > { %v6059_v48 = vpop.f32.mrb[59].mxu1  ;;  %v3905_v5 = vpop.eup %3904  ;;  %v3059_v37 = vadd.f32 %v3032_v27, %v6938_v1  ;;  %v1379_v3 = vadd.f32 %v5891_v36, %v6925_v13  ;;  %v2731_v21 = vmul.f32 0.5, %v3897_v20  ;;  %3924 = vtanh.f32 %v2182_v2 }
 0x173   : > { %6939 = vst [vmem:[#allocation17_spill] sm:$0xff] %v6070_v22  ;;  %v3907_v16 = vpop.eup %3906  ;;  %v2207_v52 = vmul.f32 0.5, %v1377_v35  ;;  %v1264_v10 = vadd.f32 %v5901_v0, %v5586_v17  ;;  %v6083_v62 = vadd.f32 0.5, %v2707_v30  ;;  %3926 = vtanh.f32 %v2184_v23 }
 0x174   : > { %v6068_v33 = vpop.f32.mrb[60].mxu0  ;;  %3086 = vst [vmem:[%s5582_s6 + $0xd0] sm:$0xff] %v3059_v37  ;;  %v3909_v34 = vpop.eup %3908  ;;  %v2206_v26 = vmul.f32 0.5, %v1260_v6  ;;  %v1383_v36 = vadd.f32 %v5906_v46, %v5594_v28  ;;  %v2732_v22 = vmul.f32 0.5, %v3899_v55  ;;  %v2755_v12 = vmul.f32 0.5, %v3901_v57 }
 0x175   : > { %v6074_v24 = vpop.f32.mrb[60].mxu1  ;;  %v6076_v19 = vpop.f32.mrb[61].mxu0  ;;  %6940 = vst [vmem:[#allocation14_spill] sm:$0xff] %v6083_v62  ;;  %v2756_v20 = vmul.f32 0.5, %v3903_v60  ;;  %v2208_v37 = vmul.f32 0.5, %v1379_v3  ;;  %v2565_v40 = vmul.f32 0.5, %v3905_v5  ;;  %3928 = vtanh.f32 %v2205_v25 }
 0x176   : > { %v6081_v27 = vpop.f32.mrb[61].mxu1  ;;  %v3911_v1 = vpop.eup %3910  ;;  %v2567_v0 = vmul.f32 0.5, %v3907_v16  ;;  %v1266_v30 = vadd.f32 %v5908_v63, %v5601_v53  ;;  %v6095_v46 = vadd.f32 0.5, %v2708_v45  ;;  %v6097_v55 = vadd.f32 0.5, %v2731_v21 }
 0x177   : > { %v3913_v35 = vpop.eup %3912  ;;  %3930 = vtanh.f32 %v2207_v52  ;;  %v2229_v57 = vmul.f32 0.5, %v1264_v10  ;;  %v2566_v5 = vmul.f32 0.5, %v3909_v34  ;;  %v2231_v25 = vmul.f32 0.5, %v1383_v36 }
 0x178   : > { %v6087_v2 = vpop.f32.mrb[62].mxu0  ;;  %v3915_v6 = vpop.eup %3914  ;;  %6942 = vst [vmem:[#allocation27_spill] sm:$0xff] %v6095_v46  ;;  %6943 = vst [vmem:[#allocation28_spill] sm:$0xff] %v6097_v55  ;;  %3932 = vtanh.f32 %v2206_v26  ;;  %v1385_v63 = vadd.f32 %v5914_v9, %v6925_v13  ;;  %v6103_v42 = vadd.f32 0.5, %v2732_v22  ;;  %v2568_v45 = vmul.f32 0.5, %v3911_v1 }
 0x179   : > { %v6091_v62 = vpop.f32.mrb[62].mxu1  ;;  %v6093_v23 = vpop.f32.mrb[63].mxu0  ;;  %3934 = vtanh.f32 %v2208_v37  ;;  %v6109_v10 = vadd.f32 0.5, %v2756_v20  ;;  %v6111_v46 = vadd.f32 0.5, %v2565_v40  ;;  %v6113_v34 = vadd.f32 0.5, %v2567_v0 }
 0x17a   : > { %6941 = vst [vmem:[#allocation26_spill] sm:$0xff] %v6093_v23  ;;  %v6099_v60 = vpop.f32.mrb[63].mxu1  ;;  %v3917_v3 = vpop.eup %3916  ;;  %6944 = vst [vmem:[#allocation29_spill] sm:$0xff] %v6103_v42  ;;  %v6105_v23 = vadd.f32 0.5, %v2755_v12  ;;  %v2230_v26 = vmul.f32 0.5, %v1266_v30  ;;  %v2589_v42 = vmul.f32 0.5, %v3913_v35  ;;  %3936 = vtanh.f32 %v2229_v57 }
 0x17b   : > { %v3919_v16 = vpop.eup %3918  ;;  %6946 = vst [vmem:[#allocation31_spill] sm:$0xff] %v6109_v10  ;;  %6947 = vst [vmem:[#allocation32_spill] sm:$0xff] %v6111_v46  ;;  %v2591_v12 = vmul.f32 0.5, %v3915_v6  ;;  %v1270_v1 = vadd.f32 %v5925_v32, %v5586_v17  ;;  %v6123_v20 = vadd.f32 0.5, %v2566_v5  ;;  %3938 = vtanh.f32 %v2231_v25 }
 0x17c   : > { %6945 = vst [vmem:[#allocation30_spill] sm:$0xff] %v6105_v23  ;;  %v6107_v21 = vpop.f32.mrb[64].mxu0  ;;  %v3921_v52 = vpop.eup %3920  ;;  %6948 = vst [vmem:[#allocation33_spill] sm:$0xff] %v6113_v34  ;;  %v2232_v40 = vmul.f32 0.5, %v1385_v63  ;;  %v1389_v0 = vadd.f32 %v5932_v14, %v5594_v28  ;;  %v6127_v10 = vadd.f32 0.5, %v2568_v45  ;;  %v2590_v34 = vmul.f32 0.5, %v3917_v3 }
 0x17d   : > { %v6115_v36 = vpop.f32.mrb[64].mxu1  ;;  %v6117_v9 = vpop.f32.mrb[65].mxu0  ;;  %6949 = vst [vmem:[#allocation34_spill] sm:$0xff] %v6123_v20  ;;  %v2592_v46 = vmul.f32 0.5, %v3919_v16  ;;  %v1272_v35 = vadd.f32 %v5934_v51, %v5601_v53  ;;  %v2613_v57 = vmul.f32 0.5, %v3921_v52  ;;  %3940 = vtanh.f32 %v2230_v26 }
 0x17e   : > { %v3923_v22 = vpop.eup %3922  ;;  %v6121_v37 = vpop.f32.mrb[65].mxu1  ;;  %6950 = vst [vmem:[#allocation35_spill] sm:$0xff] %v6127_v10  ;;  %v1391_v5 = vadd.f32 %v5938_v7, %v6925_v13  ;;  %v6139_v63 = vadd.f32 0.5, %v2589_v42  ;;  %v6141_v3 = vadd.f32 0.5, %v2591_v12  ;;  %v2253_v16 = vmul.f32 0.5, %v1270_v1 }
 0x17f   : > { %v3925_v30 = vpop.eup %3924  ;;  %v2615_v23 = vmul.f32 0.5, %v3923_v22  ;;  %v1276_v51 = vadd.f32 %v5943_v54, %v5586_v17  ;;  %3942 = vtanh.f32 %v2232_v40  ;;  %v2255_v26 = vmul.f32 0.5, %v1389_v0 }
 0x180   : > { %v6131_v6 = vpop.f32.mrb[66].mxu0  ;;  %v3927_v32 = vpop.eup %3926  ;;  %6951 = vst [vmem:[#allocation36_spill] sm:$0xff] %v6139_v63  ;;  %6952 = vst [vmem:[#allocation37_spill] sm:$0xff] %v6141_v3  ;;  %v2614_v22 = vmul.f32 0.5, %v3925_v30  ;;  %v1395_v7 = vadd.f32 %v5949_v49, %v5594_v28  ;;  %v6149_v20 = vadd.f32 0.5, %v2590_v34  ;;  %v6151_v42 = vadd.f32 0.5, %v2592_v46 }
 0x181   : > { %v6135_v25 = vpop.f32.mrb[66].mxu1  ;;  %v6137_v14 = vpop.f32.mrb[67].mxu0  ;;  %v2616_v12 = vmul.f32 0.5, %v3927_v32  ;;  %v2254_v3 = vmul.f32 0.5, %v1272_v35  ;;  %v6155_v54 = vadd.f32 0.5, %v2613_v57  ;;  %v6157_v55 = vadd.f32 0.5, %v2615_v23 }
 0x182   : > { %v6145_v45 = vpop.f32.mrb[67].mxu1  ;;  %v3929_v52 = vpop.eup %3928  ;;  %6953 = vst [vmem:[#allocation38_spill] sm:$0xff] %v6149_v20  ;;  %6954 = vst [vmem:[#allocation39_spill] sm:$0xff] %v6151_v42  ;;  %v2256_v30 = vmul.f32 0.5, %v1391_v5  ;;  %v1278_v40 = vadd.f32 %v5951_v43, %v5601_v53  ;;  %3944 = vtanh.f32 %v2253_v16  ;;  %v2277_v32 = vmul.f32 0.5, %v1276_v51 }
 0x183   : > { %v3931_v10 = vpop.eup %3930  ;;  %6955 = vst [vmem:[#allocation40_spill] sm:$0xff] %v6155_v54  ;;  %6956 = vst [vmem:[#allocation41_spill] sm:$0xff] %v6157_v55  ;;  %v2637_v46 = vmul.f32 0.5, %v3929_v52  ;;  %v1397_v35 = vadd.f32 %v5956_v18, %v6925_v13  ;;  %v6169_v57 = vadd.f32 0.5, %v2614_v22  ;;  %3946 = vtanh.f32 %v2255_v26 }
 0x184   : > { %v6153_v1 = vpop.f32.mrb[68].mxu0  ;;  %v3933_v63 = vpop.eup %3932  ;;  %v2639_v23 = vmul.f32 0.5, %v3931_v10  ;;  %v2279_v5 = vmul.f32 0.5, %v1395_v7  ;;  %v6171_v43 = vadd.f32 0.5, %v2616_v12  ;;  %3948 = vtanh.f32 %v2254_v3 }
 0x185   : > { %v6161_v0 = vpop.f32.mrb[68].mxu1  ;;  %v6163_v49 = vpop.f32.mrb[69].mxu0  ;;  %6957 = vst [vmem:[#allocation42_spill] sm:$0xff] %v6169_v57  ;;  %v2638_v54 = vmul.f32 0.5, %v3933_v63  ;;  %v1282_v52 = vadd.f32 %v5968_v15, %v5586_v17  ;;  %3950 = vtanh.f32 %v2256_v30  ;;  %v2278_v18 = vmul.f32 0.5, %v1278_v40 }
 0x186   : > { %v3935_v34 = vpop.eup %3934  ;;  %v6167_v42 = vpop.f32.mrb[69].mxu1  ;;  %6958 = vst [vmem:[#allocation43_spill] sm:$0xff] %v6171_v43  ;;  %v1401_v22 = vadd.f32 %v5970_v4, %v5594_v28  ;;  %v6183_v7 = vadd.f32 0.5, %v2637_v46  ;;  %3952 = vtanh.f32 %v2277_v32  ;;  %v2280_v63 = vmul.f32 0.5, %v1397_v35 }
 0x187   : > { %v3937_v55 = vpop.eup %3936  ;;  %v2640_v20 = vmul.f32 0.5, %v3935_v34  ;;  %v1284_v15 = vadd.f32 %v5972_v59, %v5601_v53  ;;  %v6189_v34 = vadd.f32 0.5, %v2639_v23  ;;  %3954 = vtanh.f32 %v2279_v5 }
 0x188   : > { %v6175_v16 = vpop.f32.mrb[70].mxu0  ;;  %v3939_v51 = vpop.eup %3938  ;;  %6959 = vst [vmem:[#allocation44_spill] sm:$0xff] %v6183_v7  ;;  %v2661_v30 = vmul.f32 0.5, %v3937_v55  ;;  %v1403_v4 = vadd.f32 %v5978_v29, %v6925_v13  ;;  %v6193_v40 = vadd.f32 0.5, %v2638_v54  ;;  %v2301_v46 = vmul.f32 0.5, %v1282_v52 }
 0x189   : > { %v6179_v10 = vpop.f32.mrb[70].mxu1  ;;  %v6181_v26 = vpop.f32.mrb[71].mxu0  ;;  %6960 = vst [vmem:[#allocation45_spill] sm:$0xff] %v6189_v34  ;;  %v2663_v43 = vmul.f32 0.5, %v3939_v51  ;;  %v1288_v32 = vadd.f32 %v5987_v11, %v5586_v17  ;;  %v6199_v7 = vadd.f32 0.5, %v2640_v20  ;;  %3956 = vtanh.f32 %v2278_v18 }
 0x18a   : > { %v6187_v3 = vpop.f32.mrb[71].mxu1  ;;  %v3941_v12 = vpop.eup %3940  ;;  %6961 = vst [vmem:[#allocation46_spill] sm:$0xff] %v6193_v40  ;;  %v2303_v23 = vmul.f32 0.5, %v1401_v22  ;;  %v1407_v55 = vadd.f32 %v5992_v38, %v5594_v28  ;;  %3958 = vtanh.f32 %v2280_v63  ;;  %v2302_v52 = vmul.f32 0.5, %v1284_v15  ;;  %v4201_v28 = vld [vmem:[%s6884_s2 + $0x8] sm:$0xff]  ;;  %v6965_v38 = vld [vmem:[#allocation6_spill] sm:$0xff] }
 0x18b   : > { %v3943_v59 = vpop.eup %3942  ;;  %6962 = vst [vmem:[#allocation47_spill] sm:$0xff] %v6199_v7  ;;  %v2662_v54 = vmul.f32 0.5, %v3941_v12  ;;  %v1290_v17 = vadd.f32 %v5994_v56, %v5601_v53  ;;  %v6211_v51 = vadd.f32 0.5, %v2661_v30  ;;  %v2304_v20 = vmul.f32 0.5, %v1403_v4 }
 0x18c   : > { %v6197_v35 = vpop.f32.mrb[72].mxu0  ;;  %v1409_v18 = vadd.f32 %v6000_v39, %v6925_v13  ;;  %v6219_v22 = vrot.slane %v4201_v28, %v6965_v38  ;;  %v3945_v63 = vpop.eup %3944  ;;  %v6221_v15 = vadd.f32 0.5, %v2663_v43  ;;  %v2664_v12 = vmul.f32 0.5, %v3943_v59  ;;  %v6967_v39 = vld [vmem:[#allocation7_spill] sm:$0xff] }
 0x18d   : > { %v6203_v5 = vpop.f32.mrb[72].mxu1  ;;  %v6205_v29 = vpop.f32.mrb[73].mxu0  ;;  %6964 = vst [vmem:[#allocation49_spill] sm:$0xff] %v6211_v51  ;;  %3960 = vtanh.f32 %v2301_v46  ;;  %v2325_v53 = vmul.f32 0.5, %v1288_v32  ;;  %v2327_v4 = vmul.f32 0.5, %v1407_v55  ;;  %v6228_v7 = vrot.slane %v4201_v28, %v6967_v39  ;;  %v6971_v32 = vld [vmem:[#allocation8_spill] sm:$0xff] }
 0x18e   : > { %v6209_v11 = vpop.f32.mrb[73].mxu1  ;;  %6966 = vst [vmem:[#allocation50_spill] sm:$0xff] %v6221_v15  ;;  %v3947_v30 = vpop.eup %3946  ;;  %3962 = vtanh.f32 %v2303_v23  ;;  %v1478_v13 = vadd.f32 %v6008_v61, %v6219_v22  ;;  %v6234_v15 = vadd.f32 0.5, %v2662_v54  ;;  %v2326_v46 = vmul.f32 0.5, %v1290_v17 }
 0x18f   : > { %6963 = vst [vmem:[#allocation48_spill] sm:$0xff] %v6209_v11  ;;  %v3949_v43 = vpop.eup %3948  ;;  %3964 = vtanh.f32 %v2302_v52  ;;  %v6237_v59 = vrot.slane %v4201_v28, %v6971_v32  ;;  %v2685_v34 = vmul.f32 0.5, %v3945_v63  ;;  %v2328_v61 = vmul.f32 0.5, %v1409_v18  ;;  %v6973_v52 = vld [vmem:[#allocation9_spill] sm:$0xff] }
 0x190   : > { %v6223_v56 = vpop.f32.mrb[74].mxu0  ;;  %6970 = vst [vmem:[#allocation53_spill] sm:$0xff] %v6234_v15  ;;  %v3951_v55 = vpop.eup %3950  ;;  %3966 = vtanh.f32 %v2304_v20  ;;  %v1597_v39 = vadd.f32 %v6014_v8, %v6228_v7  ;;  %v2137_v57 = vmul.f32 0.5, %v1478_v13  ;;  %v6246_v17 = vrot.slane %v4201_v28, %v6973_v52  ;;  %v6978_v28 = vld [vmem:[#allocation11_spill] sm:$0xff] }
 0x191   : > { %v6230_v51 = vpop.f32.mrb[74].mxu1  ;;  %v6232_v38 = vpop.f32.mrb[75].mxu0  ;;  %3968 = vtanh.f32 %v2325_v53  ;;  %v1480_v54 = vadd.f32 %v6016_v41, %v6237_v59  ;;  %v1484_v20 = vadd.f32 %v6029_v47, %v6219_v22  ;;  %v2686_v53 = vmul.f32 0.5, %v3949_v43  ;;  %v6977_v41 = vld [vmem:[#allocation10_spill] sm:$0xff]  ;;  %v6980_v47 = vld [vmem:[#allocation13_spill] sm:$0xff] }
 0x192   : > { %6968 = vst [vmem:[#allocation51_spill] sm:$0xff] %v6230_v51  ;;  %6969 = vst [vmem:[#allocation52_spill] sm:$0xff] %v6232_v38  ;;  %v6239_v23 = vpop.f32.mrb[75].mxu1  ;;  %v3953_v40 = vpop.eup %3952  ;;  %3970 = vtanh.f32 %v2327_v4  ;;  %v2139_v63 = vmul.f32 0.5, %v1597_v39  ;;  %v1599_v13 = vadd.f32 %v6977_v41, %v6246_v17  ;;  %v1603_v52 = vadd.f32 %v6978_v28, %v6228_v7 }
 0x193   : > { %6972 = vst [vmem:[#allocation54_spill] sm:$0xff] %v6239_v23  ;;  %v3955_v15 = vpop.eup %3954  ;;  %v2687_v23 = vmul.f32 0.5, %v3947_v30  ;;  %3972 = vtanh.f32 %v2326_v46  ;;  %v2688_v4 = vmul.f32 0.5, %v3951_v55  ;;  %v2138_v39 = vmul.f32 0.5, %v1480_v54 }
 0x194   : > { %v6248_v32 = vpop.f32.mrb[76].mxu0  ;;  %v3957_v30 = vpop.eup %3956  ;;  %3974 = vtanh.f32 %v2328_v61  ;;  %v1486_v38 = vadd.f32 %v6980_v47, %v6237_v59  ;;  %v6264_v51 = vadd.f32 0.5, %v2664_v12  ;;  %v2140_v43 = vmul.f32 0.5, %v1599_v13 }
 0x195   : > { %6974 = vst [vmem:[#allocation55_spill] sm:$0xff] %v6248_v32  ;;  %v6252_v18 = vpop.f32.mrb[76].mxu1  ;;  %v6254_v8 = vpop.f32.mrb[77].mxu0  ;;  %3976 = vtanh.f32 %v2137_v57  ;;  %v2161_v46 = vmul.f32 0.5, %v1484_v20  ;;  %v6268_v41 = vadd.f32 0.5, %v2685_v34  ;;  %v2709_v28 = vmul.f32 0.5, %v3953_v40 }
 0x196   : > { %6975 = vst [vmem:[#allocation56_spill] sm:$0xff] %v6252_v18  ;;  %6976 = vst [vmem:[#allocation57_spill] sm:$0xff] %v6254_v8  ;;  %v6260_v32 = vpop.f32.mrb[77].mxu1  ;;  %v3959_v18 = vpop.eup %3958  ;;  %3978 = vtanh.f32 %v2139_v63  ;;  %v6274_v54 = vadd.f32 0.5, %v2687_v23  ;;  %v6276_v47 = vadd.f32 0.5, %v2686_v53  ;;  %v1605_v57 = vadd.f32 %v6039_v58, %v6246_v17 }
 0x197   : > { %6979 = vst [vmem:[#allocation10_spill] sm:$0xff] %v6260_v32  ;;  %6981 = vst [vmem:[#allocation11_spill] sm:$0xff] %v6264_v51  ;;  %v2163_v32 = vmul.f32 0.5, %v1603_v52  ;;  %v3961_v61 = vpop.eup %3960  ;;  %3980 = vtanh.f32 %v2140_v43  ;;  %v6282_v20 = vadd.f32 0.5, %v2688_v4  ;;  %v2162_v40 = vmul.f32 0.5, %v1486_v38 }
 0x198   : > { %v6266_v8 = vpop.f32.mrb[78].mxu0  ;;  %6982 = vst [vmem:[#allocation13_spill] sm:$0xff] %v6268_v41  ;;  %6983 = vst [vmem:[#allocation58_spill] sm:$0xff] %v6274_v54  ;;  %v3963_v34 = vpop.eup %3962  ;;  %3982 = vtanh.f32 %v2138_v39  ;;  %v1490_v52 = vadd.f32 %v6045_v31, %v6219_v22  ;;  %v2711_v13 = vmul.f32 0.5, %v3955_v15  ;;  %v2164_v23 = vmul.f32 0.5, %v1605_v57 }
 0x199   : > { %v6270_v11 = vpop.f32.mrb[78].mxu1  ;;  %v6272_v55 = vpop.f32.mrb[79].mxu0  ;;  %6984 = vst [vmem:[#allocation59_spill] sm:$0xff] %v6276_v47  ;;  %6985 = vst [vmem:[#allocation60_spill] sm:$0xff] %v6282_v20  ;;  %3984 = vtanh.f32 %v2161_v46  ;;  %v1609_v53 = vadd.f32 %v6052_v50, %v6228_v7  ;;  %v6292_v51 = vadd.f32 0.5, %v2709_v28  ;;  %v1492_v38 = vadd.f32 %v6054_v44, %v6237_v59 }
 0x19a   : > { %v6280_v12 = vpop.f32.mrb[79].mxu1  ;;  %v3965_v63 = vpop.eup %3964  ;;  %3986 = vtanh.f32 %v2163_v32  ;;  %v2185_v4 = vmul.f32 0.5, %v1490_v52  ;;  %v2710_v46 = vmul.f32 0.5, %v3957_v30  ;;  %v1611_v50 = vadd.f32 %v6059_v48, %v6246_v17 }
 0x19b   : > { %v6290_v58 = vpop.eup %3966  ;;  %6987 = vst [vmem:[#allocation62_spill] sm:$0xff] %v6292_v51  ;;  %3988 = vtanh.f32 %v2164_v23  ;;  %v2187_v57 = vmul.f32 0.5, %v1609_v53  ;;  %v2733_v32 = vmul.f32 0.5, %v3961_v61  ;;  %v2186_v52 = vmul.f32 0.5, %v1492_v38 }
 0x19c   : > { %v6288_v43 = vpop.f32.mrb[80].mxu0  ;;  %6986 = vst [vmem:[#allocation61_spill] sm:$0xff] %v6290_v58  ;;  %v3969_v15 = vpop.eup %3968  ;;  %v2712_v58 = vmul.f32 0.5, %v3959_v18  ;;  %3990 = vtanh.f32 %v2162_v40  ;;  %v2735_v44 = vmul.f32 0.5, %v3963_v34  ;;  %v2188_v54 = vmul.f32 0.5, %v1611_v50 }
 0x19d   : > { %v6296_v39 = vpop.f32.mrb[80].mxu1  ;;  %v6298_v31 = vpop.f32.mrb[81].mxu0  ;;  %3992 = vtanh.f32 %v2185_v4  ;;  %v1496_v41 = vadd.f32 %v6068_v33, %v6219_v22  ;;  %v2734_v53 = vmul.f32 0.5, %v3965_v63  ;;  %v1615_v48 = vadd.f32 %v6074_v24, %v6228_v7 }
 0x19e   : > { %v6302_v20 = vpop.f32.mrb[81].mxu1  ;;  %v3971_v28 = vpop.eup %3970  ;;  %3994 = vtanh.f32 %v2187_v57  ;;  %v1617_v18 = vadd.f32 %v6081_v27, %v6246_v17  ;;  %v6318_v4 = vadd.f32 0.5, %v2711_v13  ;;  %v2757_v33 = vmul.f32 0.5, %v3969_v15 }
 0x19f   : > { %v3973_v51 = vpop.eup %3972  ;;  %3996 = vtanh.f32 %v2188_v54  ;;  %v1498_v63 = vadd.f32 %v6076_v19, %v6237_v59  ;;  %v2759_v24 = vmul.f32 0.5, %v3971_v28  ;;  %v1502_v27 = vadd.f32 %v6087_v2, %v6219_v22 }
 0x1a0   : > { %v6306_v30 = vpop.f32.mrb[82].mxu0  ;;  %v6308_v23 = vpop.eup %3974  ;;  %6990 = vst [vmem:[#allocation65_spill] sm:$0xff] %v6318_v4  ;;  %3998 = vtanh.f32 %v2186_v52  ;;  %v2212_v50 = vmul.f32 0.5, %v1617_v18  ;;  %v6327_v47 = vadd.f32 0.5, %v2710_v46  ;;  %v6329_v13 = vadd.f32 0.5, %v2712_v58 }
 0x1a1   : > { %6988 = vst [vmem:[#allocation63_spill] sm:$0xff] %v6308_v23  ;;  %v6314_v61 = vpop.f32.mrb[82].mxu1  ;;  %v6316_v34 = vpop.f32.mrb[83].mxu0  ;;  %v6331_v15 = vadd.f32 0.5, %v2733_v32  ;;  %v2209_v54 = vmul.f32 0.5, %v1496_v41  ;;  %v6337_v28 = vadd.f32 0.5, %v2734_v53 }
 0x1a2   : > { %6989 = vst [vmem:[#allocation64_spill] sm:$0xff] %v6316_v34  ;;  %v3977_v40 = vpop.eup %3976  ;;  %v6322_v38 = vpop.f32.mrb[83].mxu1  ;;  %6992 = vst [vmem:[#allocation67_spill] sm:$0xff] %v6327_v47  ;;  %v2211_v18 = vmul.f32 0.5, %v1615_v48  ;;  %v6343_v47 = vadd.f32 0.5, %v2757_v33  ;;  %v2758_v58 = vmul.f32 0.5, %v3973_v51  ;;  %4000 = vtanh.f32 %v2212_v50 }
 0x1a3   : > { %6991 = vst [vmem:[#allocation66_spill] sm:$0xff] %v6322_v38  ;;  %v3979_v57 = vpop.eup %3978  ;;  %6993 = vst [vmem:[#allocation68_spill] sm:$0xff] %v6329_v13  ;;  %v6335_v38 = vadd.f32 0.5, %v2735_v44  ;;  %v2210_v32 = vmul.f32 0.5, %v1498_v63  ;;  %v2233_v53 = vmul.f32 0.5, %v1502_v27  ;;  %v2569_v33 = vmul.f32 0.5, %v3977_v40 }
 0x1a4   : > { %v3981_v23 = vpop.eup %3980  ;;  %6994 = vst [vmem:[#allocation69_spill] sm:$0xff] %v6331_v15  ;;  %v6333_v4 = vpop.f32.mrb[84].mxu0  ;;  %6996 = vst [vmem:[#allocation71_spill] sm:$0xff] %v6337_v28  ;;  %v6347_v15 = vadd.f32 0.5, %v2759_v24  ;;  %v2571_v51 = vmul.f32 0.5, %v3979_v57  ;;  %4002 = vtanh.f32 %v2209_v54  ;;  %v1623_v63 = vadd.f32 %v6099_v60, %v6246_v17  ;;  %v7002_v27 = vld [vmem:[#allocation18_spill] sm:$0xff] }
 0x1a5   : > { %v3983_v19 = vpop.eup %3982  ;;  %6995 = vst [vmem:[#allocation70_spill] sm:$0xff] %v6335_v38  ;;  %v2572_v52 = vmul.f32 0.5, %v3981_v23  ;;  %v6339_v34 = vpop.f32.mrb[84].mxu1  ;;  %6998 = vst [vmem:[#allocation73_spill] sm:$0xff] %v6343_v47  ;;  %v1621_v23 = vadd.f32 %v6091_v62, %v6228_v7  ;;  %4004 = vtanh.f32 %v2211_v18  ;;  %v7003_v62 = vld [vmem:[#allocation26_spill] sm:$0xff] }
 0x1a6   : > { %v6341_v2 = vpop.f32.mrb[85].mxu0  ;;  %v3985_v46 = vpop.eup %3984  ;;  %7000 = vst [vmem:[#allocation75_spill] sm:$0xff] %v6347_v15  ;;  %v1504_v47 = vadd.f32 %v7003_v62, %v6237_v59  ;;  %v2570_v57 = vmul.f32 0.5, %v3983_v19  ;;  %4006 = vtanh.f32 %v2210_v32  ;;  %v2236_v60 = vmul.f32 0.5, %v1623_v63 }
 0x1a7   : > { %6997 = vst [vmem:[#allocation72_spill] sm:$0xff] %v6341_v2  ;;  %v6345_v41 = vpop.f32.mrb[85].mxu1  ;;  %v3987_v13 = vpop.eup %3986  ;;  %v2788_v44 = vadd.f32 0.5, %v2572_v52  ;;  %v2593_v54 = vmul.f32 0.5, %v3985_v46  ;;  %v6369_v2 = vadd.f32 0.5, %v2758_v58  ;;  %4008 = vtanh.f32 %v2233_v53 }
 0x1a8   : > { %6999 = vst [vmem:[#allocation74_spill] sm:$0xff] %v6345_v41  ;;  %v3989_v48 = vpop.eup %3988  ;;  %v6358_v50 = vpop.f32.mrb[86].mxu0  ;;  %v2235_v18 = vmul.f32 0.5, %v1621_v23  ;;  %4010 = vtanh.f32 %v2236_v60  ;;  %v1508_v19 = vadd.f32 %v6107_v21, %v6219_v22  ;;  %v1629_v46 = vadd.f32 %v6121_v37, %v6246_v17 }
 0x1a9   : > { %7001 = vst [vmem:[#allocation76_spill] sm:$0xff] %v6358_v50  ;;  %v3991_v24 = vpop.eup %3990  ;;  %v3087_v52 = vmul.f32 %v2788_v44, %v7002_v27  ;;  %v2596_v15 = vmul.f32 0.5, %v3989_v48  ;;  %v6363_v38 = vpop.f32.mrb[86].mxu1  ;;  %7004 = vst [vmem:[#allocation18_spill] sm:$0xff] %v6369_v2  ;;  %v6372_v27 = vadd.f32 0.5, %v2569_v33  ;;  %v6380_v58 = vadd.f32 0.5, %v2571_v51 }
 0x1aa   : > { %v6365_v28 = vpop.f32.mrb[87].mxu0  ;;  %v3993_v40 = vpop.eup %3992  ;;  %v2234_v23 = vmul.f32 0.5, %v1504_v47  ;;  %v6387_v60 = vadd.f32 0.5, %v2570_v57  ;;  %v2595_v21 = vmul.f32 0.5, %v3987_v13  ;;  %v2594_v2 = vmul.f32 0.5, %v3991_v24 }
 0x1ab   : > { %v6367_v41 = vpop.f32.mrb[87].mxu1  ;;  %v3995_v50 = vpop.eup %3994  ;;  %3168 = vst [vmem:[%s6354_s12] sm:$0xff] %v3087_v52  ;;  %v2812_v44 = vadd.f32 0.5, %v2596_v15  ;;  %7005 = vst [vmem:[#allocation26_spill] sm:$0xff] %v6372_v27  ;;  %v7008_v52 = vld [vmem:[#allocation20_spill] sm:$0xff]  ;;  %v6389_v27 = vadd.f32 0.5, %v2593_v54  ;;  %4012 = vtanh.f32 %v2235_v18  ;;  %v1627_v51 = vadd.f32 %v6115_v36, %v6228_v7  ;;  %v7011_v54 = vld [vmem:[#allocation22_spill] sm:$0xff] }
 0x1ac   : > { %v3997_v48 = vpop.eup %3996  ;;  %v6378_v32 = vpop.f32.mrb[88].mxu0  ;;  %7007 = vst [vmem:[#allocation78_spill] sm:$0xff] %v6380_v58  ;;  %7009 = vst [vmem:[#allocation20_spill] sm:$0xff] %v6387_v60  ;;  %v2257_v57 = vmul.f32 0.5, %v1508_v19  ;;  %4014 = vtanh.f32 %v2234_v23 }
 0x1ad   : > { %7006 = vst [vmem:[#allocation77_spill] sm:$0xff] %v6378_v32  ;;  %v3999_v63 = vpop.eup %3998  ;;  %v3096_v15 = vmul.f32 %v2812_v44, %v7008_v52  ;;  %v2620_v53 = vmul.f32 0.5, %v3997_v48  ;;  %v6383_v62 = vpop.f32.mrb[88].mxu1  ;;  %7010 = vst [vmem:[#allocation79_spill] sm:$0xff] %v6389_v27  ;;  %v2260_v44 = vmul.f32 0.5, %v1629_v46  ;;  %v2617_v48 = vmul.f32 0.5, %v3993_v40 }
 0x1ae   : > { %v6385_v33 = vpop.f32.mrb[89].mxu0  ;;  %v6391_v37 = vpop.f32.mrb[89].mxu1  ;;  %v2619_v52 = vmul.f32 0.5, %v3995_v50  ;;  %v2618_v58 = vmul.f32 0.5, %v3999_v63  ;;  %v6405_v46 = vadd.f32 0.5, %v2595_v21  ;;  %v6407_v50 = vadd.f32 0.5, %v2594_v2 }
 0x1af   : > { %3177 = vst [vmem:[%s6354_s12 + $0x48] sm:$0xff] %v3096_v15  ;;  %v2836_v32 = vadd.f32 0.5, %v2620_v53  ;;  %v4001_v47 = vpop.eup %4000  ;;  %v1510_v15 = vadd.f32 %v6117_v9, %v6237_v59  ;;  %4016 = vtanh.f32 %v2260_v44  ;;  %v1514_v40 = vadd.f32 %v6131_v6, %v6219_v22 }
 0x1b0   : > { %v6396_v60 = vpop.f32.mrb[90].mxu0  ;;  %v2644_v24 = vmul.f32 0.5, %v4001_v47  ;;  %v4003_v36 = vpop.eup %4002  ;;  %7012 = vst [vmem:[#allocation22_spill] sm:$0xff] %v6405_v46  ;;  %7013 = vst [vmem:[#allocation80_spill] sm:$0xff] %v6407_v50  ;;  %v2259_v23 = vmul.f32 0.5, %v1627_v51  ;;  %v1633_v9 = vadd.f32 %v6135_v25, %v6228_v7  ;;  %v1635_v47 = vadd.f32 %v6145_v45, %v6246_v17  ;;  %v7017_v51 = vld [vmem:[#allocation24_spill] sm:$0xff] }
 0x1b1   : > { %v3105_v13 = vmul.f32 %v2836_v32, %v7011_v54  ;;  %v6401_v18 = vpop.f32.mrb[90].mxu1  ;;  %v6403_v53 = vpop.f32.mrb[91].mxu0  ;;  %v6418_v54 = vadd.f32 0.5, %v2617_v48  ;;  %v6420_v2 = vadd.f32 0.5, %v2619_v52  ;;  %v6422_v44 = vadd.f32 0.5, %v2618_v58 }
 0x1b2   : > { %v6411_v19 = vpop.f32.mrb[91].mxu1  ;;  %v4005_v32 = vpop.eup %4004  ;;  %v2860_v63 = vadd.f32 0.5, %v2644_v24  ;;  %4018 = vtanh.f32 %v2257_v57  ;;  %v2641_v24 = vmul.f32 0.5, %v4003_v36  ;;  %v2258_v27 = vmul.f32 0.5, %v1510_v15 }
 0x1b3   : > { %3186 = vst [vmem:[%s6354_s12 + $0x90] sm:$0xff] %v3105_v13  ;;  %v4007_v21 = vpop.eup %4006  ;;  %7014 = vst [vmem:[#allocation81_spill] sm:$0xff] %v6418_v54  ;;  %v1516_v25 = vadd.f32 %v6137_v14, %v6237_v59  ;;  %v2281_v58 = vmul.f32 0.5, %v1514_v40  ;;  %v2284_v54 = vmul.f32 0.5, %v1635_v47  ;;  %v1520_v57 = vadd.f32 %v6153_v1, %v6219_v22 }
 0x1b4   : > { %7015 = vst [vmem:[#allocation82_spill] sm:$0xff] %v6420_v2  ;;  %7016 = vst [vmem:[#allocation83_spill] sm:$0xff] %v6422_v44  ;;  %v6424_v6 = vpop.f32.mrb[92].mxu0  ;;  %v4009_v13 = vpop.eup %4008  ;;  %v3114_v46 = vmul.f32 %v2860_v63, %v7017_v51  ;;  %v2643_v2 = vmul.f32 0.5, %v4005_v32  ;;  %4020 = vtanh.f32 %v2259_v23  ;;  %v2283_v15 = vmul.f32 0.5, %v1633_v9 }
 0x1b5   : > { %v6429_v45 = vpop.f32.mrb[92].mxu1  ;;  %v6431_v48 = vpop.f32.mrb[93].mxu0  ;;  %v1639_v14 = vadd.f32 %v6161_v0, %v6228_v7  ;;  %v2642_v63 = vmul.f32 0.5, %v4007_v21  ;;  %4022 = vtanh.f32 %v2284_v54  ;;  %v1522_v51 = vadd.f32 %v6163_v49, %v6237_v59 }
 0x1b6   : > { %v4011_v52 = vpop.eup %4010  ;;  %v6435_v44 = vpop.f32.mrb[93].mxu1  ;;  %3195 = vst [vmem:[%s6354_s12 + $0xd8] sm:$0xff] %v3114_v46  ;;  %v1641_v40 = vadd.f32 %v6167_v42, %v6246_v17  ;;  %v2665_v47 = vmul.f32 0.5, %v4009_v13  ;;  %4024 = vtanh.f32 %v2258_v27  ;;  %v2282_v46 = vmul.f32 0.5, %v1516_v25  ;;  %v7019_v13 = vld [vmem:[#allocation12_spill] sm:$0xff] }
 0x1b7   : > { %v2668_v36 = vmul.f32 0.5, %v4011_v52  ;;  %v4013_v1 = vpop.eup %4012  ;;  %4026 = vtanh.f32 %v2281_v58  ;;  %v2305_v0 = vmul.f32 0.5, %v1520_v57  ;;  %v1526_v49 = vadd.f32 %v6175_v16, %v6219_v22  ;;  %v6460_v25 = vld [vmem:[%s6884_s2 + $0x10] sm:$0xff] }
 0x1b8   : > { %v6444_v32 = vpop.f32.mrb[94].mxu0  ;;  %v2308_v21 = vmul.f32 0.5, %v1641_v40  ;;  %v4015_v42 = vpop.eup %4014  ;;  %v6454_v52 = vadd.f32 0.5, %v2641_v24  ;;  %4028 = vtanh.f32 %v2283_v15  ;;  %v2307_v27 = vmul.f32 0.5, %v1639_v14 }
 0x1b9   : > { %v2884_v50 = vadd.f32 0.5, %v2668_v36  ;;  %v6446_v23 = vpop.f32.mrb[94].mxu1  ;;  %v6448_v9 = vpop.f32.mrb[95].mxu0  ;;  %v6462_v57 = vadd.f32 0.5, %v2643_v2  ;;  %v6464_v40 = vadd.f32 0.5, %v2642_v63  ;;  %v2306_v16 = vmul.f32 0.5, %v1522_v51 }
 0x1ba   : > { %v6452_v54 = vpop.f32.mrb[95].mxu1  ;;  %7018 = vst [vmem:[#allocation24_spill] sm:$0xff] %v6454_v52  ;;  %v4017_v58 = vpop.eup %4016  ;;  %4030 = vtanh.f32 %v2308_v21  ;;  %v6468_v24 = vadd.f32 0.5, %v2665_v47  ;;  %v1647_v15 = vadd.f32 %v6187_v3, %v6246_v17  ;;  %v2329_v63 = vmul.f32 0.5, %v1526_v49  ;;  %v7023_v51 = vld [vmem:[#allocation2_spill] sm:$0xff] }
 0x1bb   : > { %v3123_v36 = vmul.f32 %v2884_v50, %v7019_v13  ;;  %7020 = vst [vmem:[#allocation12_spill] sm:$0xff] %v6462_v57  ;;  %7021 = vst [vmem:[#allocation84_spill] sm:$0xff] %v6464_v40  ;;  %v2692_v50 = vmul.f32 0.5, %v4017_v58  ;;  %4032 = vtanh.f32 %v2282_v46  ;;  %v2667_v57 = vmul.f32 0.5, %v4013_v1  ;;  %v7024_v58 = vld [vmem:[#allocation3_spill] sm:$0xff] }
 0x1bc   : > { %v6466_v22 = vpop.f32.mrb[96].mxu0  ;;  %7022 = vst [vmem:[#allocation85_spill] sm:$0xff] %v6468_v24  ;;  %v4019_v2 = vpop.eup %4018  ;;  %4034 = vtanh.f32 %v2305_v0  ;;  %v6479_v21 = vrot.slane %v6460_v25, %v7023_v51  ;;  %v2332_v46 = vmul.f32 0.5, %v1647_v15  ;;  %v6485_v3 = vrot.slane %v6460_v25, %v7024_v58  ;;  %v7025_v0 = vld [vmem:[#allocation5_spill] sm:$0xff] }
 0x1bd   : > { %3204 = vst [vmem:[%s6354_s12 + $0x120] sm:$0xff] %v3123_v36  ;;  %v6473_v14 = vpop.f32.mrb[96].mxu1  ;;  %v6475_v13 = vpop.f32.mrb[97].mxu0  ;;  %v2908_v36 = vadd.f32 0.5, %v2692_v50  ;;  %4036 = vtanh.f32 %v2307_v27  ;;  %v2666_v17 = vmul.f32 0.5, %v4015_v42  ;;  %v6491_v49 = vrot.slane %v6460_v25, %v7025_v0  ;;  %v7027_v50 = vld [vmem:[#allocation16_spill] sm:$0xff] }
 0x1be   : > { %v6481_v47 = vpop.f32.mrb[97].mxu1  ;;  %4038 = vtanh.f32 %v2306_v16  ;;  %v1716_v1 = vadd.f32 %v6197_v35, %v6479_v21  ;;  %v4021_v24 = vpop.eup %4020  ;;  %v1645_v15 = vadd.f32 %v6179_v10, %v6228_v7  ;;  %v1835_v42 = vadd.f32 %v6203_v5, %v6485_v3  ;;  %v7031_v5 = vld [vmem:[#allocation4_spill] sm:$0xff] }
 0x1bf   : > { %v3132_v27 = vmul.f32 %v2908_v36, %v7027_v50  ;;  %4040 = vtanh.f32 %v2332_v46  ;;  %v4023_v58 = vpop.eup %4022  ;;  %v1528_v0 = vadd.f32 %v6181_v26, %v6237_v59  ;;  %v1718_v36 = vadd.f32 %v6205_v29, %v6491_v49 }
 0x1c0   : > { %v6493_v51 = vpop.f32.mrb[98].mxu0  ;;  %4042 = vtanh.f32 %v2329_v63  ;;  %v2141_v52 = vmul.f32 0.5, %v1716_v1  ;;  %v4025_v10 = vpop.eup %4024  ;;  %v2716_v7 = vmul.f32 0.5, %v4023_v58  ;;  %v2143_v46 = vmul.f32 0.5, %v1835_v42  ;;  %v7036_v58 = vld [vmem:[#allocation48_spill] sm:$0xff] }
 0x1c1   : > { %7026 = vst [vmem:[#allocation2_spill] sm:$0xff] %v6493_v51  ;;  %v6500_v16 = vpop.f32.mrb[98].mxu1  ;;  %v6502_v35 = vpop.f32.mrb[99].mxu0  ;;  %3213 = vst [vmem:[%s6354_s12 + $0x168] sm:$0xff] %v3132_v27  ;;  %v6513_v40 = vrot.slane %v6460_v25, %v7031_v5  ;;  %v1722_v63 = vadd.f32 %v6223_v56, %v6479_v21  ;;  %v6519_v26 = vadd.f32 0.5, %v2667_v57  ;;  %v2689_v59 = vmul.f32 0.5, %v4019_v2 }
 0x1c2   : > { %7028 = vst [vmem:[#allocation3_spill] sm:$0xff] %v6500_v16  ;;  %7029 = vst [vmem:[#allocation5_spill] sm:$0xff] %v6502_v35  ;;  %v6508_v50 = vpop.f32.mrb[99].mxu1  ;;  %v6517_v35 = vpop.eup %4026  ;;  %4044 = vtanh.f32 %v2141_v52  ;;  %v2142_v29 = vmul.f32 0.5, %v1718_v36  ;;  %v2691_v27 = vmul.f32 0.5, %v4021_v24  ;;  %v2932_v42 = vadd.f32 0.5, %v2716_v7 }
 0x1c3   : > { %7030 = vst [vmem:[#allocation16_spill] sm:$0xff] %v6508_v50  ;;  %7032 = vst [vmem:[#allocation4_spill] sm:$0xff] %v6517_v35  ;;  %v6523_v50 = vpop.eup %4028  ;;  %4046 = vtanh.f32 %v2143_v46  ;;  %v1837_v5 = vadd.f32 %v7036_v58, %v6513_v40  ;;  %v2690_v57 = vmul.f32 0.5, %v4025_v10  ;;  %v2165_v52 = vmul.f32 0.5, %v1722_v63 }
 0x1c4   : > { %7033 = vst [vmem:[#allocation86_spill] sm:$0xff] %v6519_v26  ;;  %v6521_v1 = vpop.f32.mrb[100].mxu0  ;;  %7035 = vst [vmem:[#allocation88_spill] sm:$0xff] %v6523_v50  ;;  %v4031_v35 = vpop.eup %4030  ;;  %v2331_v26 = vmul.f32 0.5, %v1645_v15  ;;  %4048 = vtanh.f32 %v2142_v29  ;;  %v7039_v50 = vld [vmem:[#allocation14_spill] sm:$0xff]  ;;  %v2330_v46 = vmul.f32 0.5, %v1528_v0 }
 0x1c5   : > { %7034 = vst [vmem:[#allocation87_spill] sm:$0xff] %v6521_v1  ;;  %v6527_v16 = vpop.f32.mrb[100].mxu1  ;;  %v6529_v56 = vpop.f32.mrb[101].mxu0  ;;  %v3141_v24 = vmul.f32 %v2932_v42, %v7039_v50  ;;  %v2740_v7 = vmul.f32 0.5, %v4031_v35  ;;  %v2144_v1 = vmul.f32 0.5, %v1837_v5  ;;  %v6536_v58 = vadd.f32 0.5, %v2666_v17 }
 0x1c6   : > { %7037 = vst [vmem:[#allocation48_spill] sm:$0xff] %v6527_v16  ;;  %v6531_v2 = vpop.f32.mrb[101].mxu1  ;;  %v4033_v36 = vpop.eup %4032  ;;  %v6538_v16 = vadd.f32 0.5, %v2689_v59  ;;  %4050 = vtanh.f32 %v2165_v52  ;;  %v7043_v15 = vld [vmem:[#allocation51_spill] sm:$0xff]  ;;  %v7046_v0 = vld [vmem:[#allocation52_spill] sm:$0xff]  ;;  %v7048_v52 = vld [vmem:[#allocation54_spill] sm:$0xff] }
 0x1c7   : > { %7038 = vst [vmem:[#allocation89_spill] sm:$0xff] %v6531_v2  ;;  %v6534_v51 = vpop.eup %4034  ;;  %7041 = vst [vmem:[#allocation90_spill] sm:$0xff] %v6536_v58  ;;  %v1841_v10 = vadd.f32 %v7043_v15, %v6485_v3  ;;  %v6546_v2 = vadd.f32 0.5, %v2691_v27  ;;  %v2956_v35 = vadd.f32 0.5, %v2740_v7  ;;  %4052 = vtanh.f32 %v2144_v1  ;;  %v7049_v27 = vld [vmem:[#allocation55_spill] sm:$0xff] }
 0x1c8   : > { %7040 = vst [vmem:[#allocation14_spill] sm:$0xff] %v6534_v51  ;;  %7042 = vst [vmem:[#allocation91_spill] sm:$0xff] %v6538_v16  ;;  %v6542_v29 = vpop.f32.mrb[102].mxu0  ;;  %v6544_v63 = vpop.eup %4036  ;;  %v1724_v50 = vadd.f32 %v7046_v0, %v6491_v49  ;;  %4054 = vtanh.f32 %v2331_v26  ;;  %v1843_v15 = vadd.f32 %v7048_v52, %v6513_v40  ;;  %v7052_v0 = vld [vmem:[#allocation28_spill] sm:$0xff]  ;;  %v6570_v52 = vmul.f32 0.5, %v4033_v36 }
 0x1c9   : > { %7044 = vst [vmem:[#allocation51_spill] sm:$0xff] %v6544_v63  ;;  %7045 = vst [vmem:[#allocation92_spill] sm:$0xff] %v6546_v2  ;;  %v6551_v17 = vpop.f32.mrb[102].mxu1  ;;  %v6553_v59 = vpop.f32.mrb[103].mxu0  ;;  %v2167_v5 = vmul.f32 0.5, %v1841_v10  ;;  %v6563_v63 = vadd.f32 0.5, %v2690_v57  ;;  %v3150_v51 = vmul.f32 %v2956_v35, %v7052_v0  ;;  %4056 = vtanh.f32 %v2330_v46 }
 0x1ca   : > { %3222 = vst [vmem:[%s6354_s12 + $0x1b0] sm:$0xff] %v3141_v24  ;;  %v6555_v42 = vpop.eup %4038  ;;  %v1728_v24 = vadd.f32 %v7049_v27, %v6479_v21  ;;  %v6561_v7 = vpop.f32.mrb[103].mxu1  ;;  %v2166_v2 = vmul.f32 0.5, %v1724_v50  ;;  %v2168_v10 = vmul.f32 0.5, %v1843_v15  ;;  %7055 = vst [vmem:[#allocation94_spill] sm:$0xff] %v6570_v52  ;;  %v7056_v27 = vld [vmem:[#allocation56_spill] sm:$0xff] }
 0x1cb   : > { %7047 = vst [vmem:[#allocation52_spill] sm:$0xff] %v6555_v42  ;;  %7050 = vst [vmem:[#allocation54_spill] sm:$0xff] %v6561_v7  ;;  %v4041_v1 = vpop.eup %4040  ;;  %4058 = vtanh.f32 %v2167_v5  ;;  %v1847_v57 = vadd.f32 %v7056_v27, %v6485_v3  ;;  %v7060_v15 = vld [vmem:[#allocation10_spill] sm:$0xff] }
 0x1cc   : > { %7051 = vst [vmem:[#allocation55_spill] sm:$0xff] %v6563_v63  ;;  %v6566_v16 = vpop.eup %4042  ;;  %v2764_v26 = vmul.f32 0.5, %v4041_v1  ;;  %v2189_v42 = vmul.f32 0.5, %v1728_v24  ;;  %v6568_v58 = vpop.f32.mrb[104].mxu0  ;;  %3231 = vst [vmem:[%s6354_s12 + $0x1f8] sm:$0xff] %v3150_v51  ;;  %4060 = vtanh.f32 %v2166_v2  ;;  %v7057_v63 = vld [vmem:[#allocation57_spill] sm:$0xff]  ;;  %v1849_v24 = vadd.f32 %v7060_v15, %v6513_v40 }
 0x1cd   : > { %7053 = vst [vmem:[#allocation28_spill] sm:$0xff] %v6566_v16  ;;  %7054 = vst [vmem:[#allocation93_spill] sm:$0xff] %v6568_v58  ;;  %v1730_v35 = vadd.f32 %v7057_v63, %v6491_v49  ;;  %v6577_v46 = vpop.f32.mrb[104].mxu1  ;;  %v6579_v50 = vpop.f32.mrb[105].mxu0  ;;  %4062 = vtanh.f32 %v2168_v10  ;;  %v1734_v51 = vadd.f32 %v6266_v8, %v6479_v21  ;;  %v2191_v63 = vmul.f32 0.5, %v1847_v57  ;;  %v7062_v52 = vld [vmem:[#allocation30_spill] sm:$0xff] }
 0x1ce   : > { %7058 = vst [vmem:[#allocation56_spill] sm:$0xff] %v6577_v46  ;;  %7059 = vst [vmem:[#allocation57_spill] sm:$0xff] %v6579_v50  ;;  %v4045_v1 = vpop.eup %4044  ;;  %v2980_v5 = vadd.f32 0.5, %v2764_v26  ;;  %v6585_v2 = vpop.f32.mrb[105].mxu1  ;;  %4064 = vtanh.f32 %v2189_v42  ;;  %v2192_v26 = vmul.f32 0.5, %v1849_v24  ;;  %v1853_v8 = vadd.f32 %v6270_v11, %v6485_v3  ;;  %v7066_v24 = vld [vmem:[#allocation19_spill] sm:$0xff] }
 0x1cf   : > { %7061 = vst [vmem:[#allocation10_spill] sm:$0xff] %v6585_v2  ;;  %v4047_v36 = vpop.eup %4046  ;;  %v2573_v0 = vmul.f32 0.5, %v4045_v1  ;;  %v2190_v27 = vmul.f32 0.5, %v1730_v35  ;;  %v2213_v10 = vmul.f32 0.5, %v1734_v51  ;;  %4066 = vtanh.f32 %v2191_v63 }
 0x1d0   : > { %v4049_v16 = vpop.eup %4048  ;;  %v3159_v50 = vmul.f32 %v2980_v5, %v7062_v52  ;;  %v2575_v46 = vmul.f32 0.5, %v4047_v36  ;;  %v6588_v58 = vpop.f32.mrb[106].mxu0  ;;  %v1736_v52 = vadd.f32 %v6272_v55, %v6491_v49  ;;  %v1855_v1 = vadd.f32 %v6280_v12, %v6513_v40  ;;  %v7068_v12 = vld [vmem:[#allocation32_spill] sm:$0xff] }
 0x1d1   : > { %v2789_v15 = vadd.f32 0.5, %v2573_v0  ;;  %v2574_v7 = vmul.f32 0.5, %v4049_v16  ;;  %v6592_v2 = vpop.f32.mrb[106].mxu1  ;;  %v6594_v42 = vpop.f32.mrb[107].mxu0  ;;  %4068 = vtanh.f32 %v2190_v27  ;;  %v2215_v55 = vmul.f32 0.5, %v1853_v8 }
 0x1d2   : > { %7063 = vst [vmem:[#allocation30_spill] sm:$0xff] %v6592_v2  ;;  %7064 = vst [vmem:[#allocation95_spill] sm:$0xff] %v6594_v42  ;;  %v4051_v57 = vpop.eup %4050  ;;  %v2791_v35 = vadd.f32 0.5, %v2575_v46  ;;  %v6601_v16 = vpop.f32.mrb[107].mxu1  ;;  %4070 = vtanh.f32 %v2192_v26  ;;  %v7067_v46 = vld [vmem:[#allocation34_spill] sm:$0xff]  ;;  %v2214_v2 = vmul.f32 0.5, %v1736_v52  ;;  %v1740_v26 = vadd.f32 %v6288_v43, %v6479_v21 }
 0x1d3   : > { %3240 = vst [vmem:[%s6354_s12 + $0x240] sm:$0xff] %v3159_v50  ;;  %7065 = vst [vmem:[#allocation96_spill] sm:$0xff] %v6601_v16  ;;  %v4053_v5 = vpop.eup %4052  ;;  %v3088_v11 = vmul.f32 %v2789_v15, %v7066_v24  ;;  %v2790_v51 = vadd.f32 0.5, %v2574_v7  ;;  %v2597_v36 = vmul.f32 0.5, %v4051_v57  ;;  %4072 = vtanh.f32 %v2213_v10  ;;  %v7069_v57 = vld [vmem:[#allocation21_spill] sm:$0xff] }
 0x1d4   : > { %v6604_v0 = vpop.eup %4054  ;;  %v3090_v50 = vmul.f32 %v2791_v35, %v7067_v46  ;;  %v2576_v63 = vmul.f32 0.5, %v4053_v5  ;;  %v2216_v15 = vmul.f32 0.5, %v1855_v1  ;;  %4074 = vtanh.f32 %v2215_v55 }
 0x1d5   : > { %v6607_v27 = vpop.eup %4056  ;;  %3169 = vst [vmem:[%s6354_s12 + $0x8] sm:$0xff] %v3088_v11  ;;  %v3089_v16 = vmul.f32 %v2790_v51, %v7068_v12  ;;  %v2813_v42 = vadd.f32 0.5, %v2597_v36  ;;  %v1859_v10 = vadd.f32 %v6296_v39, %v6485_v3  ;;  %4076 = vtanh.f32 %v2214_v2  ;;  %v7070_v11 = vld [vmem:[#allocation33_spill] sm:$0xff]  ;;  %v7071_v12 = vld [vmem:[#allocation38_spill] sm:$0xff] }
 0x1d6   : > { %v4059_v24 = vpop.eup %4058  ;;  %3171 = vst [vmem:[%s6354_s12 + $0x18] sm:$0xff] %v3090_v50  ;;  %v2792_v7 = vadd.f32 0.5, %v2576_v63  ;;  %v1742_v52 = vadd.f32 %v6298_v31, %v6491_v49  ;;  %4078 = vtanh.f32 %v2216_v15  ;;  %v2237_v46 = vmul.f32 0.5, %v1740_v26 }
 0x1d7   : > { %v4061_v8 = vpop.eup %4060  ;;  %3170 = vst [vmem:[%s6354_s12 + $0x10] sm:$0xff] %v3089_v16  ;;  %v3097_v35 = vmul.f32 %v2813_v42, %v7069_v57  ;;  %v2599_v5 = vmul.f32 0.5, %v4059_v24  ;;  %v2239_v63 = vmul.f32 0.5, %v1859_v10  ;;  %v1861_v31 = vadd.f32 %v6302_v20, %v6513_v40  ;;  %v7072_v10 = vld [vmem:[#allocation36_spill] sm:$0xff] }
 0x1d8   : > { %v4063_v1 = vpop.eup %4062  ;;  %v3091_v51 = vmul.f32 %v2792_v7, %v7070_v11  ;;  %v2598_v36 = vmul.f32 0.5, %v4061_v8  ;;  %v2238_v16 = vmul.f32 0.5, %v1742_v52  ;;  %4080 = vtanh.f32 %v2237_v46  ;;  %v7073_v52 = vld [vmem:[#allocation37_spill] sm:$0xff]  ;;  %v7074_v46 = vld [vmem:[#allocation23_spill] sm:$0xff] }
 0x1d9   : > { %v4065_v43 = vpop.eup %4064  ;;  %3178 = vst [vmem:[%s6354_s12 + $0x50] sm:$0xff] %v3097_v35  ;;  %v2815_v50 = vadd.f32 0.5, %v2599_v5  ;;  %v2600_v39 = vmul.f32 0.5, %v4063_v1  ;;  %4082 = vtanh.f32 %v2239_v63  ;;  %v1746_v7 = vadd.f32 %v6306_v30, %v6479_v21 }
 0x1da   : > { %3172 = vst [vmem:[%s6354_s12 + $0x20] sm:$0xff] %v3091_v51  ;;  %v2814_v42 = vadd.f32 0.5, %v2598_v36  ;;  %v2621_v55 = vmul.f32 0.5, %v4065_v43  ;;  %v4067_v2 = vpop.eup %4066  ;;  %4084 = vtanh.f32 %v2238_v16  ;;  %v2240_v11 = vmul.f32 0.5, %v1861_v31  ;;  %v7076_v31 = vld [vmem:[#allocation42_spill] sm:$0xff] }
 0x1db   : > { %v3099_v24 = vmul.f32 %v2815_v50, %v7071_v12  ;;  %v2816_v15 = vadd.f32 0.5, %v2600_v39  ;;  %v4069_v26 = vpop.eup %4068  ;;  %v2623_v35 = vmul.f32 0.5, %v4067_v2  ;;  %v2261_v51 = vmul.f32 0.5, %v1746_v7 }
 0x1dc   : > { %v3098_v8 = vmul.f32 %v2814_v42, %v7072_v10  ;;  %v2837_v57 = vadd.f32 0.5, %v2621_v55  ;;  %v4071_v5 = vpop.eup %4070  ;;  %v2622_v1 = vmul.f32 0.5, %v4069_v26  ;;  %v1865_v39 = vadd.f32 %v6314_v61, %v6485_v3  ;;  %v7075_v42 = vld [vmem:[#allocation64_spill] sm:$0xff] }
 0x1dd   : > { %3180 = vst [vmem:[%s6354_s12 + $0x60] sm:$0xff] %v3099_v24  ;;  %v3100_v20 = vmul.f32 %v2816_v15, %v7073_v52  ;;  %v4073_v36 = vpop.eup %4072  ;;  %v2839_v30 = vadd.f32 0.5, %v2623_v35  ;;  %v2624_v50 = vmul.f32 0.5, %v4071_v5  ;;  %4086 = vtanh.f32 %v2240_v11  ;;  %v7077_v26 = vld [vmem:[#allocation40_spill] sm:$0xff]  ;;  %v7078_v5 = vld [vmem:[#allocation41_spill] sm:$0xff] }
 0x1de   : > { %3179 = vst [vmem:[%s6354_s12 + $0x58] sm:$0xff] %v3098_v8  ;;  %v3106_v43 = vmul.f32 %v2837_v57, %v7074_v46  ;;  %v2838_v63 = vadd.f32 0.5, %v2622_v1  ;;  %v2645_v16 = vmul.f32 0.5, %v4073_v36  ;;  %v1748_v55 = vadd.f32 %v7075_v42, %v6491_v49  ;;  %v4075_v2 = vpop.eup %4074  ;;  %v7079_v1 = vld [vmem:[#allocation66_spill] sm:$0xff] }
 0x1df   : > { %3181 = vst [vmem:[%s6354_s12 + $0x68] sm:$0xff] %v3100_v20  ;;  %v3108_v12 = vmul.f32 %v2839_v30, %v7076_v31  ;;  %v2840_v24 = vadd.f32 0.5, %v2624_v50  ;;  %4088 = vtanh.f32 %v2261_v51  ;;  %v2263_v15 = vmul.f32 0.5, %v1865_v39  ;;  %v4077_v7 = vpop.eup %4076  ;;  %v7080_v51 = vld [vmem:[#allocation25_spill] sm:$0xff] }
 0x1e0   : > { %3187 = vst [vmem:[%s6354_s12 + $0x98] sm:$0xff] %v3106_v43  ;;  %v3107_v10 = vmul.f32 %v2838_v63, %v7077_v26  ;;  %v2861_v61 = vadd.f32 0.5, %v2645_v16  ;;  %v2647_v8 = vmul.f32 0.5, %v4075_v2  ;;  %v2262_v57 = vmul.f32 0.5, %v1748_v55  ;;  %v4079_v35 = vpop.eup %4078  ;;  %v7081_v55 = vld [vmem:[#allocation46_spill] sm:$0xff]  ;;  %v7083_v26 = vld [vmem:[#allocation44_spill] sm:$0xff] }
 0x1e1   : > { %3189 = vst [vmem:[%s6354_s12 + $0xa8] sm:$0xff] %v3108_v12  ;;  %v3109_v52 = vmul.f32 %v2840_v24, %v7078_v5  ;;  %v2646_v20 = vmul.f32 0.5, %v4077_v7  ;;  %4090 = vtanh.f32 %v2263_v15  ;;  %v1867_v11 = vadd.f32 %v7079_v1, %v6513_v40  ;;  %v7082_v24 = vld [vmem:[#allocation72_spill] sm:$0xff]  ;;  %v7085_v1 = vld [vmem:[#allocation74_spill] sm:$0xff] }
 0x1e2   : > { %3188 = vst [vmem:[%s6354_s12 + $0xa0] sm:$0xff] %v3107_v10  ;;  %v3115_v36 = vmul.f32 %v2861_v61, %v7080_v51  ;;  %v2863_v46 = vadd.f32 0.5, %v2647_v8  ;;  %v2648_v43 = vmul.f32 0.5, %v4079_v35  ;;  %4092 = vtanh.f32 %v2262_v57  ;;  %v4081_v30 = vpop.eup %4080  ;;  %v7084_v8 = vld [vmem:[#allocation45_spill] sm:$0xff] }
 0x1e3   : > { %3190 = vst [vmem:[%s6354_s12 + $0xb0] sm:$0xff] %v3109_v52  ;;  %v2862_v50 = vadd.f32 0.5, %v2646_v20  ;;  %v2264_v39 = vmul.f32 0.5, %v1867_v11  ;;  %v1752_v63 = vadd.f32 %v6333_v4, %v6479_v21  ;;  %v1871_v16 = vadd.f32 %v6339_v34, %v6485_v3  ;;  %v4083_v42 = vpop.eup %4082 }
 0x1e4   : > { %3196 = vst [vmem:[%s6354_s12 + $0xe0] sm:$0xff] %v3115_v36  ;;  %v3117_v2 = vmul.f32 %v2863_v46, %v7081_v55  ;;  %v2864_v31 = vadd.f32 0.5, %v2648_v43  ;;  %v2669_v12 = vmul.f32 0.5, %v4081_v30  ;;  %v1754_v15 = vadd.f32 %v7082_v24, %v6491_v49  ;;  %v4085_v7 = vpop.eup %4084  ;;  %v7086_v36 = vld [vmem:[#allocation15_spill] sm:$0xff]  ;;  %v7087_v30 = vld [vmem:[#allocation76_spill] sm:$0xff] }
 0x1e5   : > { %v3116_v10 = vmul.f32 %v2862_v50, %v7083_v26  ;;  %v2671_v61 = vmul.f32 0.5, %v4083_v42  ;;  %4094 = vtanh.f32 %v2264_v39  ;;  %v2285_v4 = vmul.f32 0.5, %v1752_v63  ;;  %v7088_v63 = vld [vmem:[#allocation53_spill] sm:$0xff] }
 0x1e6   : > { %3198 = vst [vmem:[%s6354_s12 + $0xf0] sm:$0xff] %v3117_v2  ;;  %v3118_v34 = vmul.f32 %v2864_v31, %v7084_v8  ;;  %v2885_v57 = vadd.f32 0.5, %v2669_v12  ;;  %v2670_v35 = vmul.f32 0.5, %v4085_v7  ;;  %v2287_v5 = vmul.f32 0.5, %v1871_v16  ;;  %v7089_v2 = vld [vmem:[#allocation49_spill] sm:$0xff] }
 0x1e7   : > { %3197 = vst [vmem:[%s6354_s12 + $0xe8] sm:$0xff] %v3116_v10  ;;  %v2887_v52 = vadd.f32 0.5, %v2671_v61  ;;  %4096 = vtanh.f32 %v2285_v4  ;;  %v2286_v20 = vmul.f32 0.5, %v1754_v15  ;;  %v1873_v11 = vadd.f32 %v7085_v1, %v6513_v40  ;;  %v4087_v51 = vpop.eup %4086  ;;  %v7091_v1 = vld [vmem:[#allocation17_spill] sm:$0xff] }
 0x1e8   : > { %3199 = vst [vmem:[%s6354_s12 + $0xf8] sm:$0xff] %v3118_v34  ;;  %v3124_v46 = vmul.f32 %v2885_v57, %v7086_v36  ;;  %v2886_v43 = vadd.f32 0.5, %v2670_v35  ;;  %4098 = vtanh.f32 %v2287_v5  ;;  %v1758_v50 = vadd.f32 %v7087_v30, %v6479_v21  ;;  %v7090_v35 = vld [vmem:[#allocation50_spill] sm:$0xff] }
 0x1e9   : > { %v4089_v39 = vpop.eup %4088  ;;  %v3126_v16 = vmul.f32 %v2887_v52, %v7088_v63  ;;  %v2672_v42 = vmul.f32 0.5, %v4087_v51  ;;  %4100 = vtanh.f32 %v2286_v20  ;;  %v2288_v55 = vmul.f32 0.5, %v1873_v11 }
 0x1ea   : > { %3205 = vst [vmem:[%s6354_s12 + $0x128] sm:$0xff] %v3124_v46  ;;  %v3125_v31 = vmul.f32 %v2886_v43, %v7089_v2  ;;  %v2693_v12 = vmul.f32 0.5, %v4089_v39  ;;  %v2309_v24 = vmul.f32 0.5, %v1758_v50  ;;  %v1877_v15 = vadd.f32 %v6363_v38, %v6485_v3  ;;  %v7093_v50 = vld [vmem:[#allocation59_spill] sm:$0xff] }
 0x1eb   : > { %v4091_v7 = vpop.eup %4090  ;;  %3207 = vst [vmem:[%s6354_s12 + $0x138] sm:$0xff] %v3126_v16  ;;  %v2888_v26 = vadd.f32 0.5, %v2672_v42  ;;  %4102 = vtanh.f32 %v2288_v55  ;;  %v1760_v10 = vadd.f32 %v6365_v28, %v6491_v49  ;;  %v1879_v61 = vadd.f32 %v6367_v41, %v6513_v40  ;;  %v7092_v28 = vld [vmem:[#allocation77_spill] sm:$0xff] }
 0x1ec   : > { %v4093_v4 = vpop.eup %4092  ;;  %3206 = vst [vmem:[%s6354_s12 + $0x130] sm:$0xff] %v3125_v31  ;;  %v2909_v8 = vadd.f32 0.5, %v2693_v12  ;;  %v2695_v34 = vmul.f32 0.5, %v4091_v7  ;;  %4104 = vtanh.f32 %v2309_v24  ;;  %v2311_v57 = vmul.f32 0.5, %v1877_v15 }
 0x1ed   : > { %v3127_v38 = vmul.f32 %v2888_v26, %v7090_v35  ;;  %v2694_v5 = vmul.f32 0.5, %v4093_v4  ;;  %v2310_v52 = vmul.f32 0.5, %v1760_v10  ;;  %v2312_v20 = vmul.f32 0.5, %v1879_v61  ;;  %v7096_v10 = vld [vmem:[#allocation7_spill] sm:$0xff] }
 0x1ee   : > { %v3133_v11 = vmul.f32 %v2909_v8, %v7091_v1  ;;  %v2911_v51 = vadd.f32 0.5, %v2695_v34  ;;  %4106 = vtanh.f32 %v2311_v57  ;;  %v1764_v41 = vadd.f32 %v7092_v28, %v6479_v21  ;;  %v7094_v21 = vld [vmem:[#allocation13_spill] sm:$0xff] }
 0x1ef   : > { %v4095_v36 = vpop.eup %4094  ;;  %3208 = vst [vmem:[%s6354_s12 + $0x140] sm:$0xff] %v3127_v38  ;;  %v2910_v46 = vadd.f32 0.5, %v2694_v5  ;;  %4108 = vtanh.f32 %v2310_v52  ;;  %v1883_v43 = vadd.f32 %v6383_v62, %v6485_v3  ;;  %v1766_v30 = vadd.f32 %v6385_v33, %v6491_v49  ;;  %v7095_v33 = vld [vmem:[#allocation6_spill] sm:$0xff]  ;;  %v7098_v52 = vld [vmem:[#allocation27_spill] sm:$0xff] }
 0x1f0   : > { %3214 = vst [vmem:[%s6354_s12 + $0x170] sm:$0xff] %v3133_v11  ;;  %v3135_v39 = vmul.f32 %v2911_v51, %v7093_v50  ;;  %v2696_v63 = vmul.f32 0.5, %v4095_v36  ;;  %4110 = vtanh.f32 %v2312_v20  ;;  %v2333_v16 = vmul.f32 0.5, %v1764_v41  ;;  %v7099_v51 = vld [vmem:[#allocation8_spill] sm:$0xff]  ;;  %v7100_v41 = vld [vmem:[#allocation67_spill] sm:$0xff] }
 0x1f1   : > { %v4097_v42 = vpop.eup %4096  ;;  %v3134_v55 = vmul.f32 %v2910_v46, %v7094_v21  ;;  %v2335_v2 = vmul.f32 0.5, %v1883_v43  ;;  %v2334_v31 = vmul.f32 0.5, %v1766_v30  ;;  %v1885_v12 = vadd.f32 %v6391_v37, %v6513_v40  ;;  %v7097_v37 = vld [vmem:[#allocation58_spill] sm:$0xff] }
 0x1f2   : > { %v4099_v24 = vpop.eup %4098  ;;  %3216 = vst [vmem:[%s6354_s12 + $0x180] sm:$0xff] %v3135_v39  ;;  %v2912_v62 = vadd.f32 0.5, %v2696_v63  ;;  %v2717_v3 = vmul.f32 0.5, %v4097_v42  ;;  %4112 = vtanh.f32 %v2333_v16  ;;  %v6694_v49 = vrot.slane %v6460_v25, %v7095_v33  ;;  %v7102_v16 = vld [vmem:[#allocation9_spill] sm:$0xff] }
 0x1f3   : > { %v4101_v15 = vpop.eup %4100  ;;  %3215 = vst [vmem:[%s6354_s12 + $0x178] sm:$0xff] %v3134_v55  ;;  %v2719_v7 = vmul.f32 0.5, %v4099_v24  ;;  %4114 = vtanh.f32 %v2335_v2  ;;  %v2336_v26 = vmul.f32 0.5, %v1885_v12  ;;  %v6699_v61 = vrot.slane %v6460_v25, %v7096_v10  ;;  %v7103_v24 = vld [vmem:[#allocation65_spill] sm:$0xff] }
 0x1f4   : > { %v3136_v40 = vmul.f32 %v2912_v62, %v7097_v37  ;;  %v2933_v4 = vadd.f32 0.5, %v2717_v3  ;;  %v2718_v8 = vmul.f32 0.5, %v4101_v15  ;;  %4116 = vtanh.f32 %v2334_v31  ;;  %v7104_v33 = vld [vmem:[#allocation29_spill] sm:$0xff] }
 0x1f5   : > { %v4103_v34 = vpop.eup %4102  ;;  %v2935_v57 = vadd.f32 0.5, %v2719_v7  ;;  %4118 = vtanh.f32 %v2336_v26  ;;  %v1954_v35 = vadd.f32 %v6396_v60, %v6694_v49  ;;  %v2073_v38 = vadd.f32 %v6401_v18, %v6699_v61  ;;  %v7101_v18 = vld [vmem:[#allocation62_spill] sm:$0xff] }
 0x1f6   : > { %v4105_v5 = vpop.eup %4104  ;;  %3217 = vst [vmem:[%s6354_s12 + $0x188] sm:$0xff] %v3136_v40  ;;  %v3142_v20 = vmul.f32 %v2933_v4, %v7098_v52  ;;  %v2934_v1 = vadd.f32 0.5, %v2718_v8  ;;  %v2720_v11 = vmul.f32 0.5, %v4103_v34  ;;  %v6710_v28 = vrot.slane %v6460_v25, %v7099_v51  ;;  %v7105_v8 = vld [vmem:[#allocation71_spill] sm:$0xff]  ;;  %v7106_v52 = vld [vmem:[#allocation69_spill] sm:$0xff]  ;;  %v7107_v51 = vld [vmem:[#allocation70_spill] sm:$0xff] }
 0x1f7   : > { %v3144_v36 = vmul.f32 %v2935_v57, %v7100_v41  ;;  %v2741_v46 = vmul.f32 0.5, %v4105_v5  ;;  %v2145_v43 = vmul.f32 0.5, %v1954_v35  ;;  %v2147_v60 = vmul.f32 0.5, %v2073_v38 }
 0x1f8   : > { %v4107_v30 = vpop.eup %4106  ;;  %3223 = vst [vmem:[%s6354_s12 + $0x1b8] sm:$0xff] %v3142_v20  ;;  %v3143_v50 = vmul.f32 %v2934_v1, %v7101_v18  ;;  %v2936_v39 = vadd.f32 0.5, %v2720_v11  ;;  %v1956_v63 = vadd.f32 %v6403_v53, %v6710_v28  ;;  %v6719_v42 = vrot.slane %v6460_v25, %v7102_v16  ;;  %v7109_v16 = vld [vmem:[#allocation18_spill] sm:$0xff] }
 0x1f9   : > { %v4109_v21 = vpop.eup %4108  ;;  %3225 = vst [vmem:[%s6354_s12 + $0x1c8] sm:$0xff] %v3144_v36  ;;  %v2957_v55 = vadd.f32 0.5, %v2741_v46  ;;  %v2743_v2 = vmul.f32 0.5, %v4107_v30  ;;  %4120 = vtanh.f32 %v2145_v43  ;;  %v1960_v31 = vadd.f32 %v6424_v6, %v6694_v49  ;;  %v7108_v30 = vld [vmem:[#allocation31_spill] sm:$0xff] }
 0x1fa   : > { %v4111_v12 = vpop.eup %4110  ;;  %3224 = vst [vmem:[%s6354_s12 + $0x1c0] sm:$0xff] %v3143_v50  ;;  %v3145_v62 = vmul.f32 %v2936_v39, %v7103_v24  ;;  %v2742_v3 = vmul.f32 0.5, %v4109_v21  ;;  %4122 = vtanh.f32 %v2147_v60  ;;  %v2146_v53 = vmul.f32 0.5, %v1956_v63 }
 0x1fb   : > { %v3151_v25 = vmul.f32 %v2957_v55, %v7104_v33  ;;  %v2959_v15 = vadd.f32 0.5, %v2743_v2  ;;  %v2744_v7 = vmul.f32 0.5, %v4111_v12  ;;  %v2075_v26 = vadd.f32 %v6411_v19, %v6719_v42  ;;  %v7110_v12 = vld [vmem:[#allocation73_spill] sm:$0xff] }
 0x1fc   : > { %v4113_v10 = vpop.eup %4112  ;;  %3226 = vst [vmem:[%s6354_s12 + $0x1d0] sm:$0xff] %v3145_v62  ;;  %v2958_v37 = vadd.f32 0.5, %v2742_v3  ;;  %4124 = vtanh.f32 %v2146_v53  ;;  %v2169_v6 = vmul.f32 0.5, %v1960_v31  ;;  %v2079_v40 = vadd.f32 %v6429_v45, %v6699_v61 }
 0x1fd   : > { %v4115_v4 = vpop.eup %4114  ;;  %3232 = vst [vmem:[%s6354_s12 + $0x200] sm:$0xff] %v3151_v25  ;;  %v3153_v34 = vmul.f32 %v2959_v15, %v7105_v8  ;;  %v2960_v57 = vadd.f32 0.5, %v2744_v7  ;;  %v2765_v35 = vmul.f32 0.5, %v4113_v10  ;;  %v2148_v38 = vmul.f32 0.5, %v2075_v26 }
 0x1fe   : > { %v4117_v5 = vpop.eup %4116  ;;  %v3152_v19 = vmul.f32 %v2958_v37, %v7106_v52  ;;  %v2767_v20 = vmul.f32 0.5, %v4115_v4  ;;  %4126 = vtanh.f32 %v2169_v6  ;;  %v2171_v1 = vmul.f32 0.5, %v2079_v40  ;;  %v7113_v52 = vld [vmem:[#allocation20_spill] sm:$0xff] }
 0x1ff   : > { %v4119_v11 = vpop.eup %4118  ;;  %3234 = vst [vmem:[%s6354_s12 + $0x210] sm:$0xff] %v3153_v34  ;;  %v3154_v41 = vmul.f32 %v2960_v57, %v7107_v51  ;;  %v2981_v45 = vadd.f32 0.5, %v2765_v35  ;;  %v2766_v36 = vmul.f32 0.5, %v4117_v5  ;;  %4128 = vtanh.f32 %v2148_v38  ;;  %v7112_v57 = vld [vmem:[#allocation35_spill] sm:$0xff] }
 0x200   : > { %3233 = vst [vmem:[%s6354_s12 + $0x208] sm:$0xff] %v3152_v19  ;;  %v2983_v46 = vadd.f32 0.5, %v2767_v20  ;;  %v2768_v43 = vmul.f32 0.5, %v4119_v11  ;;  %4130 = vtanh.f32 %v2171_v1  ;;  %v1962_v60 = vadd.f32 %v6431_v48, %v6710_v28 }
 0x201   : > { %3235 = vst [vmem:[%s6354_s12 + $0x218] sm:$0xff] %v3154_v41  ;;  %v3160_v18 = vmul.f32 %v2981_v45, %v7108_v30  ;;  %v2982_v50 = vadd.f32 0.5, %v2766_v36  ;;  %v2081_v39 = vadd.f32 %v6435_v44, %v6719_v42  ;;  %v1966_v63 = vadd.f32 %v6444_v32, %v6694_v49  ;;  %v7111_v32 = vld [vmem:[#allocation75_spill] sm:$0xff]  ;;  %v7114_v41 = vld [vmem:[#allocation26_spill] sm:$0xff] }
 0x202   : > { %v3162_v21 = vmul.f32 %v2983_v46, %v7109_v16  ;;  %v2984_v55 = vadd.f32 0.5, %v2768_v43  ;;  %v2170_v2 = vmul.f32 0.5, %v1962_v60  ;;  %v2085_v31 = vadd.f32 %v6446_v23, %v6699_v61 }
 0x203   : > { %v4121_v48 = vpop.eup %4120  ;;  %3241 = vst [vmem:[%s6354_s12 + $0x248] sm:$0xff] %v3160_v18  ;;  %v3161_v24 = vmul.f32 %v2982_v50, %v7110_v12  ;;  %v2172_v62 = vmul.f32 0.5, %v2081_v39  ;;  %v2193_v3 = vmul.f32 0.5, %v1966_v63  ;;  %v1968_v44 = vadd.f32 %v6448_v9, %v6710_v28  ;;  %v7115_v18 = vld [vmem:[#allocation2_spill] sm:$0xff]  ;;  %v7116_v39 = vld [vmem:[#allocation39_spill] sm:$0xff] }
 0x204   : > { %v4123_v53 = vpop.eup %4122  ;;  %3243 = vst [vmem:[%s6354_s12 + $0x258] sm:$0xff] %v3162_v21  ;;  %v3163_v33 = vmul.f32 %v2984_v55, %v7111_v32  ;;  %v2577_v25 = vmul.f32 0.5, %v4121_v48  ;;  %4132 = vtanh.f32 %v2170_v2  ;;  %v2195_v15 = vmul.f32 0.5, %v2085_v31  ;;  %v7118_v21 = vld [vmem:[#allocation5_spill] sm:$0xff]  ;;  %v7119_v31 = vld [vmem:[#allocation78_spill] sm:$0xff] }
 0x205   : > { %3242 = vst [vmem:[%s6354_s12 + $0x250] sm:$0xff] %v3161_v24  ;;  %v2579_v7 = vmul.f32 0.5, %v4123_v53  ;;  %4134 = vtanh.f32 %v2172_v62  ;;  %v2194_v23 = vmul.f32 0.5, %v1968_v44  ;;  %v2087_v26 = vadd.f32 %v6452_v54, %v6719_v42  ;;  %v7120_v24 = vld [vmem:[#allocation16_spill] sm:$0xff] }
 0x206   : > { %v4125_v10 = vpop.eup %4124  ;;  %3244 = vst [vmem:[%s6354_s12 + $0x260] sm:$0xff] %v3163_v33  ;;  %v2793_v37 = vadd.f32 0.5, %v2577_v25  ;;  %4136 = vtanh.f32 %v2193_v3  ;;  %v1972_v9 = vadd.f32 %v6466_v22, %v6694_v49  ;;  %v2091_v6 = vadd.f32 %v6473_v14, %v6699_v61  ;;  %v7121_v44 = vld [vmem:[#allocation80_spill] sm:$0xff] }
 0x207   : > { %v2795_v40 = vadd.f32 0.5, %v2579_v7  ;;  %v2578_v4 = vmul.f32 0.5, %v4125_v10  ;;  %4138 = vtanh.f32 %v2195_v15  ;;  %v2196_v8 = vmul.f32 0.5, %v2087_v26 }
 0x208   : > { %v4127_v34 = vpop.eup %4126  ;;  %v3092_v35 = vmul.f32 %v2793_v37, %v7112_v57  ;;  %4140 = vtanh.f32 %v2194_v23  ;;  %v2217_v54 = vmul.f32 0.5, %v1972_v9  ;;  %v2219_v38 = vmul.f32 0.5, %v2091_v6  ;;  %v7122_v9 = vld [vmem:[#allocation87_spill] sm:$0xff] }
 0x209   : > { %v4129_v5 = vpop.eup %4128  ;;  %v3094_v19 = vmul.f32 %v2795_v40, %v7113_v52  ;;  %v2794_v20 = vadd.f32 0.5, %v2578_v4  ;;  %v2601_v22 = vmul.f32 0.5, %v4127_v34  ;;  %4142 = vtanh.f32 %v2196_v8  ;;  %v7123_v34 = vld [vmem:[#allocation48_spill] sm:$0xff] }
 0x20a   : > { %v4131_v14 = vpop.eup %4130  ;;  %3173 = vst [vmem:[%s6354_s12 + $0x28] sm:$0xff] %v3092_v35  ;;  %v2580_v1 = vmul.f32 0.5, %v4129_v5  ;;  %4144 = vtanh.f32 %v2217_v54  ;;  %v1974_v11 = vadd.f32 %v6475_v13, %v6710_v28  ;;  %v2093_v51 = vadd.f32 %v6481_v47, %v6719_v42  ;;  %v7117_v47 = vld [vmem:[#allocation3_spill] sm:$0xff] }
 0x20b   : > { %3175 = vst [vmem:[%s6354_s12 + $0x38] sm:$0xff] %v3094_v19  ;;  %v3093_v45 = vmul.f32 %v2794_v20, %v7114_v41  ;;  %v2817_v36 = vadd.f32 0.5, %v2601_v22  ;;  %v2603_v46 = vmul.f32 0.5, %v4131_v14  ;;  %4146 = vtanh.f32 %v2219_v38  ;;  %v7124_v54 = vld [vmem:[#allocation79_spill] sm:$0xff]  ;;  %v7125_v20 = vld [vmem:[#allocation22_spill] sm:$0xff] }
 0x20c   : > { %v2796_v43 = vadd.f32 0.5, %v2580_v1  ;;  %v2218_v60 = vmul.f32 0.5, %v1974_v11  ;;  %v2220_v30 = vmul.f32 0.5, %v2093_v51  ;;  %v1978_v50 = vadd.f32 %v7115_v18, %v6694_v49  ;;  %v7126_v41 = vld [vmem:[#allocation43_spill] sm:$0xff] }
 0x20d   : > { %3174 = vst [vmem:[%s6354_s12 + $0x30] sm:$0xff] %v3093_v45  ;;  %v3101_v63 = vmul.f32 %v2817_v36, %v7116_v39  ;;  %v2819_v13 = vadd.f32 0.5, %v2603_v46  ;;  %v2097_v16 = vadd.f32 %v7117_v47, %v6699_v61  ;;  %v1980_v55 = vadd.f32 %v7118_v21, %v6710_v28  ;;  %v7128_v39 = vld [vmem:[#allocation81_spill] sm:$0xff]  ;;  %v7129_v21 = vld [vmem:[#allocation82_spill] sm:$0xff] }
 0x20e   : > { %v4133_v2 = vpop.eup %4132  ;;  %v3095_v48 = vmul.f32 %v2796_v43, %v7119_v31  ;;  %4148 = vtanh.f32 %v2218_v60  ;;  %v2241_v12 = vmul.f32 0.5, %v1978_v50  ;;  %v2099_v62 = vadd.f32 %v7120_v24, %v6719_v42  ;;  %v7127_v60 = vld [vmem:[#allocation83_spill] sm:$0xff]  ;;  %v7130_v31 = vld [vmem:[#allocation89_spill] sm:$0xff] }
 0x20f   : > { %v4135_v3 = vpop.eup %4134  ;;  %3182 = vst [vmem:[%s6354_s12 + $0x70] sm:$0xff] %v3101_v63  ;;  %v3103_v53 = vmul.f32 %v2819_v13, %v7121_v44  ;;  %v2602_v32 = vmul.f32 0.5, %v4133_v2  ;;  %4150 = vtanh.f32 %v2220_v30  ;;  %v2243_v33 = vmul.f32 0.5, %v2097_v16 }
 0x210   : > { %v4137_v25 = vpop.eup %4136  ;;  %3176 = vst [vmem:[%s6354_s12 + $0x40] sm:$0xff] %v3095_v48  ;;  %v2604_v15 = vmul.f32 0.5, %v4135_v3  ;;  %4152 = vtanh.f32 %v2241_v12  ;;  %v2242_v7 = vmul.f32 0.5, %v1980_v55  ;;  %v2244_v23 = vmul.f32 0.5, %v2099_v62  ;;  %v7131_v62 = vld [vmem:[#allocation47_spill] sm:$0xff] }
 0x211   : > { %v4139_v26 = vpop.eup %4138  ;;  %3184 = vst [vmem:[%s6354_s12 + $0x80] sm:$0xff] %v3103_v53  ;;  %v2818_v10 = vadd.f32 0.5, %v2602_v32  ;;  %v2625_v37 = vmul.f32 0.5, %v4137_v25  ;;  %4154 = vtanh.f32 %v2243_v33  ;;  %v1984_v6 = vadd.f32 %v7122_v9, %v6694_v49  ;;  %v7132_v33 = vld [vmem:[#allocation84_spill] sm:$0xff] }
 0x212   : > { %v4141_v40 = vpop.eup %4140  ;;  %v2820_v4 = vadd.f32 0.5, %v2604_v15  ;;  %v2627_v8 = vmul.f32 0.5, %v4139_v26  ;;  %4156 = vtanh.f32 %v2242_v7  ;;  %v2103_v57 = vadd.f32 %v7123_v34, %v6699_v61 }
 0x213   : > { %v4143_v35 = vpop.eup %4142  ;;  %v3102_v38 = vmul.f32 %v2818_v10, %v7124_v54  ;;  %v2841_v5 = vadd.f32 0.5, %v2625_v37  ;;  %v2626_v52 = vmul.f32 0.5, %v4141_v40  ;;  %4158 = vtanh.f32 %v2244_v23  ;;  %v7134_v54 = vld [vmem:[#allocation12_spill] sm:$0xff] }
 0x214   : > { %v4145_v19 = vpop.eup %4144  ;;  %v3104_v22 = vmul.f32 %v2820_v4, %v7125_v20  ;;  %v2843_v14 = vadd.f32 0.5, %v2627_v8  ;;  %v2628_v1 = vmul.f32 0.5, %v4143_v35  ;;  %v2265_v11 = vmul.f32 0.5, %v1984_v6  ;;  %v7133_v8 = vld [vmem:[#allocation24_spill] sm:$0xff] }
 0x215   : > { %v4147_v51 = vpop.eup %4146  ;;  %3183 = vst [vmem:[%s6354_s12 + $0x78] sm:$0xff] %v3102_v38  ;;  %v3110_v45 = vmul.f32 %v2841_v5, %v7126_v41  ;;  %v2842_v36 = vadd.f32 0.5, %v2626_v52  ;;  %v2649_v46 = vmul.f32 0.5, %v4145_v19  ;;  %v2267_v43 = vmul.f32 0.5, %v2103_v57  ;;  %v7135_v19 = vld [vmem:[#allocation11_spill] sm:$0xff] }
 0x216   : > { %3185 = vst [vmem:[%s6354_s12 + $0x88] sm:$0xff] %v3104_v22  ;;  %v3112_v30 = vmul.f32 %v2843_v14, %v7127_v60  ;;  %v2844_v18 = vadd.f32 0.5, %v2628_v1  ;;  %v2651_v50 = vmul.f32 0.5, %v4147_v51  ;;  %4160 = vtanh.f32 %v2265_v11  ;;  %v7137_v51 = vld [vmem:[#allocation90_spill] sm:$0xff] }
 0x217   : > { %3191 = vst [vmem:[%s6354_s12 + $0xb8] sm:$0xff] %v3110_v45  ;;  %v3111_v63 = vmul.f32 %v2842_v36, %v7128_v39  ;;  %v2865_v13 = vadd.f32 0.5, %v2649_v46  ;;  %4162 = vtanh.f32 %v2267_v43  ;;  %v1986_v47 = vadd.f32 %v6529_v56, %v6710_v28  ;;  %v7138_v36 = vld [vmem:[#allocation93_spill] sm:$0xff]  ;;  %v7139_v43 = vld [vmem:[#allocation56_spill] sm:$0xff] }
 0x218   : > { %v4149_v16 = vpop.eup %4148  ;;  %3193 = vst [vmem:[%s6354_s12 + $0xc8] sm:$0xff] %v3112_v30  ;;  %v3113_v55 = vmul.f32 %v2844_v18, %v7129_v21  ;;  %v2867_v2 = vadd.f32 0.5, %v2651_v50  ;;  %v2105_v48 = vadd.f32 %v7130_v31, %v6719_v42  ;;  %v1990_v12 = vadd.f32 %v6542_v29, %v6694_v49  ;;  %v7140_v18 = vld [vmem:[#allocation85_spill] sm:$0xff] }
 0x219   : > { %v4151_v24 = vpop.eup %4150  ;;  %3192 = vst [vmem:[%s6354_s12 + $0xc0] sm:$0xff] %v3111_v63  ;;  %v3119_v3 = vmul.f32 %v2865_v13, %v7131_v62  ;;  %v2650_v44 = vmul.f32 0.5, %v4149_v16  ;;  %v2266_v53 = vmul.f32 0.5, %v1986_v47  ;;  %v2109_v56 = vadd.f32 %v6551_v17, %v6699_v61  ;;  %v7141_v13 = vld [vmem:[#allocation86_spill] sm:$0xff]  ;;  %v7142_v31 = vld [vmem:[#allocation57_spill] sm:$0xff] }
 0x21a   : > { %v4153_v32 = vpop.eup %4152  ;;  %3194 = vst [vmem:[%s6354_s12 + $0xd0] sm:$0xff] %v3113_v55  ;;  %v3121_v25 = vmul.f32 %v2867_v2, %v7132_v33  ;;  %v2652_v15 = vmul.f32 0.5, %v4151_v24  ;;  %v2268_v7 = vmul.f32 0.5, %v2105_v48  ;;  %v2289_v23 = vmul.f32 0.5, %v1990_v12  ;;  %v7143_v12 = vld [vmem:[#allocation10_spill] sm:$0xff] }
 0x21b   : > { %v4155_v26 = vpop.eup %4154  ;;  %3200 = vst [vmem:[%s6354_s12 + $0x100] sm:$0xff] %v3119_v3  ;;  %v2866_v29 = vadd.f32 0.5, %v2650_v44  ;;  %v2673_v10 = vmul.f32 0.5, %v4153_v32  ;;  %4164 = vtanh.f32 %v2266_v53  ;;  %v2291_v37 = vmul.f32 0.5, %v2109_v56  ;;  %v7144_v44 = vld [vmem:[#allocation30_spill] sm:$0xff]  ;;  %v7145_v32 = vld [vmem:[#allocation60_spill] sm:$0xff] }
 0x21c   : > { %v4157_v9 = vpop.eup %4156  ;;  %3202 = vst [vmem:[%s6354_s12 + $0x110] sm:$0xff] %v3121_v25  ;;  %v2868_v6 = vadd.f32 0.5, %v2652_v15  ;;  %v2675_v40 = vmul.f32 0.5, %v4155_v26  ;;  %4166 = vtanh.f32 %v2268_v7  ;;  %v1992_v17 = vadd.f32 %v6553_v59, %v6710_v28  ;;  %v7136_v59 = vld [vmem:[#allocation54_spill] sm:$0xff] }
 0x21d   : > { %v4159_v4 = vpop.eup %4158  ;;  %v3120_v34 = vmul.f32 %v2866_v29, %v7133_v8  ;;  %v2889_v57 = vadd.f32 0.5, %v2673_v10  ;;  %v2674_v35 = vmul.f32 0.5, %v4157_v9  ;;  %4168 = vtanh.f32 %v2289_v23  ;;  %v7146_v23 = vld [vmem:[#allocation55_spill] sm:$0xff] }
 0x21e   : > { %v3122_v38 = vmul.f32 %v2868_v6, %v7134_v54  ;;  %v2891_v5 = vadd.f32 0.5, %v2675_v40  ;;  %v2676_v52 = vmul.f32 0.5, %v4159_v4  ;;  %4170 = vtanh.f32 %v2291_v37  ;;  %v7149_v4 = vld [vmem:[#allocation4_spill] sm:$0xff] }
 0x21f   : > { %3201 = vst [vmem:[%s6354_s12 + $0x108] sm:$0xff] %v3120_v34  ;;  %v3128_v20 = vmul.f32 %v2889_v57, %v7135_v19  ;;  %v2890_v22 = vadd.f32 0.5, %v2674_v35  ;;  %v2290_v14 = vmul.f32 0.5, %v1992_v17  ;;  %v2111_v1 = vadd.f32 %v7136_v59, %v6719_v42 }
 0x220   : > { %v4161_v11 = vpop.eup %4160  ;;  %3203 = vst [vmem:[%s6354_s12 + $0x118] sm:$0xff] %v3122_v38  ;;  %v3130_v41 = vmul.f32 %v2891_v5, %v7137_v51  ;;  %v2892_v45 = vadd.f32 0.5, %v2676_v52  ;;  %v1996_v46 = vadd.f32 %v7138_v36, %v6694_v49  ;;  %v2115_v60 = vadd.f32 %v7139_v43, %v6699_v61  ;;  %v7150_v5 = vld [vmem:[#allocation91_spill] sm:$0xff]  ;;  %v7155_v43 = vld [vmem:[#allocation61_spill] sm:$0xff] }
 0x221   : > { %v4163_v30 = vpop.eup %4162  ;;  %3209 = vst [vmem:[%s6354_s12 + $0x148] sm:$0xff] %v3128_v20  ;;  %v3129_v50 = vmul.f32 %v2890_v22, %v7140_v18  ;;  %v2697_v39 = vmul.f32 0.5, %v4161_v11  ;;  %4172 = vtanh.f32 %v2290_v14  ;;  %v2292_v63 = vmul.f32 0.5, %v2111_v1  ;;  %v7152_v14 = vld [vmem:[#allocation92_spill] sm:$0xff] }
 0x222   : > { %3211 = vst [vmem:[%s6354_s12 + $0x158] sm:$0xff] %v3130_v41  ;;  %v3131_v47 = vmul.f32 %v2892_v45, %v7141_v13  ;;  %v2699_v16 = vmul.f32 0.5, %v4163_v30  ;;  %v2313_v21 = vmul.f32 0.5, %v1996_v46  ;;  %v2315_v55 = vmul.f32 0.5, %v2115_v60  ;;  %v7153_v11 = vld [vmem:[#allocation88_spill] sm:$0xff] }
 0x223   : > { %3210 = vst [vmem:[%s6354_s12 + $0x150] sm:$0xff] %v3129_v50  ;;  %v2913_v2 = vadd.f32 0.5, %v2697_v39  ;;  %4174 = vtanh.f32 %v2292_v63  ;;  %v1998_v48 = vadd.f32 %v7142_v31, %v6710_v28  ;;  %v2117_v24 = vadd.f32 %v7143_v12, %v6719_v42  ;;  %v7154_v41 = vld [vmem:[#allocation68_spill] sm:$0xff] }
 0x224   : > { %3212 = vst [vmem:[%s6354_s12 + $0x160] sm:$0xff] %v3131_v47  ;;  %v2915_v62 = vadd.f32 0.5, %v2699_v16  ;;  %4176 = vtanh.f32 %v2313_v21  ;;  %v2002_v3 = vadd.f32 %v6588_v58, %v6694_v49  ;;  %v2121_v53 = vadd.f32 %v7144_v44, %v6699_v61  ;;  %v7147_v58 = vld [vmem:[#allocation95_spill] sm:$0xff]  ;;  %v7148_v61 = vld [vmem:[#allocation96_spill] sm:$0xff]  ;;  %v7157_v21 = vld [vmem:[#allocation14_spill] sm:$0xff] }
 0x225   : > { %v4165_v56 = vpop.eup %4164  ;;  %v3137_v33 = vmul.f32 %v2913_v2, %v7145_v32  ;;  %4178 = vtanh.f32 %v2315_v55  ;;  %v2314_v25 = vmul.f32 0.5, %v1998_v48  ;;  %v2316_v15 = vmul.f32 0.5, %v2117_v24  ;;  %v7156_v39 = vld [vmem:[#allocation52_spill] sm:$0xff]  ;;  %v7158_v44 = vld [vmem:[#allocation63_spill] sm:$0xff] }
 0x226   : > { %v4167_v7 = vpop.eup %4166  ;;  %v3139_v26 = vmul.f32 %v2915_v62, %v7146_v23  ;;  %v2698_v29 = vmul.f32 0.5, %v4165_v56  ;;  %v2337_v10 = vmul.f32 0.5, %v2002_v3  ;;  %v2339_v37 = vmul.f32 0.5, %v2121_v53  ;;  %v7159_v56 = vld [vmem:[#allocation51_spill] sm:$0xff] }
 0x227   : > { %v4169_v9 = vpop.eup %4168  ;;  %3218 = vst [vmem:[%s6354_s12 + $0x190] sm:$0xff] %v3137_v33  ;;  %v2700_v6 = vmul.f32 0.5, %v4167_v7  ;;  %4180 = vtanh.f32 %v2314_v25  ;;  %v2004_v49 = vadd.f32 %v7147_v58, %v6710_v28  ;;  %v2123_v40 = vadd.f32 %v7148_v61, %v6719_v42  ;;  %v7151_v42 = vld [vmem:[#allocation94_spill] sm:$0xff] }
 0x228   : > { %v4171_v17 = vpop.eup %4170  ;;  %v2713_v8 = vmul.f32 0.5, %v7149_v4  ;;  %3220 = vst [vmem:[%s6354_s12 + $0x1a0] sm:$0xff] %v3139_v26  ;;  %v2914_v34 = vadd.f32 0.5, %v2698_v29  ;;  %v2721_v57 = vmul.f32 0.5, %v4169_v9  ;;  %4182 = vtanh.f32 %v2316_v15 }
 0x229   : > { %v2916_v35 = vadd.f32 0.5, %v2700_v6  ;;  %v2723_v54 = vmul.f32 0.5, %v4171_v17  ;;  %4184 = vtanh.f32 %v2337_v10  ;;  %v2338_v38 = vmul.f32 0.5, %v2004_v49  ;;  %v7160_v49 = vld [vmem:[#allocation28_spill] sm:$0xff] }
 0x22a   : > { %v3138_v52 = vmul.f32 %v2914_v34, %v7150_v5  ;;  %v2937_v19 = vadd.f32 0.5, %v2721_v57  ;;  %4186 = vtanh.f32 %v2339_v37  ;;  %v2340_v28 = vmul.f32 0.5, %v2123_v40 }
 0x22b   : > { %v4173_v20 = vpop.eup %4172  ;;  %v2930_v22 = vadd.f32 0.5, %v7151_v42  ;;  %v3140_v59 = vmul.f32 %v2916_v35, %v7152_v14  ;;  %v2939_v1 = vadd.f32 0.5, %v2723_v54  ;;  %4188 = vtanh.f32 %v2338_v38 }
 0x22c   : > { %v2715_v51 = vmul.f32 0.5, %v7153_v11  ;;  %3219 = vst [vmem:[%s6354_s12 + $0x198] sm:$0xff] %v3138_v52  ;;  %v3146_v45 = vmul.f32 %v2937_v19, %v7154_v41  ;;  %v2722_v36 = vmul.f32 0.5, %v4173_v20  ;;  %4190 = vtanh.f32 %v2340_v28 }
 0x22d   : > { %v4175_v46 = vpop.eup %4174  ;;  %v2736_v60 = vmul.f32 0.5, %v7155_v43  ;;  %3221 = vst [vmem:[%s6354_s12 + $0x1a8] sm:$0xff] %v3140_v59  ;;  %v3148_v30 = vmul.f32 %v2939_v1, %v2930_v22  ;;  %v2929_v50 = vadd.f32 0.5, %v2713_v8  ;;  %v2738_v63 = vmul.f32 0.5, %v7156_v39 }
 0x22e   : > { %v4177_v18 = vpop.eup %4176  ;;  %3227 = vst [vmem:[%s6354_s12 + $0x1d8] sm:$0xff] %v3146_v45  ;;  %v2938_v13 = vadd.f32 0.5, %v2722_v36  ;;  %v2724_v47 = vmul.f32 0.5, %v4175_v46  ;;  %v2737_v55 = vmul.f32 0.5, %v7157_v21  ;;  %v2931_v31 = vadd.f32 0.5, %v2715_v51 }
 0x22f   : > { %v4179_v16 = vpop.eup %4178  ;;  %3229 = vst [vmem:[%s6354_s12 + $0x1e8] sm:$0xff] %v3148_v30  ;;  %v2745_v2 = vmul.f32 0.5, %v4177_v18  ;;  %v2952_v3 = vadd.f32 0.5, %v2736_v60  ;;  %v2760_v53 = vmul.f32 0.5, %v7158_v44  ;;  %v2739_v32 = vmul.f32 0.5, %v7159_v56 }
 0x230   : > { %v3147_v48 = vmul.f32 %v2938_v13, %v2929_v50  ;;  %v2940_v12 = vadd.f32 0.5, %v2724_v47  ;;  %v2747_v24 = vmul.f32 0.5, %v4179_v16  ;;  %v2954_v15 = vadd.f32 0.5, %v2738_v63 }
 0x231   : > { %v4181_v62 = vpop.eup %4180  ;;  %v2961_v33 = vadd.f32 0.5, %v2745_v2  ;;  %v2953_v10 = vadd.f32 0.5, %v2737_v55  ;;  %v2762_v37 = vmul.f32 0.5, %v6607_v27  ;;  %v2761_v61 = vmul.f32 0.5, %v7160_v49 }
 0x232   : > { %v4183_v25 = vpop.eup %4182  ;;  %3228 = vst [vmem:[%s6354_s12 + $0x1e0] sm:$0xff] %v3147_v48  ;;  %v3149_v7 = vmul.f32 %v2940_v12, %v2931_v31  ;;  %v2963_v23 = vadd.f32 0.5, %v2747_v24  ;;  %v2746_v26 = vmul.f32 0.5, %v4181_v62  ;;  %v2955_v34 = vadd.f32 0.5, %v2739_v32 }
 0x233   : > { %v4185_v29 = vpop.eup %4184  ;;  %v3155_v9 = vmul.f32 %v2961_v33, %v2952_v3  ;;  %v2748_v6 = vmul.f32 0.5, %v4183_v25  ;;  %v2763_v57 = vmul.f32 0.5, %v6604_v0  ;;  %v2976_v38 = vadd.f32 0.5, %v2760_v53 }
 0x234   : > { %v4187_v58 = vpop.eup %4186  ;;  %3230 = vst [vmem:[%s6354_s12 + $0x1f0] sm:$0xff] %v3149_v7  ;;  %v3157_v40 = vmul.f32 %v2963_v23, %v2954_v15  ;;  %v2962_v17 = vadd.f32 0.5, %v2746_v26  ;;  %v2769_v4 = vmul.f32 0.5, %v4185_v29  ;;  %v2978_v28 = vadd.f32 0.5, %v2762_v37 }
 0x235   : > { %v4189_v8 = vpop.eup %4188  ;;  %3236 = vst [vmem:[%s6354_s12 + $0x220] sm:$0xff] %v3155_v9  ;;  %v2964_v35 = vadd.f32 0.5, %v2748_v6  ;;  %v2771_v54 = vmul.f32 0.5, %v4187_v58  ;;  %v2977_v14 = vadd.f32 0.5, %v2761_v61  ;;  %v2979_v1 = vadd.f32 0.5, %v2763_v57 }
 0x236   : > { %v4191_v27 = vpop.eup %4190  ;;  %3238 = vst [vmem:[%s6354_s12 + $0x230] sm:$0xff] %v3157_v40  ;;  %v3156_v5 = vmul.f32 %v2962_v17, %v2953_v10  ;;  %v2985_v52 = vadd.f32 0.5, %v2769_v4  ;;  %v2770_v19 = vmul.f32 0.5, %v4189_v8 }
 0x237   : > { %v3158_v20 = vmul.f32 %v2964_v35, %v2955_v34  ;;  %v2987_v42 = vadd.f32 0.5, %v2771_v54  ;;  %v2772_v22 = vmul.f32 0.5, %v4191_v27 }
 0x238   : > { %3237 = vst [vmem:[%s6354_s12 + $0x228] sm:$0xff] %v3156_v5  ;;  %v3164_v0 = vmul.f32 %v2985_v52, %v2976_v38  ;;  %v2986_v59 = vadd.f32 0.5, %v2770_v19 }
 0x239   : > { %3239 = vst [vmem:[%s6354_s12 + $0x238] sm:$0xff] %v3158_v20  ;;  %v3166_v11 = vmul.f32 %v2987_v42, %v2978_v28  ;;  %v2988_v51 = vadd.f32 0.5, %v2772_v22 }
 0x23a   : > { %3245 = vst [vmem:[%s6354_s12 + $0x268] sm:$0xff] %v3164_v0  ;;  %v3165_v41 = vmul.f32 %v2986_v59, %v2977_v14 }
 0x23b   : > { %3247 = vst [vmem:[%s6354_s12 + $0x278] sm:$0xff] %v3166_v11  ;;  %v3167_v45 = vmul.f32 %v2988_v51, %v2979_v1 }
 0x23c   : > { %3246 = vst [vmem:[%s6354_s12 + $0x270] sm:$0xff] %v3165_v41 }
 0x23d   : > { %3248 = vst [vmem:[%s6354_s12 + $0x280] sm:$0xff] %v3167_v45 }
 0x23e PF: > { %s16_s18 = sadd.s32 1, %s4208_s18  }
 0x23f   : > { %p13_p4 = scmp.ge.s32.totalorder %s16_s18, 4  }
 0x241   :  { %15 = sbr.rel (!%p13_p4) target bundleno = 1 (0x1), region = 78 }

</bundles_post_ra>
